<compile_context>
chip_gen: v7x
topology: tpu7x:2x2x1
jax: 0.10.0
libtpu: 0.0.40
codegen_flags: <defaults>
</compile_context>

<pallas_src>
import functools

import jax
import jax.numpy as jnp
from jax.experimental import pallas as pl
from jax.experimental.pallas import tpu as pltpu


# ----------------------------------------------------------------------------
# Pallas kernel: both LSTM directions, interleaved, over one time-chunk
# ----------------------------------------------------------------------------
def bilstm_kernel(gx_ref, whh_ref, out_ref, h_scr, c_scr, *, hidden, chunk):
    """Grid = (time_chunk,)  -- sequential carry along the single grid axis.

    gx_ref  : (2, chunk, B, 4H) bf16  precomputed x@W_ih + b for this chunk.
              Direction 1 is already time-REVERSED by the wrapper, so both
              directions walk the chunk in ascending local order (one shared body).
    whh_ref : (2, H, 4H)       bf16   recurrent weights (resident across grid steps)
    out_ref : (2, chunk, B, H) bf16   hidden states (dir 1 in reversed-time order)
    h_scr/c_scr : (2, B, H) f32 VMEM  carried state, persists across grid steps.
    """
    t = pl.program_id(0)

    @pl.when(t == 0)
    def _():
        h_scr[...] = jnp.zeros_like(h_scr)
        c_scr[...] = jnp.zeros_like(c_scr)

    H = hidden
    whh = [whh_ref[0], whh_ref[1]]     # (H, 4H) bf16 each, resident in VMEM
    hs = [h_scr[0], h_scr[1]]          # f32 carries
    cs = [c_scr[0], c_scr[1]]

    # Fully unrolled static loop over the chunk.  Per step the two directions'
    # matmuls are independent -> issued back-to-back they fill the MXU pipeline and
    # overlap one direction's VPU/EUP gate math with the other's MXU push.
    # NOTE: B rows of the matmul are essentially free up to the systolic height
    # (128 on v5e, 256 on v6e/v7x) -- batch more sequences per call when possible.
    for k in range(chunk):
        gates = [
            gx_ref[d, k].astype(jnp.float32)
            + jnp.dot(hs[d].astype(jnp.bfloat16), whh[d],
                      preferred_element_type=jnp.float32)
            for d in range(2)
        ]
        for d in range(2):
            g = gates[d]
            if H % 128 == 0:
                # Lane-aligned H: each gate slice is a full-width vreg slab.
                i_g = jax.nn.sigmoid(g[:, 0 * H:1 * H])
                f_g = jax.nn.sigmoid(g[:, 1 * H:2 * H])
                g_g = jnp.tanh(g[:, 2 * H:3 * H])
                o_g = jax.nn.sigmoid(g[:, 3 * H:4 * H])
            else:
                # H < 128: two full-vreg EUP passes instead of four sub-width ones.
                sg = jax.nn.sigmoid(g)
                th = jnp.tanh(g)
                i_g = sg[:, 0 * H:1 * H]
                f_g = sg[:, 1 * H:2 * H]
                g_g = th[:, 2 * H:3 * H]
                o_g = sg[:, 3 * H:4 * H]
            cs[d] = f_g * cs[d] + i_g * g_g          # f32 state math
            hs[d] = o_g * jnp.tanh(cs[d])
            out_ref[d, k] = hs[d].astype(out_ref.dtype)

    h_scr[0] = hs[0]
    h_scr[1] = hs[1]
    c_scr[0] = cs[0]
    c_scr[1] = cs[1]


# ----------------------------------------------------------------------------
# Wrapper: one bidirectional LSTM layer (both directions fused & interleaved)
# ----------------------------------------------------------------------------
def _pick_chunk(T, B, H, *, cap=32, vmem_budget=12 * 1024 * 1024):
    """Chunk sized so double-buffered gx/out blocks stay inside scoped VMEM on every
    generation (v5e 16 MiB default scoped ... v7x 64 MiB physical)."""
    bytes_per_step = 2 * B * (4 * H + H) * 2        # both dirs, gx + out, bf16
    max_chunk = max(1, vmem_budget // (2 * bytes_per_step))   # x2: double buffering
    return max(1, min(T, cap, max_chunk))


def bilstm_layer(gx, whh_bf16, *, chunk):
    """gx: (2, Tp, B, 4H) bf16, direction 1 already time-reversed.
    Returns (2, Tp, B, H) bf16 (direction 1 still in reversed-time order)."""
    _, Tp, B, G = gx.shape
    H = whh_bf16.shape[1]
    assert Tp % chunk == 0
    n_chunks = Tp // chunk

    return pl.pallas_call(
        functools.partial(bilstm_kernel, hidden=H, chunk=chunk),
        out_shape=jax.ShapeDtypeStruct((2, Tp, B, H), jnp.bfloat16),
        grid=(n_chunks,),
        in_specs=[
            pl.BlockSpec((2, chunk, B, G), lambda t: (0, t, 0, 0)),  # gate chunk
            pl.BlockSpec((2, H, G), lambda t: (0, 0, 0)),            # W_hh resident
        ],
        out_specs=pl.BlockSpec((2, chunk, B, H), lambda t: (0, t, 0, 0)),
        scratch_shapes=[
            pltpu.VMEM((2, B, H), jnp.float32),   # h carry (both directions)
            pltpu.VMEM((2, B, H), jnp.float32),   # c carry
        ],
        compiler_params=pltpu.CompilerParams(
            dimension_semantics=("arbitrary",),
            vmem_limit_bytes=32 << 20),
    )(gx, whh_bf16)


# ----------------------------------------------------------------------------
# Full forward pass (matches PyTorch BRNN.forward with zero initial state)
# ----------------------------------------------------------------------------
def brnn_forward(x, params):
    """x: (B, T, I) batch-first, like the PyTorch module. Returns (B, num_classes)."""
    B, T, _ = x.shape
    H = params["lstm"][0]["w_hh_t"].shape[1]
    chunk = _pick_chunk(T, B, H)
    Tp = ((T + chunk - 1) // chunk) * chunk

    hf = hb = None
    for li, lp in enumerate(params["lstm"]):
        wih = lp["w_ih_t"]   # (2, in, 4H) f32
        whh = lp["w_hh_t"]   # (2, H, 4H)  f32
        b = lp["b"]          # (2, 4H)     f32
        H = whh.shape[1]
        if li == 0:
            # One big batched input projection for all T and both directions; the
            # bti->tb reorder fuses into the einsum (no separate HBM transpose).
            gx = jnp.einsum("bti,dig->dtbg", x, wih,
                            preferred_element_type=jnp.float32) + b[:, None, None, :]
        else:
            # Avoid materializing concat([h_fwd, h_bwd]): split W_ih into two dot-adds.
            wih_f = wih[:, :H, :]
            wih_b = wih[:, H:, :]
            gx = (jnp.einsum("tbh,dhg->dtbg", hf, wih_f,
                             preferred_element_type=jnp.float32)
                  + jnp.einsum("tbh,dhg->dtbg", hb, wih_b,
                               preferred_element_type=jnp.float32)
                  + b[:, None, None, :])
        gx = gx.astype(jnp.bfloat16)    # halve the HBM round-trip of the gate tensor
        if Tp != T:
            # Zero-GATE padding keeps (h, c) exactly zero through padded steps
            # (i*g = 0.5*tanh(0) = 0, f*c = 0.5*0 = 0), so real outputs are unchanged.
            gx = jnp.concatenate(
                [gx, jnp.zeros((2, Tp - T, B, gx.shape[-1]), gx.dtype)], axis=1)
        # Reverse the backward direction's time axis ONCE in XLA so the kernel uses
        # a single shared ascending-order body for both directions.
        gx = jnp.stack([gx[0], gx[1, ::-1]], axis=0)

        out = bilstm_layer(gx, whh.astype(jnp.bfloat16), chunk=chunk)
        hf = out[0, :T]           # (T, B, H) time-aligned, bf16
        hb = out[1, ::-1][:T]     # un-reverse backward direction, drop padding

    # fc(out[:, -1, :]) = fc(concat(h_fwd[T-1], h_bwd[T-1])) -- tiny, plain XLA.
    w_fc = params["fc"]["w_t"]   # (2H, C)
    logits = (hf[T - 1].astype(jnp.float32) @ w_fc[:H]
              + hb[T - 1].astype(jnp.float32) @ w_fc[H:]
              + params["fc"]["b"])
    return logits


# ----------------------------------------------------------------------------
# Deterministic parameter construction (PyTorch-style uniform(-1/sqrt(H), 1/sqrt(H)))
# ----------------------------------------------------------------------------
def init_params(key, input_size, hidden_size, num_layers, num_classes):
    H = hidden_size
    k = 1.0 / (H ** 0.5)
    params = {"lstm": []}
    for layer in range(num_layers):
        in_size = input_size if layer == 0 else 2 * H
        wihs, whhs, bs = [], [], []
        for _ in range(2):  # fwd, bwd
            key, k1, k2, k3, k4 = jax.random.split(key, 5)
            w_ih = jax.random.uniform(k1, (4 * H, in_size), jnp.float32, -k, k)
            w_hh = jax.random.uniform(k2, (4 * H, H), jnp.float32, -k, k)
            b_ih = jax.random.uniform(k3, (4 * H,), jnp.float32, -k, k)
            b_hh = jax.random.uniform(k4, (4 * H,), jnp.float32, -k, k)
            wihs.append(w_ih.T)        # (in, 4H)
            whhs.append(w_hh.T)        # (H, 4H)
            bs.append(b_ih + b_hh)     # (4H,)
        params["lstm"].append({
            "w_ih_t": jnp.stack(wihs),  # (2, in, 4H)
            "w_hh_t": jnp.stack(whhs),  # (2, H, 4H)
            "b": jnp.stack(bs),         # (2, 4H)
        })
    key, k1, k2 = jax.random.split(key, 3)
    kf = 1.0 / ((2 * H) ** 0.5)
    w_fc = jax.random.uniform(k1, (num_classes, 2 * H), jnp.float32, -kf, kf)
    b_fc = jax.random.uniform(k2, (num_classes,), jnp.float32, -kf, kf)
    params["fc"] = {"w_t": w_fc.T, "b": b_fc}
    return params


# ----------------------------------------------------------------------------
# Pure-JAX f32 reference (for correctness sanity check)
# ----------------------------------------------------------------------------
def _lstm_dir_ref(x_tbi, w_ih_t, w_hh_t, b, reverse):
    T, B, _ = x_tbi.shape
    H = w_hh_t.shape[0]
    xs = x_tbi[::-1] if reverse else x_tbi

    def step(carry, x):
        h, c = carry
        gates = x @ w_ih_t + h @ w_hh_t + b
        i, f, g, o = jnp.split(gates, 4, axis=-1)
        c = jax.nn.sigmoid(f) * c + jax.nn.sigmoid(i) * jnp.tanh(g)
        h = jax.nn.sigmoid(o) * jnp.tanh(c)
        return (h, c), h

    init = (jnp.zeros((B, H), jnp.float32), jnp.zeros((B, H), jnp.float32))
    _, hs = jax.lax.scan(step, init, xs)
    return hs[::-1] if reverse else hs


def brnn_forward_ref(x, params):
    layer_in = jnp.transpose(x, (1, 0, 2))
    for lp in params["lstm"]:
        hf = _lstm_dir_ref(layer_in, lp["w_ih_t"][0], lp["w_hh_t"][0], lp["b"][0], False)
        hb = _lstm_dir_ref(layer_in, lp["w_ih_t"][1], lp["w_hh_t"][1], lp["b"][1], True)
        layer_in = jnp.concatenate([hf, hb], axis=-1)
    return layer_in[-1] @ params["fc"]["w_t"] + params["fc"]["b"]


# ----------------------------------------------------------------------------
if __name__ == "__main__":
    # small shapes consistent with the module's forward (B, T, input_size);
    # H is a multiple of 128 so gate slices / per-step stores are lane-dense
    # (the module's default 256 also satisfies this).
    B, T = 8, 8
    INPUT_SIZE = 28
    HIDDEN_SIZE = 128
    NUM_LAYERS = 2
    NUM_CLASSES = 10

    root = jax.random.PRNGKey(0)
    kx, kp = jax.random.split(root)
    x = jax.random.normal(kx, (B, T, INPUT_SIZE), jnp.float32)
    params = init_params(kp, INPUT_SIZE, HIDDEN_SIZE, NUM_LAYERS, NUM_CLASSES)

    fwd = jax.jit(brnn_forward)
    out = jax.block_until_ready(fwd(x, params))
    ref = jax.block_until_ready(brnn_forward_ref(x, params))

    assert out.shape == (B, NUM_CLASSES)
    # bf16 matmul operands / bf16 HBM intermediates -> looser tolerance vs f32 ref.
    err = float(jnp.max(jnp.abs(out - ref)))
    assert jnp.allclose(out, ref, atol=3e-2, rtol=3e-2), \
        f"Pallas kernel mismatch vs reference (max abs err {err})"

    print("KERNEL_OK")
</pallas_src>

<mosaic_0001>
module attributes {stable_mosaic.version = 11 : i64} {
  func.func @bilstm_kernel(%arg0: i32, %arg1: memref<2x8x8x512xbf16, #tpu.memory_space<vmem>>, %arg2: memref<2x128x512xbf16, #tpu.memory_space<vmem>>, %arg3: memref<2x8x8x128xbf16, #tpu.memory_space<vmem>>, %arg4: memref<2x8x128xf32, #tpu.memory_space<vmem>>, %arg5: memref<2x8x128xf32, #tpu.memory_space<vmem>>) attributes {dimension_semantics = [#tpu.dimension_semantics<arbitrary>], iteration_bounds = array<i64: 1>, scalar_prefetch = 0 : i64, scratch_operands = 2 : i64, tpu.core_type = #tpu.core_type<tc>, window_params = [{transform_indices = @transform_0, window_bounds = array<i64: 2, 8, 8, 512>}, {pipeline_mode = #tpu.pipeline_mode<synchronous>, transform_indices = @transform_1, window_bounds = array<i64: 2, 128, 512>}, {transform_indices = @transform_2, window_bounds = array<i64: 2, 8, 8, 128>}]} {
    %c0_i32 = arith.constant 0 : i32
    %0 = arith.cmpi eq, %arg0, %c0_i32 : i32
    %1 = arith.extui %0 : i1 to i32
    %c0_i32_0 = arith.constant 0 : i32
    %2 = arith.cmpi ne, %1, %c0_i32_0 : i32
    scf.if %2 {
      %cst_214 = arith.constant 0.000000e+00 : f32
      %587 = vector.broadcast %cst_214 : f32 to vector<2x8x128xf32>
      %c0_215 = arith.constant 0 : index
      %c0_216 = arith.constant 0 : index
      %c0_217 = arith.constant 0 : index
      %588 = vector.load %arg4[%c0_215, %c0_216, %c0_217] : memref<2x8x128xf32, #tpu.memory_space<vmem>>, vector<2x8x128xf32>
      tpu.vector_store %arg4[%c0_215, %c0_216, %c0_217], %587 {strides = array<i32>} : memref<2x8x128xf32, #tpu.memory_space<vmem>>, vector<2x8x128xf32>,
      %cst_218 = arith.constant 0.000000e+00 : f32
      %589 = vector.broadcast %cst_218 : f32 to vector<2x8x128xf32>
      %c0_219 = arith.constant 0 : index
      %c0_220 = arith.constant 0 : index
      %c0_221 = arith.constant 0 : index
      %590 = vector.load %arg5[%c0_219, %c0_220, %c0_221] : memref<2x8x128xf32, #tpu.memory_space<vmem>>, vector<2x8x128xf32>
      tpu.vector_store %arg5[%c0_219, %c0_220, %c0_221], %589 {strides = array<i32>} : memref<2x8x128xf32, #tpu.memory_space<vmem>>, vector<2x8x128xf32>,
    } else {
    }
    %c0 = arith.constant 0 : index
    %c0_1 = arith.constant 0 : index
    %c0_2 = arith.constant 0 : index
    %3 = vector.load %arg2[%c0, %c0_1, %c0_2] : memref<2x128x512xbf16, #tpu.memory_space<vmem>>, vector<1x128x512xbf16>
    %4 = vector.shape_cast %3 : vector<1x128x512xbf16> to vector<128x512xbf16>
    %c1 = arith.constant 1 : index
    %c0_3 = arith.constant 0 : index
    %c0_4 = arith.constant 0 : index
    %5 = vector.load %arg2[%c1, %c0_3, %c0_4] : memref<2x128x512xbf16, #tpu.memory_space<vmem>>, vector<1x128x512xbf16>
    %6 = vector.shape_cast %5 : vector<1x128x512xbf16> to vector<128x512xbf16>
    %c0_5 = arith.constant 0 : index
    %c0_6 = arith.constant 0 : index
    %c0_7 = arith.constant 0 : index
    %7 = vector.load %arg4[%c0_5, %c0_6, %c0_7] : memref<2x8x128xf32, #tpu.memory_space<vmem>>, vector<1x8x128xf32>
    %8 = vector.shape_cast %7 : vector<1x8x128xf32> to vector<8x128xf32>
    %c1_8 = arith.constant 1 : index
    %c0_9 = arith.constant 0 : index
    %c0_10 = arith.constant 0 : index
    %9 = vector.load %arg4[%c1_8, %c0_9, %c0_10] : memref<2x8x128xf32, #tpu.memory_space<vmem>>, vector<1x8x128xf32>
    %10 = vector.shape_cast %9 : vector<1x8x128xf32> to vector<8x128xf32>
    %c0_11 = arith.constant 0 : index
    %c0_12 = arith.constant 0 : index
    %c0_13 = arith.constant 0 : index
    %11 = vector.load %arg5[%c0_11, %c0_12, %c0_13] : memref<2x8x128xf32, #tpu.memory_space<vmem>>, vector<1x8x128xf32>
    %12 = vector.shape_cast %11 : vector<1x8x128xf32> to vector<8x128xf32>
    %c1_14 = arith.constant 1 : index
    %c0_15 = arith.constant 0 : index
    %c0_16 = arith.constant 0 : index
    %13 = vector.load %arg5[%c1_14, %c0_15, %c0_16] : memref<2x8x128xf32, #tpu.memory_space<vmem>>, vector<1x8x128xf32>
    %14 = vector.shape_cast %13 : vector<1x8x128xf32> to vector<8x128xf32>
    %c0_17 = arith.constant 0 : index
    %c0_18 = arith.constant 0 : index
    %c0_19 = arith.constant 0 : index
    %c0_20 = arith.constant 0 : index
    %15 = vector.load %arg1[%c0_17, %c0_18, %c0_19, %c0_20] : memref<2x8x8x512xbf16, #tpu.memory_space<vmem>>, vector<1x1x8x512xbf16>
    %16 = vector.shape_cast %15 : vector<1x1x8x512xbf16> to vector<8x512xbf16>
    %17 = arith.extf %16 : vector<8x512xbf16> to vector<8x512xf32>
    %18 = arith.truncf %8 : vector<8x128xf32> to vector<8x128xbf16>
    %cst = arith.constant dense<0.000000e+00> : vector<8x512xf32>
    %19 = tpu.matmul %18, %4, %cst {dimension_numbers = #tpu.dot_dimension_numbers<[1], [0], [0], [1], [0, 0, 1, 1], [], []>} : vector<8x128xbf16>, vector<128x512xbf16>, vector<8x512xf32> -> vector<8x512xf32>
    %20 = arith.addf %17, %19 : vector<8x512xf32>
    %c1_21 = arith.constant 1 : index
    %c0_22 = arith.constant 0 : index
    %c0_23 = arith.constant 0 : index
    %c0_24 = arith.constant 0 : index
    %21 = vector.load %arg1[%c1_21, %c0_22, %c0_23, %c0_24] : memref<2x8x8x512xbf16, #tpu.memory_space<vmem>>, vector<1x1x8x512xbf16>
    %22 = vector.shape_cast %21 : vector<1x1x8x512xbf16> to vector<8x512xbf16>
    %23 = arith.extf %22 : vector<8x512xbf16> to vector<8x512xf32>
    %24 = arith.truncf %10 : vector<8x128xf32> to vector<8x128xbf16>
    %cst_25 = arith.constant dense<0.000000e+00> : vector<8x512xf32>
    %25 = tpu.matmul %24, %6, %cst_25 {dimension_numbers = #tpu.dot_dimension_numbers<[1], [0], [0], [1], [0, 0, 1, 1], [], []>} : vector<8x128xbf16>, vector<128x512xbf16>, vector<8x512xf32> -> vector<8x512xf32>
    %26 = arith.addf %23, %25 : vector<8x512xf32>
    %27 = vector.extract_strided_slice %20 {offsets = [0, 0], sizes = [8, 128], strides = [1, 1]} : vector<8x512xf32> to vector<8x128xf32>
    %28 = arith.negf %27 : vector<8x128xf32>
    %29 = math.exp %28 : vector<8x128xf32>
    %cst_26 = arith.constant 1.000000e+00 : f32
    %30 = vector.broadcast %cst_26 : f32 to vector<8x128xf32>
    %31 = arith.addf %30, %29 : vector<8x128xf32>
    %32 = arith.divf %30, %31 : vector<8x128xf32>
    %33 = vector.extract_strided_slice %20 {offsets = [0, 128], sizes = [8, 128], strides = [1, 1]} : vector<8x512xf32> to vector<8x128xf32>
    %34 = arith.negf %33 : vector<8x128xf32>
    %35 = math.exp %34 : vector<8x128xf32>
    %cst_27 = arith.constant 1.000000e+00 : f32
    %36 = vector.broadcast %cst_27 : f32 to vector<8x128xf32>
    %37 = arith.addf %36, %35 : vector<8x128xf32>
    %38 = arith.divf %36, %37 : vector<8x128xf32>
    %39 = vector.extract_strided_slice %20 {offsets = [0, 256], sizes = [8, 128], strides = [1, 1]} : vector<8x512xf32> to vector<8x128xf32>
    %40 = math.tanh %39 : vector<8x128xf32>
    %41 = vector.extract_strided_slice %20 {offsets = [0, 384], sizes = [8, 128], strides = [1, 1]} : vector<8x512xf32> to vector<8x128xf32>
    %42 = arith.negf %41 : vector<8x128xf32>
    %43 = math.exp %42 : vector<8x128xf32>
    %cst_28 = arith.constant 1.000000e+00 : f32
    %44 = vector.broadcast %cst_28 : f32 to vector<8x128xf32>
    %45 = arith.addf %44, %43 : vector<8x128xf32>
    %46 = arith.divf %44, %45 : vector<8x128xf32>
    %47 = arith.mulf %38, %12 : vector<8x128xf32>
    %48 = arith.mulf %32, %40 : vector<8x128xf32>
    %49 = arith.addf %47, %48 : vector<8x128xf32>
    %50 = math.tanh %49 : vector<8x128xf32>
    %51 = arith.mulf %46, %50 : vector<8x128xf32>
    %52 = arith.truncf %51 : vector<8x128xf32> to vector<8x128xbf16>
    %c0_29 = arith.constant 0 : index
    %c0_30 = arith.constant 0 : index
    %c0_31 = arith.constant 0 : index
    %c0_32 = arith.constant 0 : index
    %53 = vector.load %arg3[%c0_29, %c0_30, %c0_31, %c0_32] : memref<2x8x8x128xbf16, #tpu.memory_space<vmem>>, vector<1x1x8x128xbf16>
    %54 = vector.shape_cast %53 : vector<1x1x8x128xbf16> to vector<8x128xbf16>
    %55 = vector.shape_cast %52 : vector<8x128xbf16> to vector<1x1x8x128xbf16>
    tpu.vector_store %arg3[%c0_29, %c0_30, %c0_31, %c0_32], %55 {strides = array<i32>} : memref<2x8x8x128xbf16, #tpu.memory_space<vmem>>, vector<1x1x8x128xbf16>,
    %56 = vector.extract_strided_slice %26 {offsets = [0, 0], sizes = [8, 128], strides = [1, 1]} : vector<8x512xf32> to vector<8x128xf32>
    %57 = arith.negf %56 : vector<8x128xf32>
    %58 = math.exp %57 : vector<8x128xf32>
    %cst_33 = arith.constant 1.000000e+00 : f32
    %59 = vector.broadcast %cst_33 : f32 to vector<8x128xf32>
    %60 = arith.addf %59, %58 : vector<8x128xf32>
    %61 = arith.divf %59, %60 : vector<8x128xf32>
    %62 = vector.extract_strided_slice %26 {offsets = [0, 128], sizes = [8, 128], strides = [1, 1]} : vector<8x512xf32> to vector<8x128xf32>
    %63 = arith.negf %62 : vector<8x128xf32>
    %64 = math.exp %63 : vector<8x128xf32>
    %cst_34 = arith.constant 1.000000e+00 : f32
    %65 = vector.broadcast %cst_34 : f32 to vector<8x128xf32>
    %66 = arith.addf %65, %64 : vector<8x128xf32>
    %67 = arith.divf %65, %66 : vector<8x128xf32>
    %68 = vector.extract_strided_slice %26 {offsets = [0, 256], sizes = [8, 128], strides = [1, 1]} : vector<8x512xf32> to vector<8x128xf32>
    %69 = math.tanh %68 : vector<8x128xf32>
    %70 = vector.extract_strided_slice %26 {offsets = [0, 384], sizes = [8, 128], strides = [1, 1]} : vector<8x512xf32> to vector<8x128xf32>
    %71 = arith.negf %70 : vector<8x128xf32>
    %72 = math.exp %71 : vector<8x128xf32>
    %cst_35 = arith.constant 1.000000e+00 : f32
    %73 = vector.broadcast %cst_35 : f32 to vector<8x128xf32>
    %74 = arith.addf %73, %72 : vector<8x128xf32>
    %75 = arith.divf %73, %74 : vector<8x128xf32>
    %76 = arith.mulf %67, %14 : vector<8x128xf32>
    %77 = arith.mulf %61, %69 : vector<8x128xf32>
    %78 = arith.addf %76, %77 : vector<8x128xf32>
    %79 = math.tanh %78 : vector<8x128xf32>
    %80 = arith.mulf %75, %79 : vector<8x128xf32>
    %81 = arith.truncf %80 : vector<8x128xf32> to vector<8x128xbf16>
    %c1_36 = arith.constant 1 : index
    %c0_37 = arith.constant 0 : index
    %c0_38 = arith.constant 0 : index
    %c0_39 = arith.constant 0 : index
    %82 = vector.load %arg3[%c1_36, %c0_37, %c0_38, %c0_39] : memref<2x8x8x128xbf16, #tpu.memory_space<vmem>>, vector<1x1x8x128xbf16>
    %83 = vector.shape_cast %82 : vector<1x1x8x128xbf16> to vector<8x128xbf16>
    %84 = vector.shape_cast %81 : vector<8x128xbf16> to vector<1x1x8x128xbf16>
    tpu.vector_store %arg3[%c1_36, %c0_37, %c0_38, %c0_39], %84 {strides = array<i32>} : memref<2x8x8x128xbf16, #tpu.memory_space<vmem>>, vector<1x1x8x128xbf16>,
    %c0_40 = arith.constant 0 : index
    %c1_41 = arith.constant 1 : index
    %c0_42 = arith.constant 0 : index
    %c0_43 = arith.constant 0 : index
    %85 = vector.load %arg1[%c0_40, %c1_41, %c0_42, %c0_43] : memref<2x8x8x512xbf16, #tpu.memory_space<vmem>>, vector<1x1x8x512xbf16>
    %86 = vector.shape_cast %85 : vector<1x1x8x512xbf16> to vector<8x512xbf16>
    %87 = arith.extf %86 : vector<8x512xbf16> to vector<8x512xf32>
    %88 = arith.truncf %51 : vector<8x128xf32> to vector<8x128xbf16>
    %cst_44 = arith.constant dense<0.000000e+00> : vector<8x512xf32>
    %89 = tpu.matmul %88, %4, %cst_44 {dimension_numbers = #tpu.dot_dimension_numbers<[1], [0], [0], [1], [0, 0, 1, 1], [], []>} : vector<8x128xbf16>, vector<128x512xbf16>, vector<8x512xf32> -> vector<8x512xf32>
    %90 = arith.addf %87, %89 : vector<8x512xf32>
    %c1_45 = arith.constant 1 : index
    %c1_46 = arith.constant 1 : index
    %c0_47 = arith.constant 0 : index
    %c0_48 = arith.constant 0 : index
    %91 = vector.load %arg1[%c1_45, %c1_46, %c0_47, %c0_48] : memref<2x8x8x512xbf16, #tpu.memory_space<vmem>>, vector<1x1x8x512xbf16>
    %92 = vector.shape_cast %91 : vector<1x1x8x512xbf16> to vector<8x512xbf16>
    %93 = arith.extf %92 : vector<8x512xbf16> to vector<8x512xf32>
    %94 = arith.truncf %80 : vector<8x128xf32> to vector<8x128xbf16>
    %cst_49 = arith.constant dense<0.000000e+00> : vector<8x512xf32>
    %95 = tpu.matmul %94, %6, %cst_49 {dimension_numbers = #tpu.dot_dimension_numbers<[1], [0], [0], [1], [0, 0, 1, 1], [], []>} : vector<8x128xbf16>, vector<128x512xbf16>, vector<8x512xf32> -> vector<8x512xf32>
    %96 = arith.addf %93, %95 : vector<8x512xf32>
    %97 = vector.extract_strided_slice %90 {offsets = [0, 0], sizes = [8, 128], strides = [1, 1]} : vector<8x512xf32> to vector<8x128xf32>
    %98 = arith.negf %97 : vector<8x128xf32>
    %99 = math.exp %98 : vector<8x128xf32>
    %cst_50 = arith.constant 1.000000e+00 : f32
    %100 = vector.broadcast %cst_50 : f32 to vector<8x128xf32>
    %101 = arith.addf %100, %99 : vector<8x128xf32>
    %102 = arith.divf %100, %101 : vector<8x128xf32>
    %103 = vector.extract_strided_slice %90 {offsets = [0, 128], sizes = [8, 128], strides = [1, 1]} : vector<8x512xf32> to vector<8x128xf32>
    %104 = arith.negf %103 : vector<8x128xf32>
    %105 = math.exp %104 : vector<8x128xf32>
    %cst_51 = arith.constant 1.000000e+00 : f32
    %106 = vector.broadcast %cst_51 : f32 to vector<8x128xf32>
    %107 = arith.addf %106, %105 : vector<8x128xf32>
    %108 = arith.divf %106, %107 : vector<8x128xf32>
    %109 = vector.extract_strided_slice %90 {offsets = [0, 256], sizes = [8, 128], strides = [1, 1]} : vector<8x512xf32> to vector<8x128xf32>
    %110 = math.tanh %109 : vector<8x128xf32>
    %111 = vector.extract_strided_slice %90 {offsets = [0, 384], sizes = [8, 128], strides = [1, 1]} : vector<8x512xf32> to vector<8x128xf32>
    %112 = arith.negf %111 : vector<8x128xf32>
    %113 = math.exp %112 : vector<8x128xf32>
    %cst_52 = arith.constant 1.000000e+00 : f32
    %114 = vector.broadcast %cst_52 : f32 to vector<8x128xf32>
    %115 = arith.addf %114, %113 : vector<8x128xf32>
    %116 = arith.divf %114, %115 : vector<8x128xf32>
    %117 = arith.mulf %108, %49 : vector<8x128xf32>
    %118 = arith.mulf %102, %110 : vector<8x128xf32>
    %119 = arith.addf %117, %118 : vector<8x128xf32>
    %120 = math.tanh %119 : vector<8x128xf32>
    %121 = arith.mulf %116, %120 : vector<8x128xf32>
    %122 = arith.truncf %121 : vector<8x128xf32> to vector<8x128xbf16>
    %c0_53 = arith.constant 0 : index
    %c1_54 = arith.constant 1 : index
    %c0_55 = arith.constant 0 : index
    %c0_56 = arith.constant 0 : index
    %123 = vector.load %arg3[%c0_53, %c1_54, %c0_55, %c0_56] : memref<2x8x8x128xbf16, #tpu.memory_space<vmem>>, vector<1x1x8x128xbf16>
    %124 = vector.shape_cast %123 : vector<1x1x8x128xbf16> to vector<8x128xbf16>
    %125 = vector.shape_cast %122 : vector<8x128xbf16> to vector<1x1x8x128xbf16>
    tpu.vector_store %arg3[%c0_53, %c1_54, %c0_55, %c0_56], %125 {strides = array<i32>} : memref<2x8x8x128xbf16, #tpu.memory_space<vmem>>, vector<1x1x8x128xbf16>,
    %126 = vector.extract_strided_slice %96 {offsets = [0, 0], sizes = [8, 128], strides = [1, 1]} : vector<8x512xf32> to vector<8x128xf32>
    %127 = arith.negf %126 : vector<8x128xf32>
    %128 = math.exp %127 : vector<8x128xf32>
    %cst_57 = arith.constant 1.000000e+00 : f32
    %129 = vector.broadcast %cst_57 : f32 to vector<8x128xf32>
    %130 = arith.addf %129, %128 : vector<8x128xf32>
    %131 = arith.divf %129, %130 : vector<8x128xf32>
    %132 = vector.extract_strided_slice %96 {offsets = [0, 128], sizes = [8, 128], strides = [1, 1]} : vector<8x512xf32> to vector<8x128xf32>
    %133 = arith.negf %132 : vector<8x128xf32>
    %134 = math.exp %133 : vector<8x128xf32>
    %cst_58 = arith.constant 1.000000e+00 : f32
    %135 = vector.broadcast %cst_58 : f32 to vector<8x128xf32>
    %136 = arith.addf %135, %134 : vector<8x128xf32>
    %137 = arith.divf %135, %136 : vector<8x128xf32>
    %138 = vector.extract_strided_slice %96 {offsets = [0, 256], sizes = [8, 128], strides = [1, 1]} : vector<8x512xf32> to vector<8x128xf32>
    %139 = math.tanh %138 : vector<8x128xf32>
    %140 = vector.extract_strided_slice %96 {offsets = [0, 384], sizes = [8, 128], strides = [1, 1]} : vector<8x512xf32> to vector<8x128xf32>
    %141 = arith.negf %140 : vector<8x128xf32>
    %142 = math.exp %141 : vector<8x128xf32>
    %cst_59 = arith.constant 1.000000e+00 : f32
    %143 = vector.broadcast %cst_59 : f32 to vector<8x128xf32>
    %144 = arith.addf %143, %142 : vector<8x128xf32>
    %145 = arith.divf %143, %144 : vector<8x128xf32>
    %146 = arith.mulf %137, %78 : vector<8x128xf32>
    %147 = arith.mulf %131, %139 : vector<8x128xf32>
    %148 = arith.addf %146, %147 : vector<8x128xf32>
    %149 = math.tanh %148 : vector<8x128xf32>
    %150 = arith.mulf %145, %149 : vector<8x128xf32>
    %151 = arith.truncf %150 : vector<8x128xf32> to vector<8x128xbf16>
    %c1_60 = arith.constant 1 : index
    %c1_61 = arith.constant 1 : index
    %c0_62 = arith.constant 0 : index
    %c0_63 = arith.constant 0 : index
    %152 = vector.load %arg3[%c1_60, %c1_61, %c0_62, %c0_63] : memref<2x8x8x128xbf16, #tpu.memory_space<vmem>>, vector<1x1x8x128xbf16>
    %153 = vector.shape_cast %152 : vector<1x1x8x128xbf16> to vector<8x128xbf16>
    %154 = vector.shape_cast %151 : vector<8x128xbf16> to vector<1x1x8x128xbf16>
    tpu.vector_store %arg3[%c1_60, %c1_61, %c0_62, %c0_63], %154 {strides = array<i32>} : memref<2x8x8x128xbf16, #tpu.memory_space<vmem>>, vector<1x1x8x128xbf16>,
    %c0_64 = arith.constant 0 : index
    %c2 = arith.constant 2 : index
    %c0_65 = arith.constant 0 : index
    %c0_66 = arith.constant 0 : index
    %155 = vector.load %arg1[%c0_64, %c2, %c0_65, %c0_66] : memref<2x8x8x512xbf16, #tpu.memory_space<vmem>>, vector<1x1x8x512xbf16>
    %156 = vector.shape_cast %155 : vector<1x1x8x512xbf16> to vector<8x512xbf16>
    %157 = arith.extf %156 : vector<8x512xbf16> to vector<8x512xf32>
    %158 = arith.truncf %121 : vector<8x128xf32> to vector<8x128xbf16>
    %cst_67 = arith.constant dense<0.000000e+00> : vector<8x512xf32>
    %159 = tpu.matmul %158, %4, %cst_67 {dimension_numbers = #tpu.dot_dimension_numbers<[1], [0], [0], [1], [0, 0, 1, 1], [], []>} : vector<8x128xbf16>, vector<128x512xbf16>, vector<8x512xf32> -> vector<8x512xf32>
    %160 = arith.addf %157, %159 : vector<8x512xf32>
    %c1_68 = arith.constant 1 : index
    %c2_69 = arith.constant 2 : index
    %c0_70 = arith.constant 0 : index
    %c0_71 = arith.constant 0 : index
    %161 = vector.load %arg1[%c1_68, %c2_69, %c0_70, %c0_71] : memref<2x8x8x512xbf16, #tpu.memory_space<vmem>>, vector<1x1x8x512xbf16>
    %162 = vector.shape_cast %161 : vector<1x1x8x512xbf16> to vector<8x512xbf16>
    %163 = arith.extf %162 : vector<8x512xbf16> to vector<8x512xf32>
    %164 = arith.truncf %150 : vector<8x128xf32> to vector<8x128xbf16>
    %cst_72 = arith.constant dense<0.000000e+00> : vector<8x512xf32>
    %165 = tpu.matmul %164, %6, %cst_72 {dimension_numbers = #tpu.dot_dimension_numbers<[1], [0], [0], [1], [0, 0, 1, 1], [], []>} : vector<8x128xbf16>, vector<128x512xbf16>, vector<8x512xf32> -> vector<8x512xf32>
    %166 = arith.addf %163, %165 : vector<8x512xf32>
    %167 = vector.extract_strided_slice %160 {offsets = [0, 0], sizes = [8, 128], strides = [1, 1]} : vector<8x512xf32> to vector<8x128xf32>
    %168 = arith.negf %167 : vector<8x128xf32>
    %169 = math.exp %168 : vector<8x128xf32>
    %cst_73 = arith.constant 1.000000e+00 : f32
    %170 = vector.broadcast %cst_73 : f32 to vector<8x128xf32>
    %171 = arith.addf %170, %169 : vector<8x128xf32>
    %172 = arith.divf %170, %171 : vector<8x128xf32>
    %173 = vector.extract_strided_slice %160 {offsets = [0, 128], sizes = [8, 128], strides = [1, 1]} : vector<8x512xf32> to vector<8x128xf32>
    %174 = arith.negf %173 : vector<8x128xf32>
    %175 = math.exp %174 : vector<8x128xf32>
    %cst_74 = arith.constant 1.000000e+00 : f32
    %176 = vector.broadcast %cst_74 : f32 to vector<8x128xf32>
    %177 = arith.addf %176, %175 : vector<8x128xf32>
    %178 = arith.divf %176, %177 : vector<8x128xf32>
    %179 = vector.extract_strided_slice %160 {offsets = [0, 256], sizes = [8, 128], strides = [1, 1]} : vector<8x512xf32> to vector<8x128xf32>
    %180 = math.tanh %179 : vector<8x128xf32>
    %181 = vector.extract_strided_slice %160 {offsets = [0, 384], sizes = [8, 128], strides = [1, 1]} : vector<8x512xf32> to vector<8x128xf32>
    %182 = arith.negf %181 : vector<8x128xf32>
    %183 = math.exp %182 : vector<8x128xf32>
    %cst_75 = arith.constant 1.000000e+00 : f32
    %184 = vector.broadcast %cst_75 : f32 to vector<8x128xf32>
    %185 = arith.addf %184, %183 : vector<8x128xf32>
    %186 = arith.divf %184, %185 : vector<8x128xf32>
    %187 = arith.mulf %178, %119 : vector<8x128xf32>
    %188 = arith.mulf %172, %180 : vector<8x128xf32>
    %189 = arith.addf %187, %188 : vector<8x128xf32>
    %190 = math.tanh %189 : vector<8x128xf32>
    %191 = arith.mulf %186, %190 : vector<8x128xf32>
    %192 = arith.truncf %191 : vector<8x128xf32> to vector<8x128xbf16>
    %c0_76 = arith.constant 0 : index
    %c2_77 = arith.constant 2 : index
    %c0_78 = arith.constant 0 : index
    %c0_79 = arith.constant 0 : index
    %193 = vector.load %arg3[%c0_76, %c2_77, %c0_78, %c0_79] : memref<2x8x8x128xbf16, #tpu.memory_space<vmem>>, vector<1x1x8x128xbf16>
    %194 = vector.shape_cast %193 : vector<1x1x8x128xbf16> to vector<8x128xbf16>
    %195 = vector.shape_cast %192 : vector<8x128xbf16> to vector<1x1x8x128xbf16>
    tpu.vector_store %arg3[%c0_76, %c2_77, %c0_78, %c0_79], %195 {strides = array<i32>} : memref<2x8x8x128xbf16, #tpu.memory_space<vmem>>, vector<1x1x8x128xbf16>,
    %196 = vector.extract_strided_slice %166 {offsets = [0, 0], sizes = [8, 128], strides = [1, 1]} : vector<8x512xf32> to vector<8x128xf32>
    %197 = arith.negf %196 : vector<8x128xf32>
    %198 = math.exp %197 : vector<8x128xf32>
    %cst_80 = arith.constant 1.000000e+00 : f32
    %199 = vector.broadcast %cst_80 : f32 to vector<8x128xf32>
    %200 = arith.addf %199, %198 : vector<8x128xf32>
    %201 = arith.divf %199, %200 : vector<8x128xf32>
    %202 = vector.extract_strided_slice %166 {offsets = [0, 128], sizes = [8, 128], strides = [1, 1]} : vector<8x512xf32> to vector<8x128xf32>
    %203 = arith.negf %202 : vector<8x128xf32>
    %204 = math.exp %203 : vector<8x128xf32>
    %cst_81 = arith.constant 1.000000e+00 : f32
    %205 = vector.broadcast %cst_81 : f32 to vector<8x128xf32>
    %206 = arith.addf %205, %204 : vector<8x128xf32>
    %207 = arith.divf %205, %206 : vector<8x128xf32>
    %208 = vector.extract_strided_slice %166 {offsets = [0, 256], sizes = [8, 128], strides = [1, 1]} : vector<8x512xf32> to vector<8x128xf32>
    %209 = math.tanh %208 : vector<8x128xf32>
    %210 = vector.extract_strided_slice %166 {offsets = [0, 384], sizes = [8, 128], strides = [1, 1]} : vector<8x512xf32> to vector<8x128xf32>
    %211 = arith.negf %210 : vector<8x128xf32>
    %212 = math.exp %211 : vector<8x128xf32>
    %cst_82 = arith.constant 1.000000e+00 : f32
    %213 = vector.broadcast %cst_82 : f32 to vector<8x128xf32>
    %214 = arith.addf %213, %212 : vector<8x128xf32>
    %215 = arith.divf %213, %214 : vector<8x128xf32>
    %216 = arith.mulf %207, %148 : vector<8x128xf32>
    %217 = arith.mulf %201, %209 : vector<8x128xf32>
    %218 = arith.addf %216, %217 : vector<8x128xf32>
    %219 = math.tanh %218 : vector<8x128xf32>
    %220 = arith.mulf %215, %219 : vector<8x128xf32>
    %221 = arith.truncf %220 : vector<8x128xf32> to vector<8x128xbf16>
    %c1_83 = arith.constant 1 : index
    %c2_84 = arith.constant 2 : index
    %c0_85 = arith.constant 0 : index
    %c0_86 = arith.constant 0 : index
    %222 = vector.load %arg3[%c1_83, %c2_84, %c0_85, %c0_86] : memref<2x8x8x128xbf16, #tpu.memory_space<vmem>>, vector<1x1x8x128xbf16>
    %223 = vector.shape_cast %222 : vector<1x1x8x128xbf16> to vector<8x128xbf16>
    %224 = vector.shape_cast %221 : vector<8x128xbf16> to vector<1x1x8x128xbf16>
    tpu.vector_store %arg3[%c1_83, %c2_84, %c0_85, %c0_86], %224 {strides = array<i32>} : memref<2x8x8x128xbf16, #tpu.memory_space<vmem>>, vector<1x1x8x128xbf16>,
    %c0_87 = arith.constant 0 : index
    %c3 = arith.constant 3 : index
    %c0_88 = arith.constant 0 : index
    %c0_89 = arith.constant 0 : index
    %225 = vector.load %arg1[%c0_87, %c3, %c0_88, %c0_89] : memref<2x8x8x512xbf16, #tpu.memory_space<vmem>>, vector<1x1x8x512xbf16>
    %226 = vector.shape_cast %225 : vector<1x1x8x512xbf16> to vector<8x512xbf16>
    %227 = arith.extf %226 : vector<8x512xbf16> to vector<8x512xf32>
    %228 = arith.truncf %191 : vector<8x128xf32> to vector<8x128xbf16>
    %cst_90 = arith.constant dense<0.000000e+00> : vector<8x512xf32>
    %229 = tpu.matmul %228, %4, %cst_90 {dimension_numbers = #tpu.dot_dimension_numbers<[1], [0], [0], [1], [0, 0, 1, 1], [], []>} : vector<8x128xbf16>, vector<128x512xbf16>, vector<8x512xf32> -> vector<8x512xf32>
    %230 = arith.addf %227, %229 : vector<8x512xf32>
    %c1_91 = arith.constant 1 : index
    %c3_92 = arith.constant 3 : index
    %c0_93 = arith.constant 0 : index
    %c0_94 = arith.constant 0 : index
    %231 = vector.load %arg1[%c1_91, %c3_92, %c0_93, %c0_94] : memref<2x8x8x512xbf16, #tpu.memory_space<vmem>>, vector<1x1x8x512xbf16>
    %232 = vector.shape_cast %231 : vector<1x1x8x512xbf16> to vector<8x512xbf16>
    %233 = arith.extf %232 : vector<8x512xbf16> to vector<8x512xf32>
    %234 = arith.truncf %220 : vector<8x128xf32> to vector<8x128xbf16>
    %cst_95 = arith.constant dense<0.000000e+00> : vector<8x512xf32>
    %235 = tpu.matmul %234, %6, %cst_95 {dimension_numbers = #tpu.dot_dimension_numbers<[1], [0], [0], [1], [0, 0, 1, 1], [], []>} : vector<8x128xbf16>, vector<128x512xbf16>, vector<8x512xf32> -> vector<8x512xf32>
    %236 = arith.addf %233, %235 : vector<8x512xf32>
    %237 = vector.extract_strided_slice %230 {offsets = [0, 0], sizes = [8, 128], strides = [1, 1]} : vector<8x512xf32> to vector<8x128xf32>
    %238 = arith.negf %237 : vector<8x128xf32>
    %239 = math.exp %238 : vector<8x128xf32>
    %cst_96 = arith.constant 1.000000e+00 : f32
    %240 = vector.broadcast %cst_96 : f32 to vector<8x128xf32>
    %241 = arith.addf %240, %239 : vector<8x128xf32>
    %242 = arith.divf %240, %241 : vector<8x128xf32>
    %243 = vector.extract_strided_slice %230 {offsets = [0, 128], sizes = [8, 128], strides = [1, 1]} : vector<8x512xf32> to vector<8x128xf32>
    %244 = arith.negf %243 : vector<8x128xf32>
    %245 = math.exp %244 : vector<8x128xf32>
    %cst_97 = arith.constant 1.000000e+00 : f32
    %246 = vector.broadcast %cst_97 : f32 to vector<8x128xf32>
    %247 = arith.addf %246, %245 : vector<8x128xf32>
    %248 = arith.divf %246, %247 : vector<8x128xf32>
    %249 = vector.extract_strided_slice %230 {offsets = [0, 256], sizes = [8, 128], strides = [1, 1]} : vector<8x512xf32> to vector<8x128xf32>
    %250 = math.tanh %249 : vector<8x128xf32>
    %251 = vector.extract_strided_slice %230 {offsets = [0, 384], sizes = [8, 128], strides = [1, 1]} : vector<8x512xf32> to vector<8x128xf32>
    %252 = arith.negf %251 : vector<8x128xf32>
    %253 = math.exp %252 : vector<8x128xf32>
    %cst_98 = arith.constant 1.000000e+00 : f32
    %254 = vector.broadcast %cst_98 : f32 to vector<8x128xf32>
    %255 = arith.addf %254, %253 : vector<8x128xf32>
    %256 = arith.divf %254, %255 : vector<8x128xf32>
    %257 = arith.mulf %248, %189 : vector<8x128xf32>
    %258 = arith.mulf %242, %250 : vector<8x128xf32>
    %259 = arith.addf %257, %258 : vector<8x128xf32>
    %260 = math.tanh %259 : vector<8x128xf32>
    %261 = arith.mulf %256, %260 : vector<8x128xf32>
    %262 = arith.truncf %261 : vector<8x128xf32> to vector<8x128xbf16>
    %c0_99 = arith.constant 0 : index
    %c3_100 = arith.constant 3 : index
    %c0_101 = arith.constant 0 : index
    %c0_102 = arith.constant 0 : index
    %263 = vector.load %arg3[%c0_99, %c3_100, %c0_101, %c0_102] : memref<2x8x8x128xbf16, #tpu.memory_space<vmem>>, vector<1x1x8x128xbf16>
    %264 = vector.shape_cast %263 : vector<1x1x8x128xbf16> to vector<8x128xbf16>
    %265 = vector.shape_cast %262 : vector<8x128xbf16> to vector<1x1x8x128xbf16>
    tpu.vector_store %arg3[%c0_99, %c3_100, %c0_101, %c0_102], %265 {strides = array<i32>} : memref<2x8x8x128xbf16, #tpu.memory_space<vmem>>, vector<1x1x8x128xbf16>,
    %266 = vector.extract_strided_slice %236 {offsets = [0, 0], sizes = [8, 128], strides = [1, 1]} : vector<8x512xf32> to vector<8x128xf32>
    %267 = arith.negf %266 : vector<8x128xf32>
    %268 = math.exp %267 : vector<8x128xf32>
    %cst_103 = arith.constant 1.000000e+00 : f32
    %269 = vector.broadcast %cst_103 : f32 to vector<8x128xf32>
    %270 = arith.addf %269, %268 : vector<8x128xf32>
    %271 = arith.divf %269, %270 : vector<8x128xf32>
    %272 = vector.extract_strided_slice %236 {offsets = [0, 128], sizes = [8, 128], strides = [1, 1]} : vector<8x512xf32> to vector<8x128xf32>
    %273 = arith.negf %272 : vector<8x128xf32>
    %274 = math.exp %273 : vector<8x128xf32>
    %cst_104 = arith.constant 1.000000e+00 : f32
    %275 = vector.broadcast %cst_104 : f32 to vector<8x128xf32>
    %276 = arith.addf %275, %274 : vector<8x128xf32>
    %277 = arith.divf %275, %276 : vector<8x128xf32>
    %278 = vector.extract_strided_slice %236 {offsets = [0, 256], sizes = [8, 128], strides = [1, 1]} : vector<8x512xf32> to vector<8x128xf32>
    %279 = math.tanh %278 : vector<8x128xf32>
    %280 = vector.extract_strided_slice %236 {offsets = [0, 384], sizes = [8, 128], strides = [1, 1]} : vector<8x512xf32> to vector<8x128xf32>
    %281 = arith.negf %280 : vector<8x128xf32>
    %282 = math.exp %281 : vector<8x128xf32>
    %cst_105 = arith.constant 1.000000e+00 : f32
    %283 = vector.broadcast %cst_105 : f32 to vector<8x128xf32>
    %284 = arith.addf %283, %282 : vector<8x128xf32>
    %285 = arith.divf %283, %284 : vector<8x128xf32>
    %286 = arith.mulf %277, %218 : vector<8x128xf32>
    %287 = arith.mulf %271, %279 : vector<8x128xf32>
    %288 = arith.addf %286, %287 : vector<8x128xf32>
    %289 = math.tanh %288 : vector<8x128xf32>
    %290 = arith.mulf %285, %289 : vector<8x128xf32>
    %291 = arith.truncf %290 : vector<8x128xf32> to vector<8x128xbf16>
    %c1_106 = arith.constant 1 : index
    %c3_107 = arith.constant 3 : index
    %c0_108 = arith.constant 0 : index
    %c0_109 = arith.constant 0 : index
    %292 = vector.load %arg3[%c1_106, %c3_107, %c0_108, %c0_109] : memref<2x8x8x128xbf16, #tpu.memory_space<vmem>>, vector<1x1x8x128xbf16>
    %293 = vector.shape_cast %292 : vector<1x1x8x128xbf16> to vector<8x128xbf16>
    %294 = vector.shape_cast %291 : vector<8x128xbf16> to vector<1x1x8x128xbf16>
    tpu.vector_store %arg3[%c1_106, %c3_107, %c0_108, %c0_109], %294 {strides = array<i32>} : memref<2x8x8x128xbf16, #tpu.memory_space<vmem>>, vector<1x1x8x128xbf16>,
    %c0_110 = arith.constant 0 : index
    %c4 = arith.constant 4 : index
    %c0_111 = arith.constant 0 : index
    %c0_112 = arith.constant 0 : index
    %295 = vector.load %arg1[%c0_110, %c4, %c0_111, %c0_112] : memref<2x8x8x512xbf16, #tpu.memory_space<vmem>>, vector<1x1x8x512xbf16>
    %296 = vector.shape_cast %295 : vector<1x1x8x512xbf16> to vector<8x512xbf16>
    %297 = arith.extf %296 : vector<8x512xbf16> to vector<8x512xf32>
    %298 = arith.truncf %261 : vector<8x128xf32> to vector<8x128xbf16>
    %cst_113 = arith.constant dense<0.000000e+00> : vector<8x512xf32>
    %299 = tpu.matmul %298, %4, %cst_113 {dimension_numbers = #tpu.dot_dimension_numbers<[1], [0], [0], [1], [0, 0, 1, 1], [], []>} : vector<8x128xbf16>, vector<128x512xbf16>, vector<8x512xf32> -> vector<8x512xf32>
    %300 = arith.addf %297, %299 : vector<8x512xf32>
    %c1_114 = arith.constant 1 : index
    %c4_115 = arith.constant 4 : index
    %c0_116 = arith.constant 0 : index
    %c0_117 = arith.constant 0 : index
    %301 = vector.load %arg1[%c1_114, %c4_115, %c0_116, %c0_117] : memref<2x8x8x512xbf16, #tpu.memory_space<vmem>>, vector<1x1x8x512xbf16>
    %302 = vector.shape_cast %301 : vector<1x1x8x512xbf16> to vector<8x512xbf16>
    %303 = arith.extf %302 : vector<8x512xbf16> to vector<8x512xf32>
    %304 = arith.truncf %290 : vector<8x128xf32> to vector<8x128xbf16>
    %cst_118 = arith.constant dense<0.000000e+00> : vector<8x512xf32>
    %305 = tpu.matmul %304, %6, %cst_118 {dimension_numbers = #tpu.dot_dimension_numbers<[1], [0], [0], [1], [0, 0, 1, 1], [], []>} : vector<8x128xbf16>, vector<128x512xbf16>, vector<8x512xf32> -> vector<8x512xf32>
    %306 = arith.addf %303, %305 : vector<8x512xf32>
    %307 = vector.extract_strided_slice %300 {offsets = [0, 0], sizes = [8, 128], strides = [1, 1]} : vector<8x512xf32> to vector<8x128xf32>
    %308 = arith.negf %307 : vector<8x128xf32>
    %309 = math.exp %308 : vector<8x128xf32>
    %cst_119 = arith.constant 1.000000e+00 : f32
    %310 = vector.broadcast %cst_119 : f32 to vector<8x128xf32>
    %311 = arith.addf %310, %309 : vector<8x128xf32>
    %312 = arith.divf %310, %311 : vector<8x128xf32>
    %313 = vector.extract_strided_slice %300 {offsets = [0, 128], sizes = [8, 128], strides = [1, 1]} : vector<8x512xf32> to vector<8x128xf32>
    %314 = arith.negf %313 : vector<8x128xf32>
    %315 = math.exp %314 : vector<8x128xf32>
    %cst_120 = arith.constant 1.000000e+00 : f32
    %316 = vector.broadcast %cst_120 : f32 to vector<8x128xf32>
    %317 = arith.addf %316, %315 : vector<8x128xf32>
    %318 = arith.divf %316, %317 : vector<8x128xf32>
    %319 = vector.extract_strided_slice %300 {offsets = [0, 256], sizes = [8, 128], strides = [1, 1]} : vector<8x512xf32> to vector<8x128xf32>
    %320 = math.tanh %319 : vector<8x128xf32>
    %321 = vector.extract_strided_slice %300 {offsets = [0, 384], sizes = [8, 128], strides = [1, 1]} : vector<8x512xf32> to vector<8x128xf32>
    %322 = arith.negf %321 : vector<8x128xf32>
    %323 = math.exp %322 : vector<8x128xf32>
    %cst_121 = arith.constant 1.000000e+00 : f32
    %324 = vector.broadcast %cst_121 : f32 to vector<8x128xf32>
    %325 = arith.addf %324, %323 : vector<8x128xf32>
    %326 = arith.divf %324, %325 : vector<8x128xf32>
    %327 = arith.mulf %318, %259 : vector<8x128xf32>
    %328 = arith.mulf %312, %320 : vector<8x128xf32>
    %329 = arith.addf %327, %328 : vector<8x128xf32>
    %330 = math.tanh %329 : vector<8x128xf32>
    %331 = arith.mulf %326, %330 : vector<8x128xf32>
    %332 = arith.truncf %331 : vector<8x128xf32> to vector<8x128xbf16>
    %c0_122 = arith.constant 0 : index
    %c4_123 = arith.constant 4 : index
    %c0_124 = arith.constant 0 : index
    %c0_125 = arith.constant 0 : index
    %333 = vector.load %arg3[%c0_122, %c4_123, %c0_124, %c0_125] : memref<2x8x8x128xbf16, #tpu.memory_space<vmem>>, vector<1x1x8x128xbf16>
    %334 = vector.shape_cast %333 : vector<1x1x8x128xbf16> to vector<8x128xbf16>
    %335 = vector.shape_cast %332 : vector<8x128xbf16> to vector<1x1x8x128xbf16>
    tpu.vector_store %arg3[%c0_122, %c4_123, %c0_124, %c0_125], %335 {strides = array<i32>} : memref<2x8x8x128xbf16, #tpu.memory_space<vmem>>, vector<1x1x8x128xbf16>,
    %336 = vector.extract_strided_slice %306 {offsets = [0, 0], sizes = [8, 128], strides = [1, 1]} : vector<8x512xf32> to vector<8x128xf32>
    %337 = arith.negf %336 : vector<8x128xf32>
    %338 = math.exp %337 : vector<8x128xf32>
    %cst_126 = arith.constant 1.000000e+00 : f32
    %339 = vector.broadcast %cst_126 : f32 to vector<8x128xf32>
    %340 = arith.addf %339, %338 : vector<8x128xf32>
    %341 = arith.divf %339, %340 : vector<8x128xf32>
    %342 = vector.extract_strided_slice %306 {offsets = [0, 128], sizes = [8, 128], strides = [1, 1]} : vector<8x512xf32> to vector<8x128xf32>
    %343 = arith.negf %342 : vector<8x128xf32>
    %344 = math.exp %343 : vector<8x128xf32>
    %cst_127 = arith.constant 1.000000e+00 : f32
    %345 = vector.broadcast %cst_127 : f32 to vector<8x128xf32>
    %346 = arith.addf %345, %344 : vector<8x128xf32>
    %347 = arith.divf %345, %346 : vector<8x128xf32>
    %348 = vector.extract_strided_slice %306 {offsets = [0, 256], sizes = [8, 128], strides = [1, 1]} : vector<8x512xf32> to vector<8x128xf32>
    %349 = math.tanh %348 : vector<8x128xf32>
    %350 = vector.extract_strided_slice %306 {offsets = [0, 384], sizes = [8, 128], strides = [1, 1]} : vector<8x512xf32> to vector<8x128xf32>
    %351 = arith.negf %350 : vector<8x128xf32>
    %352 = math.exp %351 : vector<8x128xf32>
    %cst_128 = arith.constant 1.000000e+00 : f32
    %353 = vector.broadcast %cst_128 : f32 to vector<8x128xf32>
    %354 = arith.addf %353, %352 : vector<8x128xf32>
    %355 = arith.divf %353, %354 : vector<8x128xf32>
    %356 = arith.mulf %347, %288 : vector<8x128xf32>
    %357 = arith.mulf %341, %349 : vector<8x128xf32>
    %358 = arith.addf %356, %357 : vector<8x128xf32>
    %359 = math.tanh %358 : vector<8x128xf32>
    %360 = arith.mulf %355, %359 : vector<8x128xf32>
    %361 = arith.truncf %360 : vector<8x128xf32> to vector<8x128xbf16>
    %c1_129 = arith.constant 1 : index
    %c4_130 = arith.constant 4 : index
    %c0_131 = arith.constant 0 : index
    %c0_132 = arith.constant 0 : index
    %362 = vector.load %arg3[%c1_129, %c4_130, %c0_131, %c0_132] : memref<2x8x8x128xbf16, #tpu.memory_space<vmem>>, vector<1x1x8x128xbf16>
    %363 = vector.shape_cast %362 : vector<1x1x8x128xbf16> to vector<8x128xbf16>
    %364 = vector.shape_cast %361 : vector<8x128xbf16> to vector<1x1x8x128xbf16>
    tpu.vector_store %arg3[%c1_129, %c4_130, %c0_131, %c0_132], %364 {strides = array<i32>} : memref<2x8x8x128xbf16, #tpu.memory_space<vmem>>, vector<1x1x8x128xbf16>,
    %c0_133 = arith.constant 0 : index
    %c5 = arith.constant 5 : index
    %c0_134 = arith.constant 0 : index
    %c0_135 = arith.constant 0 : index
    %365 = vector.load %arg1[%c0_133, %c5, %c0_134, %c0_135] : memref<2x8x8x512xbf16, #tpu.memory_space<vmem>>, vector<1x1x8x512xbf16>
    %366 = vector.shape_cast %365 : vector<1x1x8x512xbf16> to vector<8x512xbf16>
    %367 = arith.extf %366 : vector<8x512xbf16> to vector<8x512xf32>
    %368 = arith.truncf %331 : vector<8x128xf32> to vector<8x128xbf16>
    %cst_136 = arith.constant dense<0.000000e+00> : vector<8x512xf32>
    %369 = tpu.matmul %368, %4, %cst_136 {dimension_numbers = #tpu.dot_dimension_numbers<[1], [0], [0], [1], [0, 0, 1, 1], [], []>} : vector<8x128xbf16>, vector<128x512xbf16>, vector<8x512xf32> -> vector<8x512xf32>
    %370 = arith.addf %367, %369 : vector<8x512xf32>
    %c1_137 = arith.constant 1 : index
    %c5_138 = arith.constant 5 : index
    %c0_139 = arith.constant 0 : index
    %c0_140 = arith.constant 0 : index
    %371 = vector.load %arg1[%c1_137, %c5_138, %c0_139, %c0_140] : memref<2x8x8x512xbf16, #tpu.memory_space<vmem>>, vector<1x1x8x512xbf16>
    %372 = vector.shape_cast %371 : vector<1x1x8x512xbf16> to vector<8x512xbf16>
    %373 = arith.extf %372 : vector<8x512xbf16> to vector<8x512xf32>
    %374 = arith.truncf %360 : vector<8x128xf32> to vector<8x128xbf16>
    %cst_141 = arith.constant dense<0.000000e+00> : vector<8x512xf32>
    %375 = tpu.matmul %374, %6, %cst_141 {dimension_numbers = #tpu.dot_dimension_numbers<[1], [0], [0], [1], [0, 0, 1, 1], [], []>} : vector<8x128xbf16>, vector<128x512xbf16>, vector<8x512xf32> -> vector<8x512xf32>
    %376 = arith.addf %373, %375 : vector<8x512xf32>
    %377 = vector.extract_strided_slice %370 {offsets = [0, 0], sizes = [8, 128], strides = [1, 1]} : vector<8x512xf32> to vector<8x128xf32>
    %378 = arith.negf %377 : vector<8x128xf32>
    %379 = math.exp %378 : vector<8x128xf32>
    %cst_142 = arith.constant 1.000000e+00 : f32
    %380 = vector.broadcast %cst_142 : f32 to vector<8x128xf32>
    %381 = arith.addf %380, %379 : vector<8x128xf32>
    %382 = arith.divf %380, %381 : vector<8x128xf32>
    %383 = vector.extract_strided_slice %370 {offsets = [0, 128], sizes = [8, 128], strides = [1, 1]} : vector<8x512xf32> to vector<8x128xf32>
    %384 = arith.negf %383 : vector<8x128xf32>
    %385 = math.exp %384 : vector<8x128xf32>
    %cst_143 = arith.constant 1.000000e+00 : f32
    %386 = vector.broadcast %cst_143 : f32 to vector<8x128xf32>
    %387 = arith.addf %386, %385 : vector<8x128xf32>
    %388 = arith.divf %386, %387 : vector<8x128xf32>
    %389 = vector.extract_strided_slice %370 {offsets = [0, 256], sizes = [8, 128], strides = [1, 1]} : vector<8x512xf32> to vector<8x128xf32>
    %390 = math.tanh %389 : vector<8x128xf32>
    %391 = vector.extract_strided_slice %370 {offsets = [0, 384], sizes = [8, 128], strides = [1, 1]} : vector<8x512xf32> to vector<8x128xf32>
    %392 = arith.negf %391 : vector<8x128xf32>
    %393 = math.exp %392 : vector<8x128xf32>
    %cst_144 = arith.constant 1.000000e+00 : f32
    %394 = vector.broadcast %cst_144 : f32 to vector<8x128xf32>
    %395 = arith.addf %394, %393 : vector<8x128xf32>
    %396 = arith.divf %394, %395 : vector<8x128xf32>
    %397 = arith.mulf %388, %329 : vector<8x128xf32>
    %398 = arith.mulf %382, %390 : vector<8x128xf32>
    %399 = arith.addf %397, %398 : vector<8x128xf32>
    %400 = math.tanh %399 : vector<8x128xf32>
    %401 = arith.mulf %396, %400 : vector<8x128xf32>
    %402 = arith.truncf %401 : vector<8x128xf32> to vector<8x128xbf16>
    %c0_145 = arith.constant 0 : index
    %c5_146 = arith.constant 5 : index
    %c0_147 = arith.constant 0 : index
    %c0_148 = arith.constant 0 : index
    %403 = vector.load %arg3[%c0_145, %c5_146, %c0_147, %c0_148] : memref<2x8x8x128xbf16, #tpu.memory_space<vmem>>, vector<1x1x8x128xbf16>
    %404 = vector.shape_cast %403 : vector<1x1x8x128xbf16> to vector<8x128xbf16>
    %405 = vector.shape_cast %402 : vector<8x128xbf16> to vector<1x1x8x128xbf16>
    tpu.vector_store %arg3[%c0_145, %c5_146, %c0_147, %c0_148], %405 {strides = array<i32>} : memref<2x8x8x128xbf16, #tpu.memory_space<vmem>>, vector<1x1x8x128xbf16>,
    %406 = vector.extract_strided_slice %376 {offsets = [0, 0], sizes = [8, 128], strides = [1, 1]} : vector<8x512xf32> to vector<8x128xf32>
    %407 = arith.negf %406 : vector<8x128xf32>
    %408 = math.exp %407 : vector<8x128xf32>
    %cst_149 = arith.constant 1.000000e+00 : f32
    %409 = vector.broadcast %cst_149 : f32 to vector<8x128xf32>
    %410 = arith.addf %409, %408 : vector<8x128xf32>
    %411 = arith.divf %409, %410 : vector<8x128xf32>
    %412 = vector.extract_strided_slice %376 {offsets = [0, 128], sizes = [8, 128], strides = [1, 1]} : vector<8x512xf32> to vector<8x128xf32>
    %413 = arith.negf %412 : vector<8x128xf32>
    %414 = math.exp %413 : vector<8x128xf32>
    %cst_150 = arith.constant 1.000000e+00 : f32
    %415 = vector.broadcast %cst_150 : f32 to vector<8x128xf32>
    %416 = arith.addf %415, %414 : vector<8x128xf32>
    %417 = arith.divf %415, %416 : vector<8x128xf32>
    %418 = vector.extract_strided_slice %376 {offsets = [0, 256], sizes = [8, 128], strides = [1, 1]} : vector<8x512xf32> to vector<8x128xf32>
    %419 = math.tanh %418 : vector<8x128xf32>
    %420 = vector.extract_strided_slice %376 {offsets = [0, 384], sizes = [8, 128], strides = [1, 1]} : vector<8x512xf32> to vector<8x128xf32>
    %421 = arith.negf %420 : vector<8x128xf32>
    %422 = math.exp %421 : vector<8x128xf32>
    %cst_151 = arith.constant 1.000000e+00 : f32
    %423 = vector.broadcast %cst_151 : f32 to vector<8x128xf32>
    %424 = arith.addf %423, %422 : vector<8x128xf32>
    %425 = arith.divf %423, %424 : vector<8x128xf32>
    %426 = arith.mulf %417, %358 : vector<8x128xf32>
    %427 = arith.mulf %411, %419 : vector<8x128xf32>
    %428 = arith.addf %426, %427 : vector<8x128xf32>
    %429 = math.tanh %428 : vector<8x128xf32>
    %430 = arith.mulf %425, %429 : vector<8x128xf32>
    %431 = arith.truncf %430 : vector<8x128xf32> to vector<8x128xbf16>
    %c1_152 = arith.constant 1 : index
    %c5_153 = arith.constant 5 : index
    %c0_154 = arith.constant 0 : index
    %c0_155 = arith.constant 0 : index
    %432 = vector.load %arg3[%c1_152, %c5_153, %c0_154, %c0_155] : memref<2x8x8x128xbf16, #tpu.memory_space<vmem>>, vector<1x1x8x128xbf16>
    %433 = vector.shape_cast %432 : vector<1x1x8x128xbf16> to vector<8x128xbf16>
    %434 = vector.shape_cast %431 : vector<8x128xbf16> to vector<1x1x8x128xbf16>
    tpu.vector_store %arg3[%c1_152, %c5_153, %c0_154, %c0_155], %434 {strides = array<i32>} : memref<2x8x8x128xbf16, #tpu.memory_space<vmem>>, vector<1x1x8x128xbf16>,
    %c0_156 = arith.constant 0 : index
    %c6 = arith.constant 6 : index
    %c0_157 = arith.constant 0 : index
    %c0_158 = arith.constant 0 : index
    %435 = vector.load %arg1[%c0_156, %c6, %c0_157, %c0_158] : memref<2x8x8x512xbf16, #tpu.memory_space<vmem>>, vector<1x1x8x512xbf16>
    %436 = vector.shape_cast %435 : vector<1x1x8x512xbf16> to vector<8x512xbf16>
    %437 = arith.extf %436 : vector<8x512xbf16> to vector<8x512xf32>
    %438 = arith.truncf %401 : vector<8x128xf32> to vector<8x128xbf16>
    %cst_159 = arith.constant dense<0.000000e+00> : vector<8x512xf32>
    %439 = tpu.matmul %438, %4, %cst_159 {dimension_numbers = #tpu.dot_dimension_numbers<[1], [0], [0], [1], [0, 0, 1, 1], [], []>} : vector<8x128xbf16>, vector<128x512xbf16>, vector<8x512xf32> -> vector<8x512xf32>
    %440 = arith.addf %437, %439 : vector<8x512xf32>
    %c1_160 = arith.constant 1 : index
    %c6_161 = arith.constant 6 : index
    %c0_162 = arith.constant 0 : index
    %c0_163 = arith.constant 0 : index
    %441 = vector.load %arg1[%c1_160, %c6_161, %c0_162, %c0_163] : memref<2x8x8x512xbf16, #tpu.memory_space<vmem>>, vector<1x1x8x512xbf16>
    %442 = vector.shape_cast %441 : vector<1x1x8x512xbf16> to vector<8x512xbf16>
    %443 = arith.extf %442 : vector<8x512xbf16> to vector<8x512xf32>
    %444 = arith.truncf %430 : vector<8x128xf32> to vector<8x128xbf16>
    %cst_164 = arith.constant dense<0.000000e+00> : vector<8x512xf32>
    %445 = tpu.matmul %444, %6, %cst_164 {dimension_numbers = #tpu.dot_dimension_numbers<[1], [0], [0], [1], [0, 0, 1, 1], [], []>} : vector<8x128xbf16>, vector<128x512xbf16>, vector<8x512xf32> -> vector<8x512xf32>
    %446 = arith.addf %443, %445 : vector<8x512xf32>
    %447 = vector.extract_strided_slice %440 {offsets = [0, 0], sizes = [8, 128], strides = [1, 1]} : vector<8x512xf32> to vector<8x128xf32>
    %448 = arith.negf %447 : vector<8x128xf32>
    %449 = math.exp %448 : vector<8x128xf32>
    %cst_165 = arith.constant 1.000000e+00 : f32
    %450 = vector.broadcast %cst_165 : f32 to vector<8x128xf32>
    %451 = arith.addf %450, %449 : vector<8x128xf32>
    %452 = arith.divf %450, %451 : vector<8x128xf32>
    %453 = vector.extract_strided_slice %440 {offsets = [0, 128], sizes = [8, 128], strides = [1, 1]} : vector<8x512xf32> to vector<8x128xf32>
    %454 = arith.negf %453 : vector<8x128xf32>
    %455 = math.exp %454 : vector<8x128xf32>
    %cst_166 = arith.constant 1.000000e+00 : f32
    %456 = vector.broadcast %cst_166 : f32 to vector<8x128xf32>
    %457 = arith.addf %456, %455 : vector<8x128xf32>
    %458 = arith.divf %456, %457 : vector<8x128xf32>
    %459 = vector.extract_strided_slice %440 {offsets = [0, 256], sizes = [8, 128], strides = [1, 1]} : vector<8x512xf32> to vector<8x128xf32>
    %460 = math.tanh %459 : vector<8x128xf32>
    %461 = vector.extract_strided_slice %440 {offsets = [0, 384], sizes = [8, 128], strides = [1, 1]} : vector<8x512xf32> to vector<8x128xf32>
    %462 = arith.negf %461 : vector<8x128xf32>
    %463 = math.exp %462 : vector<8x128xf32>
    %cst_167 = arith.constant 1.000000e+00 : f32
    %464 = vector.broadcast %cst_167 : f32 to vector<8x128xf32>
    %465 = arith.addf %464, %463 : vector<8x128xf32>
    %466 = arith.divf %464, %465 : vector<8x128xf32>
    %467 = arith.mulf %458, %399 : vector<8x128xf32>
    %468 = arith.mulf %452, %460 : vector<8x128xf32>
    %469 = arith.addf %467, %468 : vector<8x128xf32>
    %470 = math.tanh %469 : vector<8x128xf32>
    %471 = arith.mulf %466, %470 : vector<8x128xf32>
    %472 = arith.truncf %471 : vector<8x128xf32> to vector<8x128xbf16>
    %c0_168 = arith.constant 0 : index
    %c6_169 = arith.constant 6 : index
    %c0_170 = arith.constant 0 : index
    %c0_171 = arith.constant 0 : index
    %473 = vector.load %arg3[%c0_168, %c6_169, %c0_170, %c0_171] : memref<2x8x8x128xbf16, #tpu.memory_space<vmem>>, vector<1x1x8x128xbf16>
    %474 = vector.shape_cast %473 : vector<1x1x8x128xbf16> to vector<8x128xbf16>
    %475 = vector.shape_cast %472 : vector<8x128xbf16> to vector<1x1x8x128xbf16>
    tpu.vector_store %arg3[%c0_168, %c6_169, %c0_170, %c0_171], %475 {strides = array<i32>} : memref<2x8x8x128xbf16, #tpu.memory_space<vmem>>, vector<1x1x8x128xbf16>,
    %476 = vector.extract_strided_slice %446 {offsets = [0, 0], sizes = [8, 128], strides = [1, 1]} : vector<8x512xf32> to vector<8x128xf32>
    %477 = arith.negf %476 : vector<8x128xf32>
    %478 = math.exp %477 : vector<8x128xf32>
    %cst_172 = arith.constant 1.000000e+00 : f32
    %479 = vector.broadcast %cst_172 : f32 to vector<8x128xf32>
    %480 = arith.addf %479, %478 : vector<8x128xf32>
    %481 = arith.divf %479, %480 : vector<8x128xf32>
    %482 = vector.extract_strided_slice %446 {offsets = [0, 128], sizes = [8, 128], strides = [1, 1]} : vector<8x512xf32> to vector<8x128xf32>
    %483 = arith.negf %482 : vector<8x128xf32>
    %484 = math.exp %483 : vector<8x128xf32>
    %cst_173 = arith.constant 1.000000e+00 : f32
    %485 = vector.broadcast %cst_173 : f32 to vector<8x128xf32>
    %486 = arith.addf %485, %484 : vector<8x128xf32>
    %487 = arith.divf %485, %486 : vector<8x128xf32>
    %488 = vector.extract_strided_slice %446 {offsets = [0, 256], sizes = [8, 128], strides = [1, 1]} : vector<8x512xf32> to vector<8x128xf32>
    %489 = math.tanh %488 : vector<8x128xf32>
    %490 = vector.extract_strided_slice %446 {offsets = [0, 384], sizes = [8, 128], strides = [1, 1]} : vector<8x512xf32> to vector<8x128xf32>
    %491 = arith.negf %490 : vector<8x128xf32>
    %492 = math.exp %491 : vector<8x128xf32>
    %cst_174 = arith.constant 1.000000e+00 : f32
    %493 = vector.broadcast %cst_174 : f32 to vector<8x128xf32>
    %494 = arith.addf %493, %492 : vector<8x128xf32>
    %495 = arith.divf %493, %494 : vector<8x128xf32>
    %496 = arith.mulf %487, %428 : vector<8x128xf32>
    %497 = arith.mulf %481, %489 : vector<8x128xf32>
    %498 = arith.addf %496, %497 : vector<8x128xf32>
    %499 = math.tanh %498 : vector<8x128xf32>
    %500 = arith.mulf %495, %499 : vector<8x128xf32>
    %501 = arith.truncf %500 : vector<8x128xf32> to vector<8x128xbf16>
    %c1_175 = arith.constant 1 : index
    %c6_176 = arith.constant 6 : index
    %c0_177 = arith.constant 0 : index
    %c0_178 = arith.constant 0 : index
    %502 = vector.load %arg3[%c1_175, %c6_176, %c0_177, %c0_178] : memref<2x8x8x128xbf16, #tpu.memory_space<vmem>>, vector<1x1x8x128xbf16>
    %503 = vector.shape_cast %502 : vector<1x1x8x128xbf16> to vector<8x128xbf16>
    %504 = vector.shape_cast %501 : vector<8x128xbf16> to vector<1x1x8x128xbf16>
    tpu.vector_store %arg3[%c1_175, %c6_176, %c0_177, %c0_178], %504 {strides = array<i32>} : memref<2x8x8x128xbf16, #tpu.memory_space<vmem>>, vector<1x1x8x128xbf16>,
    %c0_179 = arith.constant 0 : index
    %c7 = arith.constant 7 : index
    %c0_180 = arith.constant 0 : index
    %c0_181 = arith.constant 0 : index
    %505 = vector.load %arg1[%c0_179, %c7, %c0_180, %c0_181] : memref<2x8x8x512xbf16, #tpu.memory_space<vmem>>, vector<1x1x8x512xbf16>
    %506 = vector.shape_cast %505 : vector<1x1x8x512xbf16> to vector<8x512xbf16>
    %507 = arith.extf %506 : vector<8x512xbf16> to vector<8x512xf32>
    %508 = arith.truncf %471 : vector<8x128xf32> to vector<8x128xbf16>
    %cst_182 = arith.constant dense<0.000000e+00> : vector<8x512xf32>
    %509 = tpu.matmul %508, %4, %cst_182 {dimension_numbers = #tpu.dot_dimension_numbers<[1], [0], [0], [1], [0, 0, 1, 1], [], []>} : vector<8x128xbf16>, vector<128x512xbf16>, vector<8x512xf32> -> vector<8x512xf32>
    %510 = arith.addf %507, %509 : vector<8x512xf32>
    %c1_183 = arith.constant 1 : index
    %c7_184 = arith.constant 7 : index
    %c0_185 = arith.constant 0 : index
    %c0_186 = arith.constant 0 : index
    %511 = vector.load %arg1[%c1_183, %c7_184, %c0_185, %c0_186] : memref<2x8x8x512xbf16, #tpu.memory_space<vmem>>, vector<1x1x8x512xbf16>
    %512 = vector.shape_cast %511 : vector<1x1x8x512xbf16> to vector<8x512xbf16>
    %513 = arith.extf %512 : vector<8x512xbf16> to vector<8x512xf32>
    %514 = arith.truncf %500 : vector<8x128xf32> to vector<8x128xbf16>
    %cst_187 = arith.constant dense<0.000000e+00> : vector<8x512xf32>
    %515 = tpu.matmul %514, %6, %cst_187 {dimension_numbers = #tpu.dot_dimension_numbers<[1], [0], [0], [1], [0, 0, 1, 1], [], []>} : vector<8x128xbf16>, vector<128x512xbf16>, vector<8x512xf32> -> vector<8x512xf32>
    %516 = arith.addf %513, %515 : vector<8x512xf32>
    %517 = vector.extract_strided_slice %510 {offsets = [0, 0], sizes = [8, 128], strides = [1, 1]} : vector<8x512xf32> to vector<8x128xf32>
    %518 = arith.negf %517 : vector<8x128xf32>
    %519 = math.exp %518 : vector<8x128xf32>
    %cst_188 = arith.constant 1.000000e+00 : f32
    %520 = vector.broadcast %cst_188 : f32 to vector<8x128xf32>
    %521 = arith.addf %520, %519 : vector<8x128xf32>
    %522 = arith.divf %520, %521 : vector<8x128xf32>
    %523 = vector.extract_strided_slice %510 {offsets = [0, 128], sizes = [8, 128], strides = [1, 1]} : vector<8x512xf32> to vector<8x128xf32>
    %524 = arith.negf %523 : vector<8x128xf32>
    %525 = math.exp %524 : vector<8x128xf32>
    %cst_189 = arith.constant 1.000000e+00 : f32
    %526 = vector.broadcast %cst_189 : f32 to vector<8x128xf32>
    %527 = arith.addf %526, %525 : vector<8x128xf32>
    %528 = arith.divf %526, %527 : vector<8x128xf32>
    %529 = vector.extract_strided_slice %510 {offsets = [0, 256], sizes = [8, 128], strides = [1, 1]} : vector<8x512xf32> to vector<8x128xf32>
    %530 = math.tanh %529 : vector<8x128xf32>
    %531 = vector.extract_strided_slice %510 {offsets = [0, 384], sizes = [8, 128], strides = [1, 1]} : vector<8x512xf32> to vector<8x128xf32>
    %532 = arith.negf %531 : vector<8x128xf32>
    %533 = math.exp %532 : vector<8x128xf32>
    %cst_190 = arith.constant 1.000000e+00 : f32
    %534 = vector.broadcast %cst_190 : f32 to vector<8x128xf32>
    %535 = arith.addf %534, %533 : vector<8x128xf32>
    %536 = arith.divf %534, %535 : vector<8x128xf32>
    %537 = arith.mulf %528, %469 : vector<8x128xf32>
    %538 = arith.mulf %522, %530 : vector<8x128xf32>
    %539 = arith.addf %537, %538 : vector<8x128xf32>
    %540 = math.tanh %539 : vector<8x128xf32>
    %541 = arith.mulf %536, %540 : vector<8x128xf32>
    %542 = arith.truncf %541 : vector<8x128xf32> to vector<8x128xbf16>
    %c0_191 = arith.constant 0 : index
    %c7_192 = arith.constant 7 : index
    %c0_193 = arith.constant 0 : index
    %c0_194 = arith.constant 0 : index
    %543 = vector.load %arg3[%c0_191, %c7_192, %c0_193, %c0_194] : memref<2x8x8x128xbf16, #tpu.memory_space<vmem>>, vector<1x1x8x128xbf16>
    %544 = vector.shape_cast %543 : vector<1x1x8x128xbf16> to vector<8x128xbf16>
    %545 = vector.shape_cast %542 : vector<8x128xbf16> to vector<1x1x8x128xbf16>
    tpu.vector_store %arg3[%c0_191, %c7_192, %c0_193, %c0_194], %545 {strides = array<i32>} : memref<2x8x8x128xbf16, #tpu.memory_space<vmem>>, vector<1x1x8x128xbf16>,
    %546 = vector.extract_strided_slice %516 {offsets = [0, 0], sizes = [8, 128], strides = [1, 1]} : vector<8x512xf32> to vector<8x128xf32>
    %547 = arith.negf %546 : vector<8x128xf32>
    %548 = math.exp %547 : vector<8x128xf32>
    %cst_195 = arith.constant 1.000000e+00 : f32
    %549 = vector.broadcast %cst_195 : f32 to vector<8x128xf32>
    %550 = arith.addf %549, %548 : vector<8x128xf32>
    %551 = arith.divf %549, %550 : vector<8x128xf32>
    %552 = vector.extract_strided_slice %516 {offsets = [0, 128], sizes = [8, 128], strides = [1, 1]} : vector<8x512xf32> to vector<8x128xf32>
    %553 = arith.negf %552 : vector<8x128xf32>
    %554 = math.exp %553 : vector<8x128xf32>
    %cst_196 = arith.constant 1.000000e+00 : f32
    %555 = vector.broadcast %cst_196 : f32 to vector<8x128xf32>
    %556 = arith.addf %555, %554 : vector<8x128xf32>
    %557 = arith.divf %555, %556 : vector<8x128xf32>
    %558 = vector.extract_strided_slice %516 {offsets = [0, 256], sizes = [8, 128], strides = [1, 1]} : vector<8x512xf32> to vector<8x128xf32>
    %559 = math.tanh %558 : vector<8x128xf32>
    %560 = vector.extract_strided_slice %516 {offsets = [0, 384], sizes = [8, 128], strides = [1, 1]} : vector<8x512xf32> to vector<8x128xf32>
    %561 = arith.negf %560 : vector<8x128xf32>
    %562 = math.exp %561 : vector<8x128xf32>
    %cst_197 = arith.constant 1.000000e+00 : f32
    %563 = vector.broadcast %cst_197 : f32 to vector<8x128xf32>
    %564 = arith.addf %563, %562 : vector<8x128xf32>
    %565 = arith.divf %563, %564 : vector<8x128xf32>
    %566 = arith.mulf %557, %498 : vector<8x128xf32>
    %567 = arith.mulf %551, %559 : vector<8x128xf32>
    %568 = arith.addf %566, %567 : vector<8x128xf32>
    %569 = math.tanh %568 : vector<8x128xf32>
    %570 = arith.mulf %565, %569 : vector<8x128xf32>
    %571 = arith.truncf %570 : vector<8x128xf32> to vector<8x128xbf16>
    %c1_198 = arith.constant 1 : index
    %c7_199 = arith.constant 7 : index
    %c0_200 = arith.constant 0 : index
    %c0_201 = arith.constant 0 : index
    %572 = vector.load %arg3[%c1_198, %c7_199, %c0_200, %c0_201] : memref<2x8x8x128xbf16, #tpu.memory_space<vmem>>, vector<1x1x8x128xbf16>
    %573 = vector.shape_cast %572 : vector<1x1x8x128xbf16> to vector<8x128xbf16>
    %574 = vector.shape_cast %571 : vector<8x128xbf16> to vector<1x1x8x128xbf16>
    tpu.vector_store %arg3[%c1_198, %c7_199, %c0_200, %c0_201], %574 {strides = array<i32>} : memref<2x8x8x128xbf16, #tpu.memory_space<vmem>>, vector<1x1x8x128xbf16>,
    %c0_202 = arith.constant 0 : index
    %c0_203 = arith.constant 0 : index
    %c0_204 = arith.constant 0 : index
    %575 = vector.load %arg4[%c0_202, %c0_203, %c0_204] : memref<2x8x128xf32, #tpu.memory_space<vmem>>, vector<1x8x128xf32>
    %576 = vector.shape_cast %575 : vector<1x8x128xf32> to vector<8x128xf32>
    %577 = vector.shape_cast %541 : vector<8x128xf32> to vector<1x8x128xf32>
    tpu.vector_store %arg4[%c0_202, %c0_203, %c0_204], %577 {strides = array<i32>} : memref<2x8x128xf32, #tpu.memory_space<vmem>>, vector<1x8x128xf32>,
    %c1_205 = arith.constant 1 : index
    %c0_206 = arith.constant 0 : index
    %c0_207 = arith.constant 0 : index
    %578 = vector.load %arg4[%c1_205, %c0_206, %c0_207] : memref<2x8x128xf32, #tpu.memory_space<vmem>>, vector<1x8x128xf32>
    %579 = vector.shape_cast %578 : vector<1x8x128xf32> to vector<8x128xf32>
    %580 = vector.shape_cast %570 : vector<8x128xf32> to vector<1x8x128xf32>
    tpu.vector_store %arg4[%c1_205, %c0_206, %c0_207], %580 {strides = array<i32>} : memref<2x8x128xf32, #tpu.memory_space<vmem>>, vector<1x8x128xf32>,
    %c0_208 = arith.constant 0 : index
    %c0_209 = arith.constant 0 : index
    %c0_210 = arith.constant 0 : index
    %581 = vector.load %arg5[%c0_208, %c0_209, %c0_210] : memref<2x8x128xf32, #tpu.memory_space<vmem>>, vector<1x8x128xf32>
    %582 = vector.shape_cast %581 : vector<1x8x128xf32> to vector<8x128xf32>
    %583 = vector.shape_cast %539 : vector<8x128xf32> to vector<1x8x128xf32>
    tpu.vector_store %arg5[%c0_208, %c0_209, %c0_210], %583 {strides = array<i32>} : memref<2x8x128xf32, #tpu.memory_space<vmem>>, vector<1x8x128xf32>,
    %c1_211 = arith.constant 1 : index
    %c0_212 = arith.constant 0 : index
    %c0_213 = arith.constant 0 : index
    %584 = vector.load %arg5[%c1_211, %c0_212, %c0_213] : memref<2x8x128xf32, #tpu.memory_space<vmem>>, vector<1x8x128xf32>
    %585 = vector.shape_cast %584 : vector<1x8x128xf32> to vector<8x128xf32>
    %586 = vector.shape_cast %568 : vector<8x128xf32> to vector<1x8x128xf32>
    tpu.vector_store %arg5[%c1_211, %c0_212, %c0_213], %586 {strides = array<i32>} : memref<2x8x128xf32, #tpu.memory_space<vmem>>, vector<1x8x128xf32>,
    return
  }
  func.func @transform_0(%arg0: i32) -> (i32, i32, i32, i32) {
    %c0_i32 = arith.constant 0 : i32
    %c0_i32_0 = arith.constant 0 : i32
    %c0_i32_1 = arith.constant 0 : i32
    %c0_i32_2 = arith.constant 0 : i32
    return %c0_i32, %arg0, %c0_i32_0, %c0_i32_1 : i32, i32, i32, i32
  }
  func.func @transform_1(%arg0: i32) -> (i32, i32, i32) {
    %c0_i32 = arith.constant 0 : i32
    %c0_i32_0 = arith.constant 0 : i32
    %c0_i32_1 = arith.constant 0 : i32
    %c0_i32_2 = arith.constant 0 : i32
    return %c0_i32, %c0_i32_0, %c0_i32_1 : i32, i32, i32
  }
  func.func @transform_2(%arg0: i32) -> (i32, i32, i32, i32) {
    %c0_i32 = arith.constant 0 : i32
    %c0_i32_0 = arith.constant 0 : i32
    %c0_i32_1 = arith.constant 0 : i32
    %c0_i32_2 = arith.constant 0 : i32
    return %c0_i32, %arg0, %c0_i32_0, %c0_i32_1 : i32, i32, i32, i32
  }
}

</mosaic_0001>

<bundles_post_ra>
// kernel: brnn_forward.2
= control target key start
LH: loop header
LB: loop body
LE: loop exit
PB: predicated region body
PF: predicated region fallthrough
CT: control target
= control target key end

     0   :  { %v4402_v1 = vmov 0   ;;  %v4404_v37 = vmov 0.0|0.0   ;;  %s4399_s1 = inlined_call_operand.vmem [shape: bf16[2,128,512], index: 1, kind: input, shape index: {}]   ;;  %s4400_s0 = inlined_call_operand.vmem [shape: bf16[2,8,8,512], index: 0, kind: input, shape index: {}]   ;;  %s4401_s2 = inlined_call_operand.vmem [shape: bf16[2,8,8,128], index: 2, kind: output, shape index: {}]  }
   0x1   :  { %v2982_v0 = vld [vmem:[%s4399_s1 + $0x4] ss:$16 sps:$4 sm:$0xff]   ;;  %290 = vmatprep.mubr.bf16.mxu0 %v4402_v1  ;;  %331 = vmatprep.mubr.bf16.mxu1 %v4402_v1  ;;  %v2989_v2 = vld [vmem:[%s4399_s1] ss:$16 sps:$4 sm:$0xff]   ;;  %v3012_v6 = vld [vmem:[%s4399_s1 + $0xc] ss:$16 sps:$4 sm:$0xff]  }
   0x2   :  { %258 = vmatprep.subr.bf16.mxu0 %v2982_v0  ;;  %v2995_v3 = vld [vmem:[%s4399_s1 + $0x24] ss:$16 sps:$4 sm:$0xff]   ;;  %v3001_v4 = vld [vmem:[%s4399_s1 + $0x20] ss:$16 sps:$4 sm:$0xff]   ;;  %v3017_v7 = vld [vmem:[%s4399_s1 + $0x8] ss:$16 sps:$4 sm:$0xff]   ;;  %299 = vmatprep.subr.bf16.mxu1 %v3012_v6 }
   0x3   :  { %259 = vmatpush1.bf16.msra.mxu0 %v2989_v2  ;;  %v3007_v5 = vld [vmem:[%s4399_s1 + $0x44] ss:$16 sps:$4 sm:$0xff]   ;;  %v3023_v8 = vld [vmem:[%s4399_s1 + $0x40] ss:$16 sps:$4 sm:$0xff]   ;;  %300 = vmatpush1.bf16.msra.mxu1 %v3017_v7  ;;  %v3036_v10 = vld [vmem:[%s4399_s1 + $0x2c] ss:$16 sps:$4 sm:$0xff]  }
   0x4   :  { %260 = vmatprep.subr.bf16.mxu0 %v2995_v3  ;;  %v3030_v9 = vld [vmem:[%s4399_s1 + $0x64] ss:$16 sps:$4 sm:$0xff]   ;;  %v3041_v11 = vld [vmem:[%s4399_s1 + $0x28] ss:$16 sps:$4 sm:$0xff]   ;;  %301 = vmatprep.subr.bf16.mxu1 %v3036_v10  ;;  %v3048_v12 = vld [vmem:[%s4399_s1 + $0x60] ss:$16 sps:$4 sm:$0xff]  }
   0x5   :  { %4503 = vst [vmem:[#allocation4_spill] sm:$0xff] %v3048_v12  ;;  %v3053_v13 = vld [vmem:[%s4399_s1 + $0x84] ss:$16 sps:$4 sm:$0xff]   ;;  %v3058_v14 = vld [vmem:[%s4399_s1 + $0x4c] ss:$16 sps:$4 sm:$0xff]  }
   0x6   :  { %4504 = vst [vmem:[#allocation5_spill] sm:$0xff] %v3053_v13  ;;  %v3065_v15 = vld [vmem:[%s4399_s1 + $0x48] ss:$16 sps:$4 sm:$0xff]   ;;  %v3071_v16 = vld [vmem:[%s4399_s1 + $0x6c] ss:$16 sps:$4 sm:$0xff]  }
   0x7   :  { %261 = vmatpush1.bf16.msra.mxu0 %v3001_v4  ;;  %302 = vmatpush1.bf16.msra.mxu1 %v3041_v11  ;;  %4505 = vst [vmem:[#allocation6_spill] sm:$0xff] %v3071_v16  ;;  %v3077_v17 = vld [vmem:[%s4399_s1 + $0x80] ss:$16 sps:$4 sm:$0xff]   ;;  %v3083_v18 = vld [vmem:[%s4399_s1 + $0xa4] ss:$16 sps:$4 sm:$0xff]  }
   0x8   :  { %262 = vmatprep.subr.bf16.mxu0 %v3007_v5  ;;  %303 = vmatprep.subr.bf16.mxu1 %v3058_v14  ;;  %4506 = vst [vmem:[#allocation7_spill] sm:$0xff] %v3077_v17  ;;  %4507 = vst [vmem:[#allocation8_spill] sm:$0xff] %v3083_v18  ;;  %v3089_v19 = vld [vmem:[%s4399_s1 + $0x68] ss:$16 sps:$4 sm:$0xff]   ;;  %v3095_v20 = vld [vmem:[%s4399_s1 + $0x8c] ss:$16 sps:$4 sm:$0xff]  }
   0x9   :  { %4508 = vst [vmem:[#allocation9_spill] sm:$0xff] %v3089_v19  ;;  %4509 = vst [vmem:[#allocation10_spill] sm:$0xff] %v3095_v20  ;;  %v3101_v21 = vld [vmem:[%s4399_s1 + $0xa0] ss:$16 sps:$4 sm:$0xff]   ;;  %v3106_v22 = vld [vmem:[%s4399_s1 + $0xc4] ss:$16 sps:$4 sm:$0xff]  }
   0xa   :  { %4510 = vst [vmem:[#allocation11_spill] sm:$0xff] %v3101_v21  ;;  %4511 = vst [vmem:[#allocation12_spill] sm:$0xff] %v3106_v22  ;;  %v3113_v23 = vld [vmem:[%s4399_s1 + $0x88] ss:$16 sps:$4 sm:$0xff]   ;;  %v3119_v24 = vld [vmem:[%s4399_s1 + $0xac] ss:$16 sps:$4 sm:$0xff]  }
   0xb   :  { %263 = vmatpush1.bf16.msra.mxu0 %v3023_v8  ;;  %304 = vmatpush1.bf16.msra.mxu1 %v3065_v15  ;;  %4512 = vst [vmem:[#allocation13_spill] sm:$0xff] %v3113_v23  ;;  %4513 = vst [vmem:[#allocation14_spill] sm:$0xff] %v3119_v24  ;;  %v3125_v25 = vld [vmem:[%s4399_s1 + $0xc0] ss:$16 sps:$4 sm:$0xff]   ;;  %v3131_v26 = vld [vmem:[%s4399_s1 + $0xe4] ss:$16 sps:$4 sm:$0xff]  }
   0xc   :  { %264 = vmatprep.subr.bf16.mxu0 %v3030_v9  ;;  %305 = vmatprep.subr.bf16.mxu1 %v3071_v16  ;;  %4514 = vst [vmem:[#allocation15_spill] sm:$0xff] %v3125_v25  ;;  %4515 = vst [vmem:[#allocation16_spill] sm:$0xff] %v3131_v26  ;;  %v3137_v27 = vld [vmem:[%s4399_s1 + $0xa8] ss:$16 sps:$4 sm:$0xff]   ;;  %v3143_v28 = vld [vmem:[%s4399_s1 + $0xcc] ss:$16 sps:$4 sm:$0xff]  }
   0xd   :  { %4516 = vst [vmem:[#allocation17_spill] sm:$0xff] %v3137_v27  ;;  %4517 = vst [vmem:[#allocation18_spill] sm:$0xff] %v3143_v28  ;;  %v3149_v29 = vld [vmem:[%s4399_s1 + $0xe0] ss:$16 sps:$4 sm:$0xff]   ;;  %v3154_v30 = vld [vmem:[%s4399_s1 + $0x104] ss:$16 sps:$4 sm:$0xff]  }
   0xe   :  { %4518 = vst [vmem:[#allocation19_spill] sm:$0xff] %v3149_v29  ;;  %4519 = vst [vmem:[#allocation20_spill] sm:$0xff] %v3154_v30  ;;  %v3161_v31 = vld [vmem:[%s4399_s1 + $0xc8] ss:$16 sps:$4 sm:$0xff]   ;;  %v3167_v32 = vld [vmem:[%s4399_s1 + $0xec] ss:$16 sps:$4 sm:$0xff]  }
   0xf   :  { %265 = vmatpush1.bf16.msra.mxu0 %v3048_v12  ;;  %306 = vmatpush1.bf16.msra.mxu1 %v3089_v19  ;;  %4520 = vst [vmem:[#allocation21_spill] sm:$0xff] %v3161_v31  ;;  %4521 = vst [vmem:[#allocation22_spill] sm:$0xff] %v3167_v32  ;;  %v3173_v33 = vld [vmem:[%s4399_s1 + $0x100] ss:$16 sps:$4 sm:$0xff]   ;;  %v3179_v34 = vld [vmem:[%s4399_s1 + $0x124] ss:$16 sps:$4 sm:$0xff]  }
  0x10   :  { %266 = vmatprep.subr.bf16.mxu0 %v3053_v13  ;;  %307 = vmatprep.subr.bf16.mxu1 %v3095_v20  ;;  %v3185_v35 = vld [vmem:[%s4399_s1 + $0xe8] ss:$16 sps:$4 sm:$0xff]   ;;  %v3191_v36 = vld [vmem:[%s4399_s1 + $0x10c] ss:$16 sps:$4 sm:$0xff]   ;;  %v3198_v38 = vld [vmem:[%s4399_s1 + $0x120] ss:$16 sps:$4 sm:$0xff]  }
  0x11   :  { %4522 = vst [vmem:[#allocation23_spill] sm:$0xff] %v3185_v35  ;;  %4523 = vst [vmem:[#allocation24_spill] sm:$0xff] %v3191_v36  ;;  %v3203_v39 = vld [vmem:[%s4399_s1 + $0x144] ss:$16 sps:$4 sm:$0xff]   ;;  %v3211_v40 = vld [vmem:[%s4399_s1 + $0x108] ss:$16 sps:$4 sm:$0xff]  }
  0x12   :  { %v3217_v41 = vld [vmem:[%s4399_s1 + $0x12c] ss:$16 sps:$4 sm:$0xff]   ;;  %v3223_v42 = vld [vmem:[%s4399_s1 + $0x140] ss:$16 sps:$4 sm:$0xff]   ;;  %v3228_v43 = vld [vmem:[%s4399_s1 + $0x164] ss:$16 sps:$4 sm:$0xff]  }
  0x13   :  { %267 = vmatpush1.bf16.msra.mxu0 %v3077_v17  ;;  %308 = vmatpush1.bf16.msra.mxu1 %v3113_v23  ;;  %v3236_v44 = vld [vmem:[%s4399_s1 + $0x128] ss:$16 sps:$4 sm:$0xff]   ;;  %v3242_v45 = vld [vmem:[%s4399_s1 + $0x14c] ss:$16 sps:$4 sm:$0xff]   ;;  %v3249_v46 = vld [vmem:[%s4399_s1 + $0x160] ss:$16 sps:$4 sm:$0xff]  }
  0x14   :  { %268 = vmatprep.subr.bf16.mxu0 %v3083_v18  ;;  %309 = vmatprep.subr.bf16.mxu1 %v3119_v24  ;;  %v3255_v47 = vld [vmem:[%s4399_s1 + $0x184] ss:$16 sps:$4 sm:$0xff]   ;;  %v3261_v48 = vld [vmem:[%s4399_s1 + $0x148] ss:$16 sps:$4 sm:$0xff]   ;;  %v3267_v49 = vld [vmem:[%s4399_s1 + $0x16c] ss:$16 sps:$4 sm:$0xff]  }
  0x15   :  { %v3273_v50 = vld [vmem:[%s4399_s1 + $0x180] ss:$16 sps:$4 sm:$0xff]   ;;  %v3279_v51 = vld [vmem:[%s4399_s1 + $0x1a4] ss:$16 sps:$4 sm:$0xff]   ;;  %v3285_v52 = vld [vmem:[%s4399_s1 + $0x168] ss:$16 sps:$4 sm:$0xff]  }
  0x16   :  { %v3291_v53 = vld [vmem:[%s4399_s1 + $0x18c] ss:$16 sps:$4 sm:$0xff]   ;;  %v3297_v54 = vld [vmem:[%s4399_s1 + $0x1a0] ss:$16 sps:$4 sm:$0xff]   ;;  %v3303_v55 = vld [vmem:[%s4399_s1 + $0x1c4] ss:$16 sps:$4 sm:$0xff]  }
  0x17   :  { %269 = vmatpush1.bf16.msra.mxu0 %v3101_v21  ;;  %310 = vmatpush1.bf16.msra.mxu1 %v3137_v27  ;;  %v3309_v56 = vld [vmem:[%s4399_s1 + $0x188] ss:$16 sps:$4 sm:$0xff]   ;;  %v3315_v57 = vld [vmem:[%s4399_s1 + $0x1ac] ss:$16 sps:$4 sm:$0xff]   ;;  %v3321_v58 = vld [vmem:[%s4399_s1 + $0x1c0] ss:$16 sps:$4 sm:$0xff]  }
  0x18   :  { %270 = vmatprep.subr.bf16.mxu0 %v3106_v22  ;;  %311 = vmatprep.subr.bf16.mxu1 %v3143_v28  ;;  %4524 = vst [vmem:[#allocation25_spill] sm:$0xff] %v3321_v58  ;;  %v3327_v59 = vld [vmem:[%s4399_s1 + $0x1e4] ss:$16 sps:$4 sm:$0xff]   ;;  %v3333_v60 = vld [vmem:[%s4399_s1 + $0x1a8] ss:$16 sps:$4 sm:$0xff]  }
  0x19   :  { %4525 = vst [vmem:[#allocation26_spill] sm:$0xff] %v3327_v59  ;;  %v3339_v61 = vld [vmem:[%s4399_s1 + $0x1cc] ss:$16 sps:$4 sm:$0xff]   ;;  %v3345_v62 = vld [vmem:[%s4399_s1 + $0x1e0] ss:$16 sps:$4 sm:$0xff]  }
  0x1a   :  { %v3352_v63 = vld [vmem:[%s4399_s1 + $0x1c8] ss:$16 sps:$4 sm:$0xff]  }
  0x1b   :  { %271 = vmatpush1.bf16.msra.mxu0 %v3125_v25  ;;  %312 = vmatpush1.bf16.msra.mxu1 %v3161_v31 }
  0x1c   :  { %272 = vmatprep.subr.bf16.mxu0 %v3131_v26  ;;  %313 = vmatprep.subr.bf16.mxu1 %v3167_v32 }
  0x1f   :  { %273 = vmatpush1.bf16.msra.mxu0 %v3149_v29  ;;  %314 = vmatpush1.bf16.msra.mxu1 %v3185_v35 }
  0x20   :  { %512 = vmatprep.subr.bf16.mxu0 %v3154_v30  ;;  %553 = vmatprep.subr.bf16.mxu1 %v3191_v36 }
  0x22   :  { %291 = vmatmul.mubr.bf16.vlgmr.msra.gmra.mrb[0].mxu0 %v4404_v37  ;;  %332 = vmatmul.mubr.bf16.vlgmr.msra.gmra.mrb[0].mxu1 %v4404_v37  ;;  %v3365_v37 = vld [vmem:[%s4399_s1 + $0x1e8] ss:$16 sps:$4 sm:$0xff]  }
  0x23   :  { %513 = vmatpush1.bf16.msra.mxu0 %v3173_v33  ;;  %544 = vmatprep.mubr.bf16.mxu0 %v4402_v1 }
  0x24   :  { %514 = vmatprep.subr.bf16.mxu0 %v3179_v34  ;;  %554 = vmatpush1.bf16.msra.mxu1 %v3211_v40 }
  0x25   :  { %555 = vmatprep.subr.bf16.mxu1 %v3217_v41  ;;  %585 = vmatprep.mubr.bf16.mxu1 %v4402_v1  ;;  %v3358_v1 = vld [vmem:[%s4399_s1 + $0x1ec] ss:$16 sps:$4 sm:$0xff]  }
  0x27   :  { %515 = vmatpush1.bf16.msra.mxu0 %v3198_v38 }
  0x28   :  { %516 = vmatprep.subr.bf16.mxu0 %v3203_v39  ;;  %556 = vmatpush1.bf16.msra.mxu1 %v3236_v44 }
  0x29   :  { %557 = vmatprep.subr.bf16.mxu1 %v3242_v45 }
  0x2b   :  { %517 = vmatpush1.bf16.msra.mxu0 %v3223_v42 }
  0x2c   :  { %518 = vmatprep.subr.bf16.mxu0 %v3228_v43  ;;  %558 = vmatpush1.bf16.msra.mxu1 %v3261_v48 }
  0x2d   :  { %559 = vmatprep.subr.bf16.mxu1 %v3267_v49 }
  0x2f   :  { %519 = vmatpush1.bf16.msra.mxu0 %v3249_v46 }
  0x30   :  { %520 = vmatprep.subr.bf16.mxu0 %v3255_v47  ;;  %560 = vmatpush1.bf16.msra.mxu1 %v3285_v52 }
  0x31   :  { %561 = vmatprep.subr.bf16.mxu1 %v3291_v53 }
  0x33   :  { %521 = vmatpush1.bf16.msra.mxu0 %v3273_v50 }
  0x34   :  { %522 = vmatprep.subr.bf16.mxu0 %v3279_v51  ;;  %562 = vmatpush1.bf16.msra.mxu1 %v3309_v56 }
  0x35   :  { %563 = vmatprep.subr.bf16.mxu1 %v3315_v57 }
  0x37   :  { %523 = vmatpush1.bf16.msra.mxu0 %v3297_v54 }
  0x38   :  { %524 = vmatprep.subr.bf16.mxu0 %v3303_v55  ;;  %564 = vmatpush1.bf16.msra.mxu1 %v3333_v60 }
  0x39   :  { %565 = vmatprep.subr.bf16.mxu1 %v3339_v61 }
  0x3b   :  { %525 = vmatpush1.bf16.msra.mxu0 %v3321_v58  ;;  %v4527_v58 = vmov 0  }
  0x3c   :  { %526 = vmatprep.subr.bf16.mxu0 %v3327_v59  ;;  %566 = vmatpush1.bf16.msra.mxu1 %v3352_v63  ;;  %v4526_v59 = vmov 0.0|0.0  }
  0x3d   :  { %567 = vmatprep.subr.bf16.mxu1 %v3358_v1 }
  0x3f   :  { %527 = vmatpush1.bf16.msra.mxu0 %v3345_v62 }
  0x40   :  { %658 = vmatprep.subr.bf16.mxu0 %v2982_v0  ;;  %568 = vmatpush1.bf16.msra.mxu1 %v3365_v37 }
  0x41   :  { %699 = vmatprep.subr.bf16.mxu1 %v3012_v6 }
  0x42   :  { %545 = vmatmul.mubr.bf16.vlgmr.msra.gmra.mrb[4].mxu0 %v4526_v59 }
  0x43   :  { %659 = vmatpush1.bf16.msra.mxu0 %v2989_v2  ;;  %690 = vmatprep.mubr.bf16.mxu0 %v4527_v58 }
  0x44   :  { %660 = vmatprep.subr.bf16.mxu0 %v2995_v3  ;;  %586 = vmatmul.mubr.bf16.vlgmr.msra.gmra.mrb[4].mxu1 %v4526_v59  ;;  %v91_v59 = vld [vmem:[%s4400_s0] sm:$0xff] }
  0x45   :  { %700 = vmatpush1.bf16.msra.mxu1 %v3017_v7  ;;  %731 = vmatprep.mubr.bf16.mxu1 %v4527_v58 }
  0x46   :  { %701 = vmatprep.subr.bf16.mxu1 %v3036_v10 }
  0x47   :  { %661 = vmatpush1.bf16.msra.mxu0 %v3001_v4 }
  0x48   :  { %662 = vmatprep.subr.bf16.mxu0 %v3007_v5 }
  0x49   :  { %702 = vmatpush1.bf16.msra.mxu1 %v3041_v11 }
  0x4a   :  { %703 = vmatprep.subr.bf16.mxu1 %v3058_v14 }
  0x4b   :  { %663 = vmatpush1.bf16.msra.mxu0 %v3023_v8 }
  0x4c   :  { %664 = vmatprep.subr.bf16.mxu0 %v3030_v9 }
  0x4d   :  { %704 = vmatpush1.bf16.msra.mxu1 %v3065_v15 }
  0x4e   :  { %705 = vmatprep.subr.bf16.mxu1 %v3071_v16 }
  0x4f   :  { %665 = vmatpush1.bf16.msra.mxu0 %v3048_v12 }
  0x50   :  { %666 = vmatprep.subr.bf16.mxu0 %v3053_v13 }
  0x51   :  { %706 = vmatpush1.bf16.msra.mxu1 %v3089_v19 }
  0x52   :  { %707 = vmatprep.subr.bf16.mxu1 %v3095_v20 }
  0x53   :  { %667 = vmatpush1.bf16.msra.mxu0 %v3077_v17 }
  0x54   :  { %668 = vmatprep.subr.bf16.mxu0 %v3083_v18 }
  0x55   :  { %708 = vmatpush1.bf16.msra.mxu1 %v3113_v23 }
  0x56   :  { %709 = vmatprep.subr.bf16.mxu1 %v3119_v24 }
  0x57   :  { %669 = vmatpush1.bf16.msra.mxu0 %v3101_v21 }
  0x58   :  { %670 = vmatprep.subr.bf16.mxu0 %v3106_v22 }
  0x59   :  { %710 = vmatpush1.bf16.msra.mxu1 %v3137_v27 }
  0x5a   :  { %711 = vmatprep.subr.bf16.mxu1 %v3143_v28 }
  0x5b   :  { %671 = vmatpush1.bf16.msra.mxu0 %v3125_v25  ;;  %v93_v25 = vunpack.c.l.bf16 %v91_v59 }
  0x5c   :  { %672 = vmatprep.subr.bf16.mxu0 %v3131_v26  ;;  %v94_v26 = vunpack.c.h.bf16 %v91_v59 }
  0x5d   :  { %712 = vmatpush1.bf16.msra.mxu1 %v3161_v31 }
  0x5e   :  { %713 = vmatprep.subr.bf16.mxu1 %v3167_v32 }
  0x5f   :  { %673 = vmatpush1.bf16.msra.mxu0 %v3149_v29  ;;  %v92_v29 = vld [vmem:[%s4400_s0 + $0x8] sm:$0xff] }
  0x60   :  { %751 = vmatprep.subr.bf16.mxu0 %v3154_v30  ;;  %v95_v59 = vunpack.c.l.bf16 %v92_v29 }
  0x61   :  { %714 = vmatpush1.bf16.msra.mxu1 %v3185_v35  ;;  %v96_v35 = vunpack.c.h.bf16 %v92_v29 }
  0x62   :  { %792 = vmatprep.subr.bf16.mxu1 %v3191_v36 }
  0xf5   :  { %v292_v22 = vpop.f32.mrb[0].mxu0  ;;  %v333_v36 = vpop.f32.mrb[0].mxu1 }
  0xf6   :  { %v340_v31 = vadd.f32 %v292_v22, %v93_v25  ;;  %v294_v28 = vpop.f32.mrb[1].mxu0  ;;  %v335_v18 = vpop.f32.mrb[1].mxu1  ;;  %v342_v19 = vadd.f32 %v333_v36, %v95_v59 }
  0xf7   :  { %v341_v30 = vadd.f32 %v294_v28, %v94_v26  ;;  %v296_v27 = vpop.f32.mrb[2].mxu0  ;;  %v343_v23 = vadd.f32 %v335_v18, %v96_v35  ;;  %v337_v17 = vpop.f32.mrb[2].mxu1 }
  0xf8   :  { %v2437_v32 = vmul.f32 -1.442695, %v340_v31  ;;  %v297_v21 = vpop.f32.mrb[3].mxu0  ;;  %v338_v20 = vpop.f32.mrb[3].mxu1 }
  0xf9   :  { %v2438_v24 = vmul.f32 -1.442695, %v341_v30  ;;  %v2439_v13 = vmul.f32 -1.442695, %v343_v23 }
  0xfa   :  { %2626 = vpow2.f32 %v2437_v32 }
  0xfb   :  { %2628 = vpow2.f32 %v2438_v24  ;;  %v2403_v24 = vld [vmem:[%s4400_s0 + $0x80] sm:$0xff] }
  0xfc   :  { %2630 = vpow2.f32 %v2439_v13  ;;  %v347_v23 = vunpack.c.l.bf16 %v2403_v24  ;;  %v348_v30 = vunpack.c.h.bf16 %v2403_v24 }
  0xfd   :  { %2632 = vtanh.f32 %v342_v19  ;;  %v2404_v19 = vld [vmem:[%s4400_s0 + $0x88] sm:$0xff] }
 0x104   :  { %v2627_v12 = vpop.eup %2626 }
 0x105   :  { %v2629_v22 = vpop.eup %2628  ;;  %v601_v25 = vadd.f32 1.0, %v2627_v12 }
 0x106   :  { %v607_v26 = vadd.f32 1.0, %v2629_v22  ;;  %v2631_v21 = vpop.eup %2630 }
 0x107   :  { %2634 = vrcp.f32 %v601_v25  ;;  %v2633_v27 = vpop.eup %2632  ;;  %v614_v17 = vadd.f32 1.0, %v2631_v21  ;;  %v350_v25 = vunpack.c.h.bf16 %v2404_v19 }
 0x108   :  { %2636 = vrcp.f32 %v607_v26 }
 0x109   :  { %2638 = vrcp.f32 %v614_v17  ;;  %v349_v17 = vunpack.c.l.bf16 %v2404_v19 }
 0x111   :  { %v2635_v18 = vpop.eup %2634 }
 0x112   :  { %v2637_v28 = vpop.eup %2636  ;;  %v618_v20 = vmul.f32 %v2635_v18, %v2633_v27 }
 0x113   :  { %v617_v29 = vmul.f32 0.0, %v2637_v28 }
 0x115   :  { %v3416_v13 = vadd.f32 %v618_v20, %v617_v29  ;;  %v546_v12 = vpop.f32.mrb[4].mxu0  ;;  %v2639_v20 = vpop.eup %2638 }
 0x116   :  { %v594_v31 = vadd.f32 %v546_v12, %v347_v23  ;;  %v548_v32 = vpop.f32.mrb[5].mxu0 }
 0x117   :  { %4528 = vst [vmem:[#allocation27_spill] sm:$0xff] %v3416_v13  ;;  %2640 = vtanh.f32 %v3416_v13  ;;  %v595_v35 = vadd.f32 %v548_v32, %v348_v30  ;;  %v550_v36 = vpop.f32.mrb[6].mxu0  ;;  %v587_v21 = vpop.f32.mrb[4].mxu1 }
 0x118   :  { %v2440_v59 = vmul.f32 -1.442695, %v594_v31  ;;  %v551_v22 = vpop.f32.mrb[7].mxu0  ;;  %v589_v27 = vpop.f32.mrb[5].mxu1  ;;  %v596_v12 = vadd.f32 %v587_v21, %v349_v17 }
 0x119   :  { %v2441_v26 = vmul.f32 -1.442695, %v595_v35  ;;  %v597_v24 = vadd.f32 %v589_v27, %v350_v25  ;;  %v591_v18 = vpop.f32.mrb[6].mxu1  ;;  %v4529_v27 = vld [vmem:[#allocation25_spill] sm:$0xff] }
 0x11a   :  { %2642 = vpow2.f32 %v2440_v59  ;;  %v592_v28 = vpop.f32.mrb[7].mxu1 }
 0x11b   :  { %2644 = vpow2.f32 %v2441_v26  ;;  %v2442_v29 = vmul.f32 -1.442695, %v597_v24  ;;  %v4530_v24 = vld [vmem:[#allocation26_spill] sm:$0xff] }
 0x11d   :  { %2646 = vpow2.f32 %v2442_v29  ;;  %v4538_v29 = vld [vmem:[#allocation8_spill] sm:$0xff] }
 0x11e   :  { %2648 = vtanh.f32 %v596_v12  ;;  %v4542_v12 = vld [vmem:[#allocation12_spill] sm:$0xff] }
 0x121   :  { %v2641_v23 = vpop.eup %2640 }
 0x122   :  { %v621_v16 = vmul.f32 %v2641_v23, %v2639_v20  ;;  %v4536_v20 = vld [vmem:[#allocation7_spill] sm:$0xff] }
 0x123   :  { %v4540_v23 = vld [vmem:[#allocation11_spill] sm:$0xff] }
 0x124   :  { %v2643_v13 = vpop.eup %2642  ;;  %v622_v30 = vpack.c.bf16 %v621_v16, %v621_v16 }
 0x125   :  { %v2645_v31 = vpop.eup %2644  ;;  %v627_v32 = vadd.f32 1.0, %v2643_v13 }
 0x126   :  { %v633_v35 = vadd.f32 1.0, %v2645_v31  ;;  %623 = vst [vmem:[%s4401_s2] sm:$0xf] %v622_v30  ;;  %691 = vmatmul.mubr.bf16.vlgmr.msra.gmra.mrb[8].mxu0 %v622_v30  ;;  %732 = vmatmul.mubr.bf16.vlgmr.msra.gmra.mrb[8].mxu1 %v622_v30  ;;  %v4543_v30 = vld [vmem:[#allocation18_spill] sm:$0xff]  ;;  %v4544_v31 = vld [vmem:[#allocation15_spill] sm:$0xff] }
 0x127   :  { %2650 = vrcp.f32 %v627_v32  ;;  %752 = vmatpush1.bf16.msra.mxu0 %v3173_v33  ;;  %793 = vmatpush1.bf16.msra.mxu1 %v3211_v40  ;;  %v2647_v16 = vpop.eup %2646  ;;  %v4545_v32 = vld [vmem:[#allocation21_spill] sm:$0xff] }
 0x128   :  { %2652 = vrcp.f32 %v633_v35  ;;  %753 = vmatprep.subr.bf16.mxu0 %v3179_v34  ;;  %794 = vmatprep.subr.bf16.mxu1 %v3217_v41  ;;  %v2649_v13 = vpop.eup %2648  ;;  %v640_v36 = vadd.f32 1.0, %v2647_v16  ;;  %v4546_v35 = vld [vmem:[#allocation16_spill] sm:$0xff]  ;;  %v4547_v16 = vld [vmem:[#allocation22_spill] sm:$0xff] }
 0x129   :  { %783 = vmatprep.mubr.bf16.mxu0 %v4527_v58  ;;  %824 = vmatprep.mubr.bf16.mxu1 %v4527_v58 }
 0x12a   :  { %2654 = vrcp.f32 %v640_v36  ;;  %v4550_v36 = vld [vmem:[#allocation20_spill] sm:$0xff] }
 0x12b   :  { %754 = vmatpush1.bf16.msra.mxu0 %v3198_v38  ;;  %795 = vmatpush1.bf16.msra.mxu1 %v3236_v44 }
 0x12c   :  { %755 = vmatprep.subr.bf16.mxu0 %v3203_v39  ;;  %796 = vmatprep.subr.bf16.mxu1 %v3242_v45 }
 0x12f   :  { %756 = vmatpush1.bf16.msra.mxu0 %v3223_v42  ;;  %797 = vmatpush1.bf16.msra.mxu1 %v3261_v48 }
 0x130   :  { %757 = vmatprep.subr.bf16.mxu0 %v3228_v43  ;;  %798 = vmatprep.subr.bf16.mxu1 %v3267_v49 }
 0x131   :  { %v2651_v19 = vpop.eup %2650 }
 0x132   :  { %v2653_v59 = vpop.eup %2652  ;;  %v644_v22 = vmul.f32 %v2651_v19, %v2649_v13  ;;  %v4548_v13 = vld [vmem:[#allocation19_spill] sm:$0xff] }
 0x133   :  { %v643_v25 = vmul.f32 0.0, %v2653_v59  ;;  %758 = vmatpush1.bf16.msra.mxu0 %v3249_v46  ;;  %799 = vmatpush1.bf16.msra.mxu1 %v3285_v52  ;;  %v4549_v19 = vld [vmem:[#allocation23_spill] sm:$0xff]  ;;  %v4551_v59 = vld [vmem:[#allocation24_spill] sm:$0xff] }
 0x134   :  { %759 = vmatprep.subr.bf16.mxu0 %v3255_v47  ;;  %800 = vmatprep.subr.bf16.mxu1 %v3291_v53  ;;  %v2655_v21 = vpop.eup %2654 }
 0x135   :  { %v3443_v26 = vadd.f32 %v644_v22, %v643_v25  ;;  %v2444_v22 = vld [vmem:[%s4400_s0 + $0x10] sm:$0xff] }
 0x136   :  { %v654_v25 = vunpack.c.l.bf16 %v2444_v22 }
 0x137   :  { %2656 = vtanh.f32 %v3443_v26  ;;  %760 = vmatpush1.bf16.msra.mxu0 %v3273_v50  ;;  %801 = vmatpush1.bf16.msra.mxu1 %v3309_v56 }
 0x138   :  { %761 = vmatprep.subr.bf16.mxu0 %v3279_v51  ;;  %802 = vmatprep.subr.bf16.mxu1 %v3315_v57 }
 0x13b   :  { %762 = vmatpush1.bf16.msra.mxu0 %v3297_v54  ;;  %803 = vmatpush1.bf16.msra.mxu1 %v3333_v60 }
 0x13c   :  { %763 = vmatprep.subr.bf16.mxu0 %v3303_v55  ;;  %804 = vmatprep.subr.bf16.mxu1 %v3339_v61 }
 0x13f   :  { %764 = vmatpush1.bf16.msra.mxu0 %v4529_v27  ;;  %805 = vmatpush1.bf16.msra.mxu1 %v3352_v63 }
 0x140   :  { %765 = vmatprep.subr.bf16.mxu0 %v4530_v24  ;;  %806 = vmatprep.subr.bf16.mxu1 %v3358_v1 }
 0x141   :  { %v2657_v18 = vpop.eup %2656 }
 0x142   :  { %v647_v17 = vmul.f32 %v2657_v18, %v2655_v21  ;;  %v655_v21 = vunpack.c.h.bf16 %v2444_v22 }
 0x143   :  { %766 = vmatpush1.bf16.msra.mxu0 %v3345_v62  ;;  %807 = vmatpush1.bf16.msra.mxu1 %v3365_v37 }
 0x144   :  { %v648_v28 = vpack.c.bf16 %v647_v17, %v647_v17  ;;  %898 = vmatprep.subr.bf16.mxu0 %v2982_v0  ;;  %939 = vmatprep.subr.bf16.mxu1 %v3012_v6  ;;  %v4531_v0 = vld [vmem:[#allocation6_spill] sm:$0xff] }
 0x146   :  { %2443 = vst [vmem:[%s4401_s2 + $0x20] sm:$0xf] %v648_v28  ;;  %784 = vmatmul.mubr.bf16.vlgmr.msra.gmra.mrb[12].mxu0 %v648_v28  ;;  %825 = vmatmul.mubr.bf16.vlgmr.msra.gmra.mrb[12].mxu1 %v648_v28 }
 0x147   :  { %899 = vmatpush1.bf16.msra.mxu0 %v2989_v2  ;;  %940 = vmatpush1.bf16.msra.mxu1 %v3017_v7  ;;  %v4532_v2 = vld [vmem:[#allocation4_spill] sm:$0xff]  ;;  %v4534_v7 = vld [vmem:[#allocation5_spill] sm:$0xff] }
 0x148   :  { %900 = vmatprep.subr.bf16.mxu0 %v2995_v3  ;;  %941 = vmatprep.subr.bf16.mxu1 %v3036_v10  ;;  %v4533_v3 = vld [vmem:[#allocation9_spill] sm:$0xff] }
 0x149   :  { %930 = vmatprep.mubr.bf16.mxu0 %v4527_v58  ;;  %971 = vmatprep.mubr.bf16.mxu1 %v4527_v58 }
 0x14b   :  { %901 = vmatpush1.bf16.msra.mxu0 %v3001_v4  ;;  %942 = vmatpush1.bf16.msra.mxu1 %v3041_v11  ;;  %v4535_v4 = vld [vmem:[#allocation10_spill] sm:$0xff] }
 0x14c   :  { %902 = vmatprep.subr.bf16.mxu0 %v3007_v5  ;;  %943 = vmatprep.subr.bf16.mxu1 %v3058_v14  ;;  %v4537_v5 = vld [vmem:[#allocation13_spill] sm:$0xff] }
 0x14f   :  { %903 = vmatpush1.bf16.msra.mxu0 %v3023_v8  ;;  %944 = vmatpush1.bf16.msra.mxu1 %v3065_v15  ;;  %v4539_v8 = vld [vmem:[#allocation14_spill] sm:$0xff] }
 0x150   :  { %904 = vmatprep.subr.bf16.mxu0 %v3030_v9  ;;  %945 = vmatprep.subr.bf16.mxu1 %v4531_v0  ;;  %v4541_v9 = vld [vmem:[#allocation17_spill] sm:$0xff] }
 0x153   :  { %905 = vmatpush1.bf16.msra.mxu0 %v4532_v2  ;;  %946 = vmatpush1.bf16.msra.mxu1 %v4533_v3 }
 0x154   :  { %906 = vmatprep.subr.bf16.mxu0 %v4534_v7  ;;  %947 = vmatprep.subr.bf16.mxu1 %v4535_v4 }
 0x157   :  { %907 = vmatpush1.bf16.msra.mxu0 %v4536_v20  ;;  %948 = vmatpush1.bf16.msra.mxu1 %v4537_v5 }
 0x158   :  { %908 = vmatprep.subr.bf16.mxu0 %v4538_v29  ;;  %949 = vmatprep.subr.bf16.mxu1 %v4539_v8 }
 0x15b   :  { %909 = vmatpush1.bf16.msra.mxu0 %v4540_v23  ;;  %950 = vmatpush1.bf16.msra.mxu1 %v4541_v9 }
 0x15c   :  { %910 = vmatprep.subr.bf16.mxu0 %v4542_v12  ;;  %951 = vmatprep.subr.bf16.mxu1 %v4543_v30 }
 0x15f   :  { %911 = vmatpush1.bf16.msra.mxu0 %v4544_v31  ;;  %952 = vmatpush1.bf16.msra.mxu1 %v4545_v32 }
 0x160   :  { %912 = vmatprep.subr.bf16.mxu0 %v4546_v35  ;;  %953 = vmatprep.subr.bf16.mxu1 %v4547_v16  ;;  %v2445_v16 = vld [vmem:[%s4400_s0 + $0x18] sm:$0xff] }
 0x161   :  { %v657_v9 = vunpack.c.h.bf16 %v2445_v16  ;;  %v656_v23 = vunpack.c.l.bf16 %v2445_v16 }
 0x163   :  { %913 = vmatpush1.bf16.msra.mxu0 %v4548_v13  ;;  %954 = vmatpush1.bf16.msra.mxu1 %v4549_v19 }
 0x164   :  { %991 = vmatprep.subr.bf16.mxu0 %v4550_v36  ;;  %1032 = vmatprep.subr.bf16.mxu1 %v4551_v59 }
 0x1f9   :  { %v692_v18 = vpop.f32.mrb[8].mxu0  ;;  %v733_v17 = vpop.f32.mrb[8].mxu1 }
 0x1fa   :  { %v740_v28 = vadd.f32 %v692_v18, %v654_v25  ;;  %v694_v13 = vpop.f32.mrb[9].mxu0  ;;  %v735_v35 = vpop.f32.mrb[9].mxu1  ;;  %v742_v25 = vadd.f32 %v733_v17, %v656_v23  ;;  %v4552_v23 = vld [vmem:[#allocation27_spill] sm:$0xff] }
 0x1fb   :  { %v741_v19 = vadd.f32 %v694_v13, %v655_v21  ;;  %v696_v32 = vpop.f32.mrb[10].mxu0  ;;  %v737_v36 = vpop.f32.mrb[10].mxu1  ;;  %v743_v22 = vadd.f32 %v735_v35, %v657_v9 }
 0x1fc   :  { %v2448_v31 = vmul.f32 -1.442695, %v740_v28  ;;  %v697_v59 = vpop.f32.mrb[11].mxu0  ;;  %v738_v30 = vpop.f32.mrb[11].mxu1 }
 0x1fd   :  { %v2449_v12 = vmul.f32 -1.442695, %v741_v19  ;;  %v2450_v8 = vmul.f32 -1.442695, %v743_v22  ;;  %v2446_v30 = vld [vmem:[%s4400_s0 + $0x90] sm:$0xff] }
 0x1fe   :  { %2658 = vpow2.f32 %v2448_v31  ;;  %v747_v16 = vunpack.c.l.bf16 %v2446_v30  ;;  %v748_v36 = vunpack.c.h.bf16 %v2446_v30 }
 0x1ff   :  { %2660 = vpow2.f32 %v2449_v12 }
 0x200   :  { %2662 = vpow2.f32 %v2450_v8 }
 0x201   :  { %2664 = vtanh.f32 %v742_v25 }
 0x208   :  { %v2659_v18 = vpop.eup %2658 }
 0x209   :  { %v2661_v29 = vpop.eup %2660  ;;  %v840_v5 = vadd.f32 1.0, %v2659_v18 }
 0x20a   :  { %v846_v20 = vadd.f32 1.0, %v2661_v29  ;;  %v2663_v32 = vpop.eup %2662 }
 0x20b   :  { %2666 = vrcp.f32 %v840_v5  ;;  %v2665_v13 = vpop.eup %2664  ;;  %v853_v35 = vadd.f32 1.0, %v2663_v32  ;;  %v2447_v5 = vld [vmem:[%s4400_s0 + $0x98] sm:$0xff] }
 0x20c   :  { %2668 = vrcp.f32 %v846_v20 }
 0x20d   :  { %2670 = vrcp.f32 %v853_v35 }
 0x215   :  { %v2667_v31 = vpop.eup %2666 }
 0x216   :  { %v2669_v12 = vpop.eup %2668  ;;  %v857_v9 = vmul.f32 %v2667_v31, %v2665_v13  ;;  %v750_v31 = vunpack.c.h.bf16 %v2447_v5 }
 0x217   :  { %v856_v19 = vmul.f32 %v2669_v12, %v4552_v23  ;;  %v2671_v35 = vpop.eup %2670 }
 0x219   :  { %v3509_v59 = vadd.f32 %v857_v9, %v856_v19  ;;  %v785_v8 = vpop.f32.mrb[12].mxu0  ;;  %v826_v29 = vpop.f32.mrb[12].mxu1  ;;  %v749_v9 = vunpack.c.l.bf16 %v2447_v5 }
 0x21a   :  { %v833_v20 = vadd.f32 %v785_v8, %v747_v16  ;;  %v787_v21 = vpop.f32.mrb[13].mxu0  ;;  %v828_v17 = vpop.f32.mrb[13].mxu1 }
 0x21b   :  { %v834_v28 = vadd.f32 %v787_v21, %v748_v36  ;;  %v789_v22 = vpop.f32.mrb[14].mxu0  ;;  %v830_v25 = vpop.f32.mrb[14].mxu1  ;;  %2672 = vtanh.f32 %v3509_v59  ;;  %v836_v12 = vadd.f32 %v828_v17, %v750_v31  ;;  %v835_v19 = vadd.f32 %v826_v29, %v749_v9  ;;  %v3557_v17 = vld [vmem:[%s4399_s1 + $0x4] ss:$16 sps:$4 sm:$0xff]   ;;  %v4559_v9 = vld [vmem:[#allocation17_spill] sm:$0xff] }
 0x21c   :  { %v2452_v18 = vmul.f32 -1.442695, %v833_v20  ;;  %v790_v32 = vpop.f32.mrb[15].mxu0  ;;  %v831_v30 = vpop.f32.mrb[15].mxu1  ;;  %v3573_v25 = vld [vmem:[%s4399_s1 + $0x8] ss:$16 sps:$4 sm:$0xff]  }
 0x21d   :  { %v2453_v13 = vmul.f32 -1.442695, %v834_v28  ;;  %v2454_v23 = vmul.f32 -1.442695, %v836_v12  ;;  %v3567_v28 = vld [vmem:[%s4399_s1] ss:$16 sps:$4 sm:$0xff]  }
 0x21e   :  { %2674 = vpow2.f32 %v2452_v18  ;;  %v3588_v18 = vld [vmem:[%s4399_s1 + $0x20] ss:$16 sps:$4 sm:$0xff]   ;;  %v3595_v32 = vld [vmem:[%s4399_s1 + $0x44] ss:$16 sps:$4 sm:$0xff]   ;;  %v4554_v30 = vld [vmem:[#allocation7_spill] sm:$0xff] }
 0x21f   :  { %2676 = vpow2.f32 %v2453_v13  ;;  %v4556_v13 = vld [vmem:[#allocation8_spill] sm:$0xff]  ;;  %v4557_v31 = vld [vmem:[#allocation14_spill] sm:$0xff]  ;;  %v4558_v12 = vld [vmem:[#allocation11_spill] sm:$0xff] }
 0x220   :  { %2678 = vpow2.f32 %v2454_v23  ;;  %v4566_v23 = vld [vmem:[#allocation19_spill] sm:$0xff] }
 0x221   :  { %2680 = vtanh.f32 %v835_v19  ;;  %v4567_v19 = vld [vmem:[#allocation23_spill] sm:$0xff] }
 0x225   :  { %v2673_v16 = vpop.eup %2672 }
 0x226   :  { %v860_v8 = vmul.f32 %v2673_v16, %v2671_v35  ;;  %v4564_v35 = vld [vmem:[#allocation16_spill] sm:$0xff]  ;;  %v4565_v16 = vld [vmem:[#allocation22_spill] sm:$0xff] }
 0x228   :  { %v2675_v4 = vpop.eup %2674  ;;  %v861_v36 = vpack.c.bf16 %v860_v8, %v860_v8  ;;  %v4568_v8 = vld [vmem:[#allocation20_spill] sm:$0xff] }
 0x229   :  { %v2677_v21 = vpop.eup %2676  ;;  %v867_v22 = vadd.f32 1.0, %v2675_v4 }
 0x22a   :  { %v873_v20 = vadd.f32 1.0, %v2677_v21  ;;  %2451 = vst [vmem:[%s4401_s2 + $0x4] sm:$0xf] %v861_v36  ;;  %931 = vmatmul.mubr.bf16.vlgmr.msra.gmra.mrb[16].mxu0 %v861_v36  ;;  %972 = vmatmul.mubr.bf16.vlgmr.msra.gmra.mrb[16].mxu1 %v861_v36  ;;  %v4569_v36 = vld [vmem:[#allocation24_spill] sm:$0xff] }
 0x22b   :  { %2682 = vrcp.f32 %v867_v22  ;;  %992 = vmatpush1.bf16.msra.mxu0 %v3173_v33  ;;  %1033 = vmatpush1.bf16.msra.mxu1 %v3211_v40  ;;  %v2679_v33 = vpop.eup %2678  ;;  %v2456_v21 = vld [vmem:[%s4400_s0 + $0x20] sm:$0xff] }
 0x22c   :  { %2684 = vrcp.f32 %v873_v20  ;;  %993 = vmatprep.subr.bf16.mxu0 %v3179_v34  ;;  %1034 = vmatprep.subr.bf16.mxu1 %v3217_v41  ;;  %v2681_v34 = vpop.eup %2680  ;;  %v894_v22 = vunpack.c.l.bf16 %v2456_v21  ;;  %v895_v20 = vunpack.c.h.bf16 %v2456_v21 }
 0x22d   :  { %1023 = vmatprep.mubr.bf16.mxu0 %v4527_v58  ;;  %1064 = vmatprep.mubr.bf16.mxu1 %v4527_v58 }
 0x22f   :  { %994 = vmatpush1.bf16.msra.mxu0 %v3198_v38  ;;  %1035 = vmatpush1.bf16.msra.mxu1 %v3236_v44  ;;  %v880_v38 = vadd.f32 1.0, %v2679_v33 }
 0x230   :  { %995 = vmatprep.subr.bf16.mxu0 %v3203_v39  ;;  %1036 = vmatprep.subr.bf16.mxu1 %v3242_v45 }
 0x231   :  { %2686 = vrcp.f32 %v880_v38 }
 0x233   :  { %996 = vmatpush1.bf16.msra.mxu0 %v3223_v42  ;;  %1037 = vmatpush1.bf16.msra.mxu1 %v3261_v48 }
 0x234   :  { %997 = vmatprep.subr.bf16.mxu0 %v3228_v43  ;;  %1038 = vmatprep.subr.bf16.mxu1 %v3267_v49 }
 0x235   :  { %v2683_v40 = vpop.eup %2682 }
 0x236   :  { %v2685_v41 = vpop.eup %2684  ;;  %v884_v4 = vmul.f32 %v2683_v40, %v2681_v34 }
 0x237   :  { %v883_v29 = vmul.f32 %v2685_v41, %v3443_v26  ;;  %998 = vmatpush1.bf16.msra.mxu0 %v3249_v46  ;;  %1039 = vmatpush1.bf16.msra.mxu1 %v3285_v52  ;;  %v2457_v41 = vld [vmem:[%s4400_s0 + $0x28] sm:$0xff] }
 0x238   :  { %999 = vmatprep.subr.bf16.mxu0 %v3255_v47  ;;  %1040 = vmatprep.subr.bf16.mxu1 %v3291_v53 }
 0x239   :  { %v3537_v39 = vadd.f32 %v884_v4, %v883_v29 }
 0x23b   :  { %1000 = vmatpush1.bf16.msra.mxu0 %v3273_v50  ;;  %1041 = vmatpush1.bf16.msra.mxu1 %v3309_v56  ;;  %2688 = vtanh.f32 %v3537_v39  ;;  %v2687_v42 = vpop.eup %2686 }
 0x23c   :  { %1001 = vmatprep.subr.bf16.mxu0 %v3279_v51  ;;  %1042 = vmatprep.subr.bf16.mxu1 %v3315_v57 }
 0x23f   :  { %1002 = vmatpush1.bf16.msra.mxu0 %v3297_v54  ;;  %1043 = vmatpush1.bf16.msra.mxu1 %v3333_v60 }
 0x240   :  { %1003 = vmatprep.subr.bf16.mxu0 %v3303_v55  ;;  %1044 = vmatprep.subr.bf16.mxu1 %v3339_v61 }
 0x243   :  { %1004 = vmatpush1.bf16.msra.mxu0 %v4529_v27  ;;  %1045 = vmatpush1.bf16.msra.mxu1 %v3352_v63 }
 0x244   :  { %1005 = vmatprep.subr.bf16.mxu0 %v4530_v24  ;;  %1046 = vmatprep.subr.bf16.mxu1 %v3358_v1 }
 0x245   :  { %v2689_v43 = vpop.eup %2688 }
 0x246   :  { %v887_v26 = vmul.f32 %v2689_v43, %v2687_v42 }
 0x247   :  { %1006 = vmatpush1.bf16.msra.mxu0 %v3345_v62  ;;  %1047 = vmatpush1.bf16.msra.mxu1 %v3365_v37 }
 0x248   :  { %v888_v5 = vpack.c.bf16 %v887_v26, %v887_v26  ;;  %1138 = vmatprep.subr.bf16.mxu0 %v3557_v17  ;;  %1179 = vmatprep.subr.bf16.mxu1 %v3012_v6  ;;  %v3579_v6 = vld [vmem:[%s4399_s1 + $0x24] ss:$16 sps:$4 sm:$0xff]  }
 0x24a   :  { %2455 = vst [vmem:[%s4401_s2 + $0x24] sm:$0xf] %v888_v5  ;;  %1024 = vmatmul.mubr.bf16.vlgmr.msra.gmra.mrb[20].mxu0 %v888_v5  ;;  %1065 = vmatmul.mubr.bf16.vlgmr.msra.gmra.mrb[20].mxu1 %v888_v5 }
 0x24b   :  { %1139 = vmatpush1.bf16.msra.mxu0 %v3567_v28  ;;  %1180 = vmatpush1.bf16.msra.mxu1 %v3573_v25 }
 0x24c   :  { %1140 = vmatprep.subr.bf16.mxu0 %v3579_v6  ;;  %1181 = vmatprep.subr.bf16.mxu1 %v3036_v10  ;;  %v3602_v10 = vld [vmem:[%s4399_s1 + $0x40] ss:$16 sps:$4 sm:$0xff]  }
 0x24d   :  { %1170 = vmatprep.mubr.bf16.mxu0 %v4527_v58  ;;  %1211 = vmatprep.mubr.bf16.mxu1 %v4527_v58 }
 0x24f   :  { %1141 = vmatpush1.bf16.msra.mxu0 %v3588_v18  ;;  %1182 = vmatpush1.bf16.msra.mxu1 %v3041_v11  ;;  %v3609_v11 = vld [vmem:[%s4399_s1 + $0x64] ss:$16 sps:$4 sm:$0xff]  }
 0x250   :  { %1142 = vmatprep.subr.bf16.mxu0 %v3595_v32  ;;  %1183 = vmatprep.subr.bf16.mxu1 %v3058_v14  ;;  %v4553_v14 = vld [vmem:[#allocation10_spill] sm:$0xff] }
 0x253   :  { %1143 = vmatpush1.bf16.msra.mxu0 %v3602_v10  ;;  %1184 = vmatpush1.bf16.msra.mxu1 %v3065_v15  ;;  %v4555_v15 = vld [vmem:[#allocation13_spill] sm:$0xff] }
 0x254   :  { %1144 = vmatprep.subr.bf16.mxu0 %v3609_v11  ;;  %1185 = vmatprep.subr.bf16.mxu1 %v4531_v0  ;;  %v4560_v0 = vld [vmem:[#allocation12_spill] sm:$0xff] }
 0x257   :  { %1145 = vmatpush1.bf16.msra.mxu0 %v4532_v2  ;;  %1186 = vmatpush1.bf16.msra.mxu1 %v4533_v3  ;;  %v4561_v2 = vld [vmem:[#allocation18_spill] sm:$0xff]  ;;  %v4562_v3 = vld [vmem:[#allocation15_spill] sm:$0xff] }
 0x258   :  { %1146 = vmatprep.subr.bf16.mxu0 %v4534_v7  ;;  %1187 = vmatprep.subr.bf16.mxu1 %v4553_v14  ;;  %v4563_v7 = vld [vmem:[#allocation21_spill] sm:$0xff] }
 0x25b   :  { %1147 = vmatpush1.bf16.msra.mxu0 %v4554_v30  ;;  %1188 = vmatpush1.bf16.msra.mxu1 %v4555_v15  ;;  %v897_v15 = vunpack.c.h.bf16 %v2457_v41 }
 0x25c   :  { %1148 = vmatprep.subr.bf16.mxu0 %v4556_v13  ;;  %1189 = vmatprep.subr.bf16.mxu1 %v4557_v31  ;;  %v896_v31 = vunpack.c.l.bf16 %v2457_v41 }
 0x25f   :  { %1149 = vmatpush1.bf16.msra.mxu0 %v4558_v12  ;;  %1190 = vmatpush1.bf16.msra.mxu1 %v4559_v9 }
 0x260   :  { %1150 = vmatprep.subr.bf16.mxu0 %v4560_v0  ;;  %1191 = vmatprep.subr.bf16.mxu1 %v4561_v2 }
 0x263   :  { %1151 = vmatpush1.bf16.msra.mxu0 %v4562_v3  ;;  %1192 = vmatpush1.bf16.msra.mxu1 %v4563_v7 }
 0x264   :  { %1152 = vmatprep.subr.bf16.mxu0 %v4564_v35  ;;  %1193 = vmatprep.subr.bf16.mxu1 %v4565_v16  ;;  %v2458_v16 = vld [vmem:[%s4400_s0 + $0xa0] sm:$0xff] }
 0x267   :  { %1153 = vmatpush1.bf16.msra.mxu0 %v4566_v23  ;;  %1194 = vmatpush1.bf16.msra.mxu1 %v4567_v19 }
 0x268   :  { %1231 = vmatprep.subr.bf16.mxu0 %v4568_v8  ;;  %1272 = vmatprep.subr.bf16.mxu1 %v4569_v36 }
 0x2fd   :  { %v932_v33 = vpop.f32.mrb[16].mxu0  ;;  %v973_v34 = vpop.f32.mrb[16].mxu1 }
 0x2fe   :  { %v980_v40 = vadd.f32 %v932_v33, %v894_v22  ;;  %v934_v4 = vpop.f32.mrb[17].mxu0  ;;  %v975_v38 = vpop.f32.mrb[17].mxu1  ;;  %v982_v9 = vadd.f32 %v973_v34, %v896_v31  ;;  %v987_v22 = vunpack.c.l.bf16 %v2458_v16  ;;  %v988_v33 = vunpack.c.h.bf16 %v2458_v16 }
 0x2ff   :  { %v981_v29 = vadd.f32 %v934_v4, %v895_v20  ;;  %v936_v42 = vpop.f32.mrb[18].mxu0  ;;  %v977_v43 = vpop.f32.mrb[18].mxu1  ;;  %v983_v13 = vadd.f32 %v975_v38, %v897_v15  ;;  %v2459_v38 = vld [vmem:[%s4400_s0 + $0xa8] sm:$0xff] }
 0x300   :  { %v2460_v26 = vmul.f32 -1.442695, %v980_v40  ;;  %v937_v5 = vpop.f32.mrb[19].mxu0  ;;  %v978_v14 = vpop.f32.mrb[19].mxu1 }
 0x301   :  { %v2461_v30 = vmul.f32 -1.442695, %v981_v29  ;;  %v2462_v12 = vmul.f32 -1.442695, %v983_v13  ;;  %v990_v13 = vunpack.c.h.bf16 %v2459_v38 }
 0x302   :  { %2690 = vpow2.f32 %v2460_v26 }
 0x303   :  { %2692 = vpow2.f32 %v2461_v30 }
 0x304   :  { %2694 = vpow2.f32 %v2462_v12  ;;  %v989_v12 = vunpack.c.l.bf16 %v2459_v38  ;;  %v3702_v38 = vld [vmem:[%s4399_s1 + $0x164] ss:$16 sps:$4 sm:$0xff]  }
 0x305   :  { %2696 = vtanh.f32 %v982_v9 }
 0x30c   :  { %v2691_v0 = vpop.eup %2690 }
 0x30d   :  { %v2693_v2 = vpop.eup %2692  ;;  %v1080_v3 = vadd.f32 1.0, %v2691_v0 }
 0x30e   :  { %v1086_v7 = vadd.f32 1.0, %v2693_v2  ;;  %v2695_v35 = vpop.eup %2694 }
 0x30f   :  { %2698 = vrcp.f32 %v1080_v3  ;;  %v2697_v23 = vpop.eup %2696  ;;  %v1093_v21 = vadd.f32 1.0, %v2695_v35 }
 0x310   :  { %2700 = vrcp.f32 %v1086_v7 }
 0x311   :  { %2702 = vrcp.f32 %v1093_v21  ;;  %v3661_v21 = vld [vmem:[%s4399_s1 + $0x108] ss:$16 sps:$4 sm:$0xff]  }
 0x319   :  { %v2699_v19 = vpop.eup %2698 }
 0x31a   :  { %v2701_v8 = vpop.eup %2700  ;;  %v1097_v36 = vmul.f32 %v2699_v19, %v2697_v23 }
 0x31b   :  { %v1096_v20 = vmul.f32 %v2701_v8, %v3509_v59  ;;  %v2703_v9 = vpop.eup %2702 }
 0x31d   :  { %v3643_v34 = vadd.f32 %v1097_v36, %v1096_v20  ;;  %v1025_v40 = vpop.f32.mrb[20].mxu0  ;;  %v1066_v41 = vpop.f32.mrb[20].mxu1  ;;  %v3655_v36 = vld [vmem:[%s4399_s1 + $0x100] ss:$16 sps:$4 sm:$0xff]   ;;  %v3673_v20 = vld [vmem:[%s4399_s1 + $0x12c] ss:$16 sps:$4 sm:$0xff]  }
 0x31e   :  { %v1073_v4 = vadd.f32 %v1025_v40, %v987_v22  ;;  %v1027_v29 = vpop.f32.mrb[21].mxu0  ;;  %v1068_v42 = vpop.f32.mrb[21].mxu1  ;;  %v1075_v3 = vadd.f32 %v1066_v41, %v989_v12  ;;  %v3667_v22 = vld [vmem:[%s4399_s1 + $0x124] ss:$16 sps:$4 sm:$0xff]   ;;  %v3882_v12 = vld [vmem:[%s4399_s1 + $0xe8] ss:$16 sps:$4 sm:$0xff]  }
 0x31f   :  { %v1074_v43 = vadd.f32 %v1027_v29, %v988_v33  ;;  %v1029_v26 = vpop.f32.mrb[22].mxu0  ;;  %v1070_v5 = vpop.f32.mrb[22].mxu1  ;;  %2704 = vtanh.f32 %v3643_v34  ;;  %v1076_v31 = vadd.f32 %v1068_v42, %v990_v13  ;;  %v3681_v33 = vld [vmem:[%s4399_s1 + $0x120] ss:$16 sps:$4 sm:$0xff]   ;;  %v3688_v40 = vld [vmem:[%s4399_s1 + $0x144] ss:$16 sps:$4 sm:$0xff]  }
 0x320   :  { %v2464_v14 = vmul.f32 -1.442695, %v1073_v4  ;;  %v1030_v59 = vpop.f32.mrb[23].mxu0  ;;  %v1071_v30 = vpop.f32.mrb[23].mxu1  ;;  %v3695_v4 = vld [vmem:[%s4399_s1 + $0x140] ss:$16 sps:$4 sm:$0xff]  }
 0x321   :  { %v2465_v15 = vmul.f32 -1.442695, %v1074_v43  ;;  %v2466_v2 = vmul.f32 -1.442695, %v1076_v31  ;;  %v3840_v5 = vld [vmem:[%s4399_s1 + $0xc4] ss:$16 sps:$4 sm:$0xff]  }
 0x322   :  { %2706 = vpow2.f32 %v2464_v14  ;;  %4581 = vst [vmem:[#allocation14_spill] sm:$0xff] %v3840_v5  ;;  %v3846_v14 = vld [vmem:[%s4399_s1 + $0xcc] ss:$16 sps:$4 sm:$0xff]   ;;  %v3852_v59 = vld [vmem:[%s4399_s1 + $0xc0] ss:$16 sps:$4 sm:$0xff]   ;;  %4588 = vst [vmem:[#allocation16_spill] sm:$0xff] %v3882_v12 }
 0x323   :  { %2708 = vpow2.f32 %v2465_v15  ;;  %4582 = vst [vmem:[#allocation11_spill] sm:$0xff] %v3846_v14  ;;  %4583 = vst [vmem:[#allocation17_spill] sm:$0xff] %v3852_v59  ;;  %v3858_v30 = vld [vmem:[%s4399_s1 + $0xc8] ss:$16 sps:$4 sm:$0xff]   ;;  %v3864_v15 = vld [vmem:[%s4399_s1 + $0xe4] ss:$16 sps:$4 sm:$0xff]  }
 0x324   :  { %2710 = vpow2.f32 %v2466_v2  ;;  %4584 = vst [vmem:[#allocation12_spill] sm:$0xff] %v3858_v30  ;;  %4585 = vst [vmem:[#allocation18_spill] sm:$0xff] %v3864_v15  ;;  %v3870_v13 = vld [vmem:[%s4399_s1 + $0xec] ss:$16 sps:$4 sm:$0xff]   ;;  %v3876_v31 = vld [vmem:[%s4399_s1 + $0xe0] ss:$16 sps:$4 sm:$0xff]  }
 0x325   :  { %2712 = vtanh.f32 %v1075_v3  ;;  %4586 = vst [vmem:[#allocation15_spill] sm:$0xff] %v3870_v13  ;;  %4587 = vst [vmem:[#allocation21_spill] sm:$0xff] %v3876_v31  ;;  %v2468_v2 = vld [vmem:[%s4400_s0 + $0x30] sm:$0xff] }
 0x326   :  { %v1134_v3 = vunpack.c.l.bf16 %v2468_v2 }
 0x329   :  { %v2705_v0 = vpop.eup %2704 }
 0x32a   :  { %v1100_v7 = vmul.f32 %v2705_v0, %v2703_v9  ;;  %v3888_v9 = vld [vmem:[%s4399_s1 + $0x104] ss:$16 sps:$4 sm:$0xff]   ;;  %v3894_v0 = vld [vmem:[%s4399_s1 + $0x10c] ss:$16 sps:$4 sm:$0xff]  }
 0x32b   :  { %4589 = vst [vmem:[#allocation22_spill] sm:$0xff] %v3888_v9  ;;  %4590 = vst [vmem:[#allocation19_spill] sm:$0xff] %v3894_v0 }
 0x32c   :  { %v2707_v35 = vpop.eup %2706  ;;  %v1101_v16 = vpack.c.bf16 %v1100_v7, %v1100_v7  ;;  %v1135_v7 = vunpack.c.h.bf16 %v2468_v2 }
 0x32d   :  { %v2709_v23 = vpop.eup %2708  ;;  %v1107_v19 = vadd.f32 1.0, %v2707_v35 }
 0x32e   :  { %v1113_v8 = vadd.f32 1.0, %v2709_v23  ;;  %2463 = vst [vmem:[%s4401_s2 + $0x8] sm:$0xf] %v1101_v16  ;;  %1171 = vmatmul.mubr.bf16.vlgmr.msra.gmra.mrb[24].mxu0 %v1101_v16  ;;  %1212 = vmatmul.mubr.bf16.vlgmr.msra.gmra.mrb[24].mxu1 %v1101_v16  ;;  %v2711_v41 = vpop.eup %2710 }
 0x32f   :  { %2714 = vrcp.f32 %v1107_v19  ;;  %1232 = vmatpush1.bf16.msra.mxu0 %v3655_v36  ;;  %1273 = vmatpush1.bf16.msra.mxu1 %v3661_v21  ;;  %v1120_v43 = vadd.f32 1.0, %v2711_v41  ;;  %v2469_v19 = vld [vmem:[%s4400_s0 + $0x38] sm:$0xff] }
 0x330   :  { %2716 = vrcp.f32 %v1113_v8  ;;  %1233 = vmatprep.subr.bf16.mxu0 %v3667_v22  ;;  %1274 = vmatprep.subr.bf16.mxu1 %v3673_v20 }
 0x331   :  { %1263 = vmatprep.mubr.bf16.mxu0 %v4527_v58  ;;  %1304 = vmatprep.mubr.bf16.mxu1 %v4527_v58  ;;  %2718 = vrcp.f32 %v1120_v43 }
 0x333   :  { %1234 = vmatpush1.bf16.msra.mxu0 %v3681_v33  ;;  %1275 = vmatpush1.bf16.msra.mxu1 %v3236_v44  ;;  %v2713_v44 = vpop.eup %2712 }
 0x334   :  { %1235 = vmatprep.subr.bf16.mxu0 %v3688_v40  ;;  %1276 = vmatprep.subr.bf16.mxu1 %v3242_v45 }
 0x337   :  { %1236 = vmatpush1.bf16.msra.mxu0 %v3695_v4  ;;  %1277 = vmatpush1.bf16.msra.mxu1 %v3261_v48 }
 0x338   :  { %1237 = vmatprep.subr.bf16.mxu0 %v3702_v38  ;;  %1278 = vmatprep.subr.bf16.mxu1 %v3267_v49 }
 0x339   :  { %v2715_v45 = vpop.eup %2714 }
 0x33a   :  { %v2717_v29 = vpop.eup %2716  ;;  %v1124_v42 = vmul.f32 %v2715_v45, %v2713_v44 }
 0x33b   :  { %v1123_v26 = vmul.f32 %v2717_v29, %v3537_v39  ;;  %1238 = vmatpush1.bf16.msra.mxu0 %v3249_v46  ;;  %1279 = vmatpush1.bf16.msra.mxu1 %v3285_v52  ;;  %v2719_v46 = vpop.eup %2718  ;;  %v3760_v52 = vld [vmem:[%s4399_s1 + $0x4c] ss:$16 sps:$4 sm:$0xff]   ;;  %v3834_v39 = vld [vmem:[%s4399_s1 + $0xa8] ss:$16 sps:$4 sm:$0xff]  }
 0x33c   :  { %1239 = vmatprep.subr.bf16.mxu0 %v3255_v47  ;;  %1280 = vmatprep.subr.bf16.mxu1 %v3291_v53  ;;  %v3767_v53 = vld [vmem:[%s4399_s1 + $0x48] ss:$16 sps:$4 sm:$0xff]   ;;  %4580 = vst [vmem:[#allocation8_spill] sm:$0xff] %v3834_v39 }
 0x33d   :  { %v3711_v48 = vadd.f32 %v1124_v42, %v1123_v26 }
 0x33f   :  { %1240 = vmatpush1.bf16.msra.mxu0 %v3273_v50  ;;  %1281 = vmatpush1.bf16.msra.mxu1 %v3309_v56  ;;  %2720 = vtanh.f32 %v3711_v48  ;;  %v3786_v56 = vld [vmem:[%s4399_s1 + $0x68] ss:$16 sps:$4 sm:$0xff]  }
 0x340   :  { %1241 = vmatprep.subr.bf16.mxu0 %v3279_v51  ;;  %1282 = vmatprep.subr.bf16.mxu1 %v3315_v57  ;;  %v3732_v51 = vld [vmem:[%s4399_s1 + $0xc] ss:$16 sps:$4 sm:$0xff]   ;;  %4572 = vst [vmem:[#allocation6_spill] sm:$0xff] %v3786_v56  ;;  %v3792_v57 = vld [vmem:[%s4399_s1 + $0x84] ss:$16 sps:$4 sm:$0xff]  }
 0x341   :  { %4573 = vst [vmem:[#allocation4_spill] sm:$0xff] %v3792_v57 }
 0x343   :  { %1242 = vmatpush1.bf16.msra.mxu0 %v3297_v54  ;;  %1283 = vmatpush1.bf16.msra.mxu1 %v3333_v60  ;;  %v3774_v54 = vld [vmem:[%s4399_s1 + $0x6c] ss:$16 sps:$4 sm:$0xff]  }
 0x344   :  { %1243 = vmatprep.subr.bf16.mxu0 %v3303_v55  ;;  %1284 = vmatprep.subr.bf16.mxu1 %v3339_v61  ;;  %4570 = vst [vmem:[#allocation25_spill] sm:$0xff] %v3774_v54  ;;  %v3780_v55 = vld [vmem:[%s4399_s1 + $0x60] ss:$16 sps:$4 sm:$0xff]   ;;  %v3798_v60 = vld [vmem:[%s4399_s1 + $0x8c] ss:$16 sps:$4 sm:$0xff]  }
 0x345   :  { %4571 = vst [vmem:[#allocation26_spill] sm:$0xff] %v3780_v55  ;;  %4574 = vst [vmem:[#allocation9_spill] sm:$0xff] %v3798_v60  ;;  %v3804_v61 = vld [vmem:[%s4399_s1 + $0x80] ss:$16 sps:$4 sm:$0xff]  }
 0x346   :  { %4575 = vst [vmem:[#allocation5_spill] sm:$0xff] %v3804_v61 }
 0x347   :  { %1244 = vmatpush1.bf16.msra.mxu0 %v4529_v27  ;;  %1285 = vmatpush1.bf16.msra.mxu1 %v3352_v63  ;;  %v3816_v63 = vld [vmem:[%s4399_s1 + $0xa4] ss:$16 sps:$4 sm:$0xff]   ;;  %v3822_v27 = vld [vmem:[%s4399_s1 + $0xac] ss:$16 sps:$4 sm:$0xff]  }
 0x348   :  { %1245 = vmatprep.subr.bf16.mxu0 %v4530_v24  ;;  %1286 = vmatprep.subr.bf16.mxu1 %v3358_v1  ;;  %v3744_v1 = vld [vmem:[%s4399_s1 + $0x2c] ss:$16 sps:$4 sm:$0xff]   ;;  %4577 = vst [vmem:[#allocation10_spill] sm:$0xff] %v3816_v63  ;;  %4578 = vst [vmem:[#allocation7_spill] sm:$0xff] %v3822_v27  ;;  %v3828_v24 = vld [vmem:[%s4399_s1 + $0xa0] ss:$16 sps:$4 sm:$0xff]  }
 0x349   :  { %v2721_v47 = vpop.eup %2720  ;;  %4579 = vst [vmem:[#allocation13_spill] sm:$0xff] %v3828_v24 }
 0x34a   :  { %v1127_v49 = vmul.f32 %v2721_v47, %v2719_v46  ;;  %v1137_v47 = vunpack.c.h.bf16 %v2469_v19 }
 0x34b   :  { %1246 = vmatpush1.bf16.msra.mxu0 %v3345_v62  ;;  %1287 = vmatpush1.bf16.msra.mxu1 %v3365_v37  ;;  %v3753_v37 = vld [vmem:[%s4399_s1 + $0x28] ss:$16 sps:$4 sm:$0xff]  }
 0x34c   :  { %v1128_v50 = vpack.c.bf16 %v1127_v49, %v1127_v49  ;;  %1378 = vmatprep.subr.bf16.mxu0 %v3557_v17  ;;  %1419 = vmatprep.subr.bf16.mxu1 %v3732_v51  ;;  %v3810_v62 = vld [vmem:[%s4399_s1 + $0x88] ss:$16 sps:$4 sm:$0xff]  }
 0x34d   :  { %4576 = vst [vmem:[#allocation27_spill] sm:$0xff] %v3810_v62 }
 0x34e   :  { %2467 = vst [vmem:[%s4401_s2 + $0x28] sm:$0xf] %v1128_v50  ;;  %1264 = vmatmul.mubr.bf16.vlgmr.msra.gmra.mrb[28].mxu0 %v1128_v50  ;;  %1305 = vmatmul.mubr.bf16.vlgmr.msra.gmra.mrb[28].mxu1 %v1128_v50  ;;  %v1136_v50 = vunpack.c.l.bf16 %v2469_v19 }
 0x34f   :  { %1379 = vmatpush1.bf16.msra.mxu0 %v3567_v28  ;;  %1420 = vmatpush1.bf16.msra.mxu1 %v3573_v25 }
 0x350   :  { %1380 = vmatprep.subr.bf16.mxu0 %v3579_v6  ;;  %1421 = vmatprep.subr.bf16.mxu1 %v3744_v1 }
 0x351   :  { %1410 = vmatprep.mubr.bf16.mxu0 %v4527_v58  ;;  %1451 = vmatprep.mubr.bf16.mxu1 %v4527_v58 }
 0x353   :  { %1381 = vmatpush1.bf16.msra.mxu0 %v3588_v18  ;;  %1422 = vmatpush1.bf16.msra.mxu1 %v3753_v37 }
 0x354   :  { %1382 = vmatprep.subr.bf16.mxu0 %v3595_v32  ;;  %1423 = vmatprep.subr.bf16.mxu1 %v3760_v52 }
 0x357   :  { %1383 = vmatpush1.bf16.msra.mxu0 %v3602_v10  ;;  %1424 = vmatpush1.bf16.msra.mxu1 %v3767_v53 }
 0x358   :  { %1384 = vmatprep.subr.bf16.mxu0 %v3609_v11  ;;  %1425 = vmatprep.subr.bf16.mxu1 %v3774_v54 }
 0x35b   :  { %1385 = vmatpush1.bf16.msra.mxu0 %v3780_v55  ;;  %1426 = vmatpush1.bf16.msra.mxu1 %v3786_v56 }
 0x35c   :  { %1386 = vmatprep.subr.bf16.mxu0 %v3792_v57  ;;  %1427 = vmatprep.subr.bf16.mxu1 %v3798_v60 }
 0x35f   :  { %1387 = vmatpush1.bf16.msra.mxu0 %v3804_v61  ;;  %1428 = vmatpush1.bf16.msra.mxu1 %v3810_v62 }
 0x360   :  { %1388 = vmatprep.subr.bf16.mxu0 %v3816_v63  ;;  %1429 = vmatprep.subr.bf16.mxu1 %v3822_v27 }
 0x363   :  { %1389 = vmatpush1.bf16.msra.mxu0 %v3828_v24  ;;  %1430 = vmatpush1.bf16.msra.mxu1 %v3834_v39 }
 0x364   :  { %1390 = vmatprep.subr.bf16.mxu0 %v3840_v5  ;;  %1431 = vmatprep.subr.bf16.mxu1 %v3846_v14 }
 0x367   :  { %1391 = vmatpush1.bf16.msra.mxu0 %v3852_v59  ;;  %1432 = vmatpush1.bf16.msra.mxu1 %v3858_v30 }
 0x368   :  { %1392 = vmatprep.subr.bf16.mxu0 %v3864_v15  ;;  %1433 = vmatprep.subr.bf16.mxu1 %v3870_v13 }
 0x36b   :  { %1393 = vmatpush1.bf16.msra.mxu0 %v3876_v31  ;;  %1434 = vmatpush1.bf16.msra.mxu1 %v3882_v12 }
 0x36c   :  { %1471 = vmatprep.subr.bf16.mxu0 %v3888_v9  ;;  %1512 = vmatprep.subr.bf16.mxu1 %v3894_v0 }
 0x401   :  { %v1172_v35 = vpop.f32.mrb[24].mxu0  ;;  %v1213_v16 = vpop.f32.mrb[24].mxu1 }
 0x402   :  { %v1220_v23 = vadd.f32 %v1172_v35, %v1134_v3  ;;  %v1174_v8 = vpop.f32.mrb[25].mxu0  ;;  %v1215_v41 = vpop.f32.mrb[25].mxu1  ;;  %v1222_v3 = vadd.f32 %v1213_v16, %v1136_v50 }
 0x403   :  { %v1221_v44 = vadd.f32 %v1174_v8, %v1135_v7  ;;  %v1176_v45 = vpop.f32.mrb[26].mxu0  ;;  %v1217_v29 = vpop.f32.mrb[26].mxu1  ;;  %v1223_v49 = vadd.f32 %v1215_v41, %v1137_v47 }
 0x404   :  { %v2472_v42 = vmul.f32 -1.442695, %v1220_v23  ;;  %v1177_v43 = vpop.f32.mrb[27].mxu0  ;;  %v1218_v26 = vpop.f32.mrb[27].mxu1  ;;  %v2470_v23 = vld [vmem:[%s4400_s0 + $0xb0] sm:$0xff] }
 0x405   :  { %v2473_v46 = vmul.f32 -1.442695, %v1221_v44  ;;  %v2474_v2 = vmul.f32 -1.442695, %v1223_v49  ;;  %v1227_v29 = vunpack.c.l.bf16 %v2470_v23 }
 0x406   :  { %2722 = vpow2.f32 %v2472_v42  ;;  %v1228_v42 = vunpack.c.h.bf16 %v2470_v23 }
 0x407   :  { %2724 = vpow2.f32 %v2473_v46 }
 0x408   :  { %2726 = vpow2.f32 %v2474_v2 }
 0x409   :  { %2728 = vtanh.f32 %v1222_v3 }
 0x410   :  { %v2723_v35 = vpop.eup %2722 }
 0x411   :  { %v2725_v0 = vpop.eup %2724  ;;  %v1320_v9 = vadd.f32 1.0, %v2723_v35 }
 0x412   :  { %v1326_v12 = vadd.f32 1.0, %v2725_v0  ;;  %v2727_v7 = vpop.eup %2726 }
 0x413   :  { %2730 = vrcp.f32 %v1320_v9  ;;  %v2729_v8 = vpop.eup %2728  ;;  %v1333_v19 = vadd.f32 1.0, %v2727_v7  ;;  %v2471_v9 = vld [vmem:[%s4400_s0 + $0xb8] sm:$0xff] }
 0x414   :  { %2732 = vrcp.f32 %v1326_v12  ;;  %v1230_v23 = vunpack.c.h.bf16 %v2471_v9 }
 0x415   :  { %2734 = vrcp.f32 %v1333_v19 }
 0x41d   :  { %v2731_v44 = vpop.eup %2730 }
 0x41e   :  { %v2733_v45 = vpop.eup %2732  ;;  %v1337_v41 = vmul.f32 %v2731_v44, %v2729_v8  ;;  %v1229_v44 = vunpack.c.l.bf16 %v2471_v9  ;;  %v3933_v9 = vld [vmem:[%s4399_s1 + $0x14c] ss:$16 sps:$4 sm:$0xff]  }
 0x41f   :  { %v1336_v16 = vmul.f32 %v2733_v45, %v3643_v34  ;;  %v2735_v45 = vpop.eup %2734 }
 0x421   :  { %v3907_v43 = vadd.f32 %v1337_v41, %v1336_v16  ;;  %v1265_v26 = vpop.f32.mrb[28].mxu0  ;;  %v1306_v0 = vpop.f32.mrb[28].mxu1 }
 0x422   :  { %v1313_v12 = vadd.f32 %v1265_v26, %v1227_v29  ;;  %v1267_v46 = vpop.f32.mrb[29].mxu0  ;;  %v1308_v47 = vpop.f32.mrb[29].mxu1  ;;  %v1315_v29 = vadd.f32 %v1306_v0, %v1229_v44  ;;  %v3926_v0 = vld [vmem:[%s4399_s1 + $0x128] ss:$16 sps:$4 sm:$0xff]   ;;  %v3954_v44 = vld [vmem:[%s4399_s1 + $0x160] ss:$16 sps:$4 sm:$0xff]  }
 0x423   :  { %v1314_v49 = vadd.f32 %v1267_v46, %v1228_v42  ;;  %v1269_v50 = vpop.f32.mrb[30].mxu0  ;;  %v1310_v2 = vpop.f32.mrb[30].mxu1  ;;  %2736 = vtanh.f32 %v3907_v43  ;;  %v1316_v8 = vadd.f32 %v1308_v47, %v1230_v23 }
 0x424   :  { %v2476_v3 = vmul.f32 -1.442695, %v1313_v12  ;;  %v1270_v34 = vpop.f32.mrb[31].mxu0  ;;  %v1311_v35 = vpop.f32.mrb[31].mxu1 }
 0x425   :  { %v2477_v7 = vmul.f32 -1.442695, %v1314_v49  ;;  %v2478_v19 = vmul.f32 -1.442695, %v1316_v8  ;;  %v3940_v49 = vld [vmem:[%s4399_s1 + $0x148] ss:$16 sps:$4 sm:$0xff]  }
 0x426   :  { %2738 = vpow2.f32 %v2476_v3  ;;  %v3947_v3 = vld [vmem:[%s4399_s1 + $0x16c] ss:$16 sps:$4 sm:$0xff]  }
 0x427   :  { %2740 = vpow2.f32 %v2477_v7 }
 0x428   :  { %2742 = vpow2.f32 %v2478_v19 }
 0x429   :  { %2744 = vtanh.f32 %v1315_v29  ;;  %v3980_v29 = vld [vmem:[%s4399_s1 + $0x180] ss:$16 sps:$4 sm:$0xff]  }
 0x42d   :  { %v2737_v41 = vpop.eup %2736 }
 0x42e   :  { %v1340_v16 = vmul.f32 %v2737_v41, %v2735_v45  ;;  %v3960_v45 = vld [vmem:[%s4399_s1 + $0x168] ss:$16 sps:$4 sm:$0xff]   ;;  %v3966_v41 = vld [vmem:[%s4399_s1 + $0x184] ss:$16 sps:$4 sm:$0xff]  }
 0x430   :  { %v2739_v26 = vpop.eup %2738  ;;  %v1341_v42 = vpack.c.bf16 %v1340_v16, %v1340_v16  ;;  %v3986_v16 = vld [vmem:[%s4399_s1 + $0x188] ss:$16 sps:$4 sm:$0xff]  }
 0x431   :  { %v2741_v46 = vpop.eup %2740  ;;  %v1347_v50 = vadd.f32 1.0, %v2739_v26  ;;  %v3993_v26 = vld [vmem:[%s4399_s1 + $0x1a4] ss:$16 sps:$4 sm:$0xff]  }
 0x432   :  { %v1353_v12 = vadd.f32 1.0, %v2741_v46  ;;  %2475 = vst [vmem:[%s4401_s2 + $0xc] sm:$0xf] %v1341_v42  ;;  %1411 = vmatmul.mubr.bf16.vlgmr.msra.gmra.mrb[32].mxu0 %v1341_v42  ;;  %1452 = vmatmul.mubr.bf16.vlgmr.msra.gmra.mrb[32].mxu1 %v1341_v42  ;;  %v2743_v47 = vpop.eup %2742  ;;  %v3999_v42 = vld [vmem:[%s4399_s1 + $0x1ac] ss:$16 sps:$4 sm:$0xff]  }
 0x433   :  { %2746 = vrcp.f32 %v1347_v50  ;;  %1472 = vmatpush1.bf16.msra.mxu0 %v3655_v36  ;;  %1513 = vmatpush1.bf16.msra.mxu1 %v3661_v21  ;;  %v2745_v2 = vpop.eup %2744  ;;  %v1360_v23 = vadd.f32 1.0, %v2743_v47  ;;  %v4005_v46 = vld [vmem:[%s4399_s1 + $0x1a0] ss:$16 sps:$4 sm:$0xff]   ;;  %v4011_v50 = vld [vmem:[%s4399_s1 + $0x1a8] ss:$16 sps:$4 sm:$0xff]  }
 0x434   :  { %2748 = vrcp.f32 %v1353_v12  ;;  %1473 = vmatprep.subr.bf16.mxu0 %v3667_v22  ;;  %1514 = vmatprep.subr.bf16.mxu1 %v3673_v20  ;;  %v4017_v12 = vld [vmem:[%s4399_s1 + $0x1c4] ss:$16 sps:$4 sm:$0xff]   ;;  %v4023_v47 = vld [vmem:[%s4399_s1 + $0x1cc] ss:$16 sps:$4 sm:$0xff]  }
 0x435   :  { %1503 = vmatprep.mubr.bf16.mxu0 %v4527_v58  ;;  %1544 = vmatprep.mubr.bf16.mxu1 %v4527_v58  ;;  %2750 = vrcp.f32 %v1360_v23  ;;  %4591 = vst [vmem:[#allocation23_spill] sm:$0xff] %v4023_v47  ;;  %v4047_v23 = vld [vmem:[%s4399_s1 + $0x1ec] ss:$16 sps:$4 sm:$0xff]  }
 0x437   :  { %1474 = vmatpush1.bf16.msra.mxu0 %v3681_v33  ;;  %1515 = vmatpush1.bf16.msra.mxu1 %v3926_v0 }
 0x438   :  { %1475 = vmatprep.subr.bf16.mxu0 %v3688_v40  ;;  %1516 = vmatprep.subr.bf16.mxu1 %v3933_v9 }
 0x43b   :  { %1476 = vmatpush1.bf16.msra.mxu0 %v3695_v4  ;;  %1517 = vmatpush1.bf16.msra.mxu1 %v3940_v49 }
 0x43c   :  { %1477 = vmatprep.subr.bf16.mxu0 %v3702_v38  ;;  %1518 = vmatprep.subr.bf16.mxu1 %v3947_v3 }
 0x43d   :  { %v2747_v34 = vpop.eup %2746 }
 0x43e   :  { %v2749_v35 = vpop.eup %2748  ;;  %v1364_v7 = vmul.f32 %v2747_v34, %v2745_v2  ;;  %v4029_v2 = vld [vmem:[%s4399_s1 + $0x1c0] ss:$16 sps:$4 sm:$0xff]   ;;  %v4035_v34 = vld [vmem:[%s4399_s1 + $0x1c8] ss:$16 sps:$4 sm:$0xff]  }
 0x43f   :  { %v1363_v8 = vmul.f32 %v2749_v35, %v3711_v48  ;;  %1478 = vmatpush1.bf16.msra.mxu0 %v3954_v44  ;;  %1519 = vmatpush1.bf16.msra.mxu1 %v3960_v45  ;;  %v3972_v48 = vld [vmem:[%s4399_s1 + $0x18c] ss:$16 sps:$4 sm:$0xff]   ;;  %4592 = vst [vmem:[#allocation20_spill] sm:$0xff] %v4029_v2  ;;  %4593 = vst [vmem:[#allocation24_spill] sm:$0xff] %v4035_v34  ;;  %v2751_v35 = vpop.eup %2750 }
 0x440   :  { %1479 = vmatprep.subr.bf16.mxu0 %v3966_v41  ;;  %1520 = vmatprep.subr.bf16.mxu1 %v3972_v48 }
 0x441   :  { %v3975_v19 = vadd.f32 %v1364_v7, %v1363_v8  ;;  %v4041_v7 = vld [vmem:[%s4399_s1 + $0x1e4] ss:$16 sps:$4 sm:$0xff]  }
 0x442   :  { %4594 = vst [vmem:[#allocation28_spill] sm:$0xff] %v4041_v7 }
 0x443   :  { %1480 = vmatpush1.bf16.msra.mxu0 %v3980_v29  ;;  %1521 = vmatpush1.bf16.msra.mxu1 %v3986_v16  ;;  %2752 = vtanh.f32 %v3975_v19 }
 0x444   :  { %1481 = vmatprep.subr.bf16.mxu0 %v3993_v26  ;;  %1522 = vmatprep.subr.bf16.mxu1 %v3999_v42 }
 0x447   :  { %1482 = vmatpush1.bf16.msra.mxu0 %v4005_v46  ;;  %1523 = vmatpush1.bf16.msra.mxu1 %v4011_v50 }
 0x448   :  { %1483 = vmatprep.subr.bf16.mxu0 %v4017_v12  ;;  %1524 = vmatprep.subr.bf16.mxu1 %v4023_v47 }
 0x44b   :  { %1484 = vmatpush1.bf16.msra.mxu0 %v4029_v2  ;;  %1525 = vmatpush1.bf16.msra.mxu1 %v4035_v34  ;;  %v4053_v34 = vld [vmem:[%s4399_s1 + $0x1e0] ss:$16 sps:$4 sm:$0xff]  }
 0x44c   :  { %1485 = vmatprep.subr.bf16.mxu0 %v4041_v7  ;;  %1526 = vmatprep.subr.bf16.mxu1 %v4047_v23  ;;  %v4059_v7 = vld [vmem:[%s4399_s1 + $0x1e8] ss:$16 sps:$4 sm:$0xff]  }
 0x44d   :  { %v2753_v8 = vpop.eup %2752 }
 0x44e   :  { %v1367_v2 = vmul.f32 %v2753_v8, %v2751_v35  ;;  %v4597_v35 = vld [vmem:[#allocation19_spill] sm:$0xff]  ;;  %v2480_v8 = vld [vmem:[%s4400_s0 + $0x40] sm:$0xff] }
 0x44f   :  { %1486 = vmatpush1.bf16.msra.mxu0 %v4053_v34  ;;  %1527 = vmatpush1.bf16.msra.mxu1 %v4059_v7 }
 0x450   :  { %v1368_v47 = vpack.c.bf16 %v1367_v2, %v1367_v2  ;;  %1618 = vmatprep.subr.bf16.mxu0 %v3557_v17  ;;  %1659 = vmatprep.subr.bf16.mxu1 %v3732_v51  ;;  %v4596_v2 = vld [vmem:[#allocation22_spill] sm:$0xff] }
 0x452   :  { %2479 = vst [vmem:[%s4401_s2 + $0x2c] sm:$0xf] %v1368_v47  ;;  %1504 = vmatmul.mubr.bf16.vlgmr.msra.gmra.mrb[36].mxu0 %v1368_v47  ;;  %1545 = vmatmul.mubr.bf16.vlgmr.msra.gmra.mrb[36].mxu1 %v1368_v47  ;;  %v4595_v47 = vld [vmem:[#allocation16_spill] sm:$0xff] }
 0x453   :  { %1619 = vmatpush1.bf16.msra.mxu0 %v3567_v28  ;;  %1660 = vmatpush1.bf16.msra.mxu1 %v3573_v25 }
 0x454   :  { %1620 = vmatprep.subr.bf16.mxu0 %v3579_v6  ;;  %1661 = vmatprep.subr.bf16.mxu1 %v3744_v1 }
 0x455   :  { %1650 = vmatprep.mubr.bf16.mxu0 %v4527_v58  ;;  %1691 = vmatprep.mubr.bf16.mxu1 %v4527_v58 }
 0x457   :  { %1621 = vmatpush1.bf16.msra.mxu0 %v3588_v18  ;;  %1662 = vmatpush1.bf16.msra.mxu1 %v3753_v37 }
 0x458   :  { %1622 = vmatprep.subr.bf16.mxu0 %v3595_v32  ;;  %1663 = vmatprep.subr.bf16.mxu1 %v3760_v52 }
 0x45b   :  { %1623 = vmatpush1.bf16.msra.mxu0 %v3602_v10  ;;  %1664 = vmatpush1.bf16.msra.mxu1 %v3767_v53 }
 0x45c   :  { %1624 = vmatprep.subr.bf16.mxu0 %v3609_v11  ;;  %1665 = vmatprep.subr.bf16.mxu1 %v3774_v54 }
 0x45f   :  { %1625 = vmatpush1.bf16.msra.mxu0 %v3780_v55  ;;  %1666 = vmatpush1.bf16.msra.mxu1 %v3786_v56 }
 0x460   :  { %1626 = vmatprep.subr.bf16.mxu0 %v3792_v57  ;;  %1667 = vmatprep.subr.bf16.mxu1 %v3798_v60 }
 0x463   :  { %1627 = vmatpush1.bf16.msra.mxu0 %v3804_v61  ;;  %1668 = vmatpush1.bf16.msra.mxu1 %v3810_v62 }
 0x464   :  { %1628 = vmatprep.subr.bf16.mxu0 %v3816_v63  ;;  %1669 = vmatprep.subr.bf16.mxu1 %v3822_v27 }
 0x467   :  { %1629 = vmatpush1.bf16.msra.mxu0 %v3828_v24  ;;  %1670 = vmatpush1.bf16.msra.mxu1 %v3834_v39 }
 0x468   :  { %1630 = vmatprep.subr.bf16.mxu0 %v3840_v5  ;;  %1671 = vmatprep.subr.bf16.mxu1 %v3846_v14  ;;  %v1374_v14 = vunpack.c.l.bf16 %v2480_v8 }
 0x46b   :  { %1631 = vmatpush1.bf16.msra.mxu0 %v3852_v59  ;;  %1672 = vmatpush1.bf16.msra.mxu1 %v3858_v30  ;;  %v1375_v59 = vunpack.c.h.bf16 %v2480_v8 }
 0x46c   :  { %1632 = vmatprep.subr.bf16.mxu0 %v3864_v15  ;;  %1673 = vmatprep.subr.bf16.mxu1 %v3870_v13  ;;  %v2481_v13 = vld [vmem:[%s4400_s0 + $0x48] sm:$0xff] }
 0x46d   :  { %v1377_v61 = vunpack.c.h.bf16 %v2481_v13  ;;  %v1376_v60 = vunpack.c.l.bf16 %v2481_v13 }
 0x46f   :  { %1633 = vmatpush1.bf16.msra.mxu0 %v3876_v31  ;;  %1674 = vmatpush1.bf16.msra.mxu1 %v4595_v47 }
 0x470   :  { %1711 = vmatprep.subr.bf16.mxu0 %v4596_v2  ;;  %1752 = vmatprep.subr.bf16.mxu1 %v4597_v35 }
 0x505   :  { %v1412_v5 = vpop.f32.mrb[32].mxu0  ;;  %v1453_v30 = vpop.f32.mrb[32].mxu1 }
 0x506   :  { %v1460_v39 = vadd.f32 %v1412_v5, %v1374_v14  ;;  %v1414_v31 = vpop.f32.mrb[33].mxu0  ;;  %v1455_v15 = vpop.f32.mrb[33].mxu1  ;;  %v1462_v5 = vadd.f32 %v1453_v30, %v1376_v60 }
 0x507   :  { %v1461_v47 = vadd.f32 %v1414_v31, %v1375_v59  ;;  %v1416_v24 = vpop.f32.mrb[34].mxu0  ;;  %v1457_v2 = vpop.f32.mrb[34].mxu1  ;;  %v1463_v8 = vadd.f32 %v1455_v15, %v1377_v61 }
 0x508   :  { %v2484_v27 = vmul.f32 -1.442695, %v1460_v39  ;;  %v1417_v35 = vpop.f32.mrb[35].mxu0  ;;  %v1458_v63 = vpop.f32.mrb[35].mxu1 }
 0x509   :  { %v2485_v62 = vmul.f32 -1.442695, %v1461_v47  ;;  %v2486_v57 = vmul.f32 -1.442695, %v1463_v8  ;;  %v2482_v63 = vld [vmem:[%s4400_s0 + $0xc0] sm:$0xff] }
 0x50a   :  { %2754 = vpow2.f32 %v2484_v27  ;;  %v1467_v15 = vunpack.c.l.bf16 %v2482_v63  ;;  %v1468_v30 = vunpack.c.h.bf16 %v2482_v63 }
 0x50b   :  { %2756 = vpow2.f32 %v2485_v62 }
 0x50c   :  { %2758 = vpow2.f32 %v2486_v57 }
 0x50d   :  { %2760 = vtanh.f32 %v1462_v5 }
 0x514   :  { %v2755_v14 = vpop.eup %2754 }
 0x515   :  { %v2757_v56 = vpop.eup %2756  ;;  %v1560_v55 = vadd.f32 1.0, %v2755_v14 }
 0x516   :  { %v1566_v54 = vadd.f32 1.0, %v2757_v56  ;;  %v2759_v24 = vpop.eup %2758 }
 0x517   :  { %2762 = vrcp.f32 %v1560_v55  ;;  %v2761_v39 = vpop.eup %2760  ;;  %v1573_v59 = vadd.f32 1.0, %v2759_v24  ;;  %v2483_v55 = vld [vmem:[%s4400_s0 + $0xc8] sm:$0xff] }
 0x518   :  { %2764 = vrcp.f32 %v1566_v54  ;;  %v1470_v63 = vunpack.c.h.bf16 %v2483_v55 }
 0x519   :  { %2766 = vrcp.f32 %v1573_v59 }
 0x521   :  { %v2763_v27 = vpop.eup %2762 }
 0x522   :  { %v2765_v62 = vpop.eup %2764  ;;  %v1577_v61 = vmul.f32 %v2763_v27, %v2761_v39  ;;  %v1469_v27 = vunpack.c.l.bf16 %v2483_v55 }
 0x523   :  { %v1576_v60 = vmul.f32 %v2765_v62, %v3907_v43  ;;  %v2767_v62 = vpop.eup %2766 }
 0x525   :  { %v4111_v13 = vadd.f32 %v1577_v61, %v1576_v60  ;;  %v1505_v57 = vpop.f32.mrb[36].mxu0  ;;  %v1546_v56 = vpop.f32.mrb[36].mxu1 }
 0x526   :  { %v1553_v54 = vadd.f32 %v1505_v57, %v1467_v15  ;;  %v1507_v31 = vpop.f32.mrb[37].mxu0  ;;  %v1548_v47 = vpop.f32.mrb[37].mxu1  ;;  %v1555_v15 = vadd.f32 %v1546_v56, %v1469_v27  ;;  %v4601_v27 = vld [vmem:[#allocation28_spill] sm:$0xff] }
 0x527   :  { %v1554_v2 = vadd.f32 %v1507_v31, %v1468_v30  ;;  %v1509_v35 = vpop.f32.mrb[38].mxu0  ;;  %v1550_v8 = vpop.f32.mrb[38].mxu1  ;;  %2768 = vtanh.f32 %v4111_v13  ;;  %v1556_v39 = vadd.f32 %v1548_v47, %v1470_v63  ;;  %v4600_v63 = vld [vmem:[#allocation24_spill] sm:$0xff] }
 0x528   :  { %v2488_v5 = vmul.f32 -1.442695, %v1553_v54  ;;  %v1510_v43 = vpop.f32.mrb[39].mxu0  ;;  %v1551_v14 = vpop.f32.mrb[39].mxu1 }
 0x529   :  { %v2489_v24 = vmul.f32 -1.442695, %v1554_v2  ;;  %v2490_v59 = vmul.f32 -1.442695, %v1556_v39 }
 0x52a   :  { %2770 = vpow2.f32 %v2488_v5 }
 0x52b   :  { %2772 = vpow2.f32 %v2489_v24  ;;  %v4599_v24 = vld [vmem:[#allocation20_spill] sm:$0xff] }
 0x52c   :  { %2774 = vpow2.f32 %v2490_v59 }
 0x52d   :  { %2776 = vtanh.f32 %v1555_v15  ;;  %v4607_v15 = vld [vmem:[#allocation5_spill] sm:$0xff] }
 0x531   :  { %v2769_v61 = vpop.eup %2768 }
 0x532   :  { %v1580_v60 = vmul.f32 %v2769_v61, %v2767_v62 }
 0x534   :  { %v2771_v57 = vpop.eup %2770  ;;  %v1581_v30 = vpack.c.bf16 %v1580_v60, %v1580_v60  ;;  %v4609_v60 = vld [vmem:[#allocation10_spill] sm:$0xff] }
 0x535   :  { %v2773_v31 = vpop.eup %2772  ;;  %v1587_v35 = vadd.f32 1.0, %v2771_v57  ;;  %v4611_v57 = vld [vmem:[#allocation13_spill] sm:$0xff] }
 0x536   :  { %v1593_v54 = vadd.f32 1.0, %v2773_v31  ;;  %2487 = vst [vmem:[%s4401_s2 + $0x10] sm:$0xf] %v1581_v30  ;;  %1651 = vmatmul.mubr.bf16.vlgmr.msra.gmra.mrb[40].mxu0 %v1581_v30  ;;  %1692 = vmatmul.mubr.bf16.vlgmr.msra.gmra.mrb[40].mxu1 %v1581_v30  ;;  %v2775_v56 = vpop.eup %2774  ;;  %v4613_v30 = vld [vmem:[#allocation14_spill] sm:$0xff]  ;;  %v4614_v31 = vld [vmem:[#allocation11_spill] sm:$0xff] }
 0x537   :  { %2778 = vrcp.f32 %v1587_v35  ;;  %1712 = vmatpush1.bf16.msra.mxu0 %v3655_v36  ;;  %1753 = vmatpush1.bf16.msra.mxu1 %v3661_v21  ;;  %v2777_v55 = vpop.eup %2776  ;;  %v1600_v5 = vadd.f32 1.0, %v2775_v56  ;;  %v4615_v35 = vld [vmem:[#allocation17_spill] sm:$0xff]  ;;  %v4617_v56 = vld [vmem:[#allocation18_spill] sm:$0xff] }
 0x538   :  { %2780 = vrcp.f32 %v1593_v54  ;;  %1713 = vmatprep.subr.bf16.mxu0 %v3667_v22  ;;  %1754 = vmatprep.subr.bf16.mxu1 %v3673_v20  ;;  %v4616_v54 = vld [vmem:[#allocation12_spill] sm:$0xff] }
 0x539   :  { %1743 = vmatprep.mubr.bf16.mxu0 %v4527_v58  ;;  %1784 = vmatprep.mubr.bf16.mxu1 %v4527_v58  ;;  %2782 = vrcp.f32 %v1600_v5  ;;  %v4622_v5 = vld [vmem:[#allocation19_spill] sm:$0xff] }
 0x53b   :  { %1714 = vmatpush1.bf16.msra.mxu0 %v3681_v33  ;;  %1755 = vmatpush1.bf16.msra.mxu1 %v3926_v0 }
 0x53c   :  { %1715 = vmatprep.subr.bf16.mxu0 %v3688_v40  ;;  %1756 = vmatprep.subr.bf16.mxu1 %v3933_v9 }
 0x53f   :  { %1716 = vmatpush1.bf16.msra.mxu0 %v3695_v4  ;;  %1757 = vmatpush1.bf16.msra.mxu1 %v3940_v49 }
 0x540   :  { %1717 = vmatprep.subr.bf16.mxu0 %v3702_v38  ;;  %1758 = vmatprep.subr.bf16.mxu1 %v3947_v3 }
 0x541   :  { %v2779_v47 = vpop.eup %2778 }
 0x542   :  { %v2781_v2 = vpop.eup %2780  ;;  %v1604_v8 = vmul.f32 %v2779_v47, %v2777_v55  ;;  %v4618_v55 = vld [vmem:[#allocation15_spill] sm:$0xff]  ;;  %v4619_v47 = vld [vmem:[#allocation21_spill] sm:$0xff] }
 0x543   :  { %v1603_v43 = vmul.f32 %v2781_v2, %v3975_v19  ;;  %1718 = vmatpush1.bf16.msra.mxu0 %v3954_v44  ;;  %1759 = vmatpush1.bf16.msra.mxu1 %v3960_v45  ;;  %v4598_v19 = vld [vmem:[#allocation23_spill] sm:$0xff]  ;;  %v2783_v39 = vpop.eup %2782  ;;  %v4620_v2 = vld [vmem:[#allocation16_spill] sm:$0xff] }
 0x544   :  { %1719 = vmatprep.subr.bf16.mxu0 %v3966_v41  ;;  %1760 = vmatprep.subr.bf16.mxu1 %v3972_v48 }
 0x545   :  { %v4139_v14 = vadd.f32 %v1604_v8, %v1603_v43  ;;  %v4621_v8 = vld [vmem:[#allocation22_spill] sm:$0xff] }
 0x546   :  { %v2492_v43 = vld [vmem:[%s4400_s0 + $0x50] sm:$0xff] }
 0x547   :  { %1720 = vmatpush1.bf16.msra.mxu0 %v3980_v29  ;;  %1761 = vmatpush1.bf16.msra.mxu1 %v3986_v16  ;;  %2784 = vtanh.f32 %v4139_v14 }
 0x548   :  { %1721 = vmatprep.subr.bf16.mxu0 %v3993_v26  ;;  %1762 = vmatprep.subr.bf16.mxu1 %v3999_v42 }
 0x54b   :  { %1722 = vmatpush1.bf16.msra.mxu0 %v4005_v46  ;;  %1763 = vmatpush1.bf16.msra.mxu1 %v4011_v50 }
 0x54c   :  { %1723 = vmatprep.subr.bf16.mxu0 %v4017_v12  ;;  %1764 = vmatprep.subr.bf16.mxu1 %v4598_v19 }
 0x54f   :  { %1724 = vmatpush1.bf16.msra.mxu0 %v4599_v24  ;;  %1765 = vmatpush1.bf16.msra.mxu1 %v4600_v63 }
 0x550   :  { %1725 = vmatprep.subr.bf16.mxu0 %v4601_v27  ;;  %1766 = vmatprep.subr.bf16.mxu1 %v4047_v23 }
 0x551   :  { %v2785_v62 = vpop.eup %2784 }
 0x552   :  { %v1607_v61 = vmul.f32 %v2785_v62, %v2783_v39  ;;  %v1614_v39 = vunpack.c.l.bf16 %v2492_v43  ;;  %v1615_v62 = vunpack.c.h.bf16 %v2492_v43 }
 0x553   :  { %1726 = vmatpush1.bf16.msra.mxu0 %v4053_v34  ;;  %1767 = vmatpush1.bf16.msra.mxu1 %v4059_v7 }
 0x554   :  { %v1608_v59 = vpack.c.bf16 %v1607_v61, %v1607_v61  ;;  %1858 = vmatprep.subr.bf16.mxu0 %v3557_v17  ;;  %1899 = vmatprep.subr.bf16.mxu1 %v3732_v51  ;;  %v4602_v17 = vld [vmem:[#allocation25_spill] sm:$0xff] }
 0x556   :  { %2491 = vst [vmem:[%s4401_s2 + $0x30] sm:$0xf] %v1608_v59  ;;  %1744 = vmatmul.mubr.bf16.vlgmr.msra.gmra.mrb[44].mxu0 %v1608_v59  ;;  %1785 = vmatmul.mubr.bf16.vlgmr.msra.gmra.mrb[44].mxu1 %v1608_v59 }
 0x557   :  { %1859 = vmatpush1.bf16.msra.mxu0 %v3567_v28  ;;  %1900 = vmatpush1.bf16.msra.mxu1 %v3573_v25  ;;  %v4603_v28 = vld [vmem:[#allocation26_spill] sm:$0xff] }
 0x558   :  { %1860 = vmatprep.subr.bf16.mxu0 %v3579_v6  ;;  %1901 = vmatprep.subr.bf16.mxu1 %v3744_v1  ;;  %v4604_v25 = vld [vmem:[#allocation6_spill] sm:$0xff]  ;;  %v4605_v6 = vld [vmem:[#allocation4_spill] sm:$0xff] }
 0x559   :  { %1890 = vmatprep.mubr.bf16.mxu0 %v4527_v58  ;;  %1931 = vmatprep.mubr.bf16.mxu1 %v4527_v58 }
 0x55b   :  { %1861 = vmatpush1.bf16.msra.mxu0 %v3588_v18  ;;  %1902 = vmatpush1.bf16.msra.mxu1 %v3753_v37  ;;  %v4606_v18 = vld [vmem:[#allocation9_spill] sm:$0xff] }
 0x55c   :  { %1862 = vmatprep.subr.bf16.mxu0 %v3595_v32  ;;  %1903 = vmatprep.subr.bf16.mxu1 %v3760_v52  ;;  %v4608_v32 = vld [vmem:[#allocation27_spill] sm:$0xff] }
 0x55f   :  { %1863 = vmatpush1.bf16.msra.mxu0 %v3602_v10  ;;  %1904 = vmatpush1.bf16.msra.mxu1 %v3767_v53  ;;  %v4610_v10 = vld [vmem:[#allocation7_spill] sm:$0xff] }
 0x560   :  { %1864 = vmatprep.subr.bf16.mxu0 %v3609_v11  ;;  %1905 = vmatprep.subr.bf16.mxu1 %v4602_v17  ;;  %v4612_v11 = vld [vmem:[#allocation8_spill] sm:$0xff] }
 0x563   :  { %1865 = vmatpush1.bf16.msra.mxu0 %v4603_v28  ;;  %1906 = vmatpush1.bf16.msra.mxu1 %v4604_v25 }
 0x564   :  { %1866 = vmatprep.subr.bf16.mxu0 %v4605_v6  ;;  %1907 = vmatprep.subr.bf16.mxu1 %v4606_v18 }
 0x567   :  { %1867 = vmatpush1.bf16.msra.mxu0 %v4607_v15  ;;  %1908 = vmatpush1.bf16.msra.mxu1 %v4608_v32 }
 0x568   :  { %1868 = vmatprep.subr.bf16.mxu0 %v4609_v60  ;;  %1909 = vmatprep.subr.bf16.mxu1 %v4610_v10 }
 0x56b   :  { %1869 = vmatpush1.bf16.msra.mxu0 %v4611_v57  ;;  %1910 = vmatpush1.bf16.msra.mxu1 %v4612_v11 }
 0x56c   :  { %1870 = vmatprep.subr.bf16.mxu0 %v4613_v30  ;;  %1911 = vmatprep.subr.bf16.mxu1 %v4614_v31 }
 0x56f   :  { %1871 = vmatpush1.bf16.msra.mxu0 %v4615_v35  ;;  %1912 = vmatpush1.bf16.msra.mxu1 %v4616_v54 }
 0x570   :  { %1872 = vmatprep.subr.bf16.mxu0 %v4617_v56  ;;  %1913 = vmatprep.subr.bf16.mxu1 %v4618_v55  ;;  %v2493_v55 = vld [vmem:[%s4400_s0 + $0x58] sm:$0xff] }
 0x571   :  { %v1617_v57 = vunpack.c.h.bf16 %v2493_v55  ;;  %v1616_v10 = vunpack.c.l.bf16 %v2493_v55 }
 0x573   :  { %1873 = vmatpush1.bf16.msra.mxu0 %v4619_v47  ;;  %1914 = vmatpush1.bf16.msra.mxu1 %v4620_v2 }
 0x574   :  { %1951 = vmatprep.subr.bf16.mxu0 %v4621_v8  ;;  %1992 = vmatprep.subr.bf16.mxu1 %v4622_v5 }
 0x609   :  { %v1652_v61 = vpop.f32.mrb[40].mxu0  ;;  %v1693_v59 = vpop.f32.mrb[40].mxu1 }
 0x60a   :  { %v1700_v54 = vadd.f32 %v1652_v61, %v1614_v39  ;;  %v1654_v47 = vpop.f32.mrb[41].mxu0  ;;  %v1695_v56 = vpop.f32.mrb[41].mxu1  ;;  %v1702_v39 = vadd.f32 %v1693_v59, %v1616_v10 }
 0x60b   :  { %v1701_v2 = vadd.f32 %v1654_v47, %v1615_v62  ;;  %v1656_v35 = vpop.f32.mrb[42].mxu0  ;;  %v1697_v8 = vpop.f32.mrb[42].mxu1  ;;  %v1703_v43 = vadd.f32 %v1695_v56, %v1617_v57 }
 0x60c   :  { %v2496_v31 = vmul.f32 -1.442695, %v1700_v54  ;;  %v1657_v5 = vpop.f32.mrb[43].mxu0  ;;  %v1698_v30 = vpop.f32.mrb[43].mxu1 }
 0x60d   :  { %v2497_v11 = vmul.f32 -1.442695, %v1701_v2  ;;  %v2498_v60 = vmul.f32 -1.442695, %v1703_v43  ;;  %v2494_v30 = vld [vmem:[%s4400_s0 + $0xd0] sm:$0xff] }
 0x60e   :  { %2786 = vpow2.f32 %v2496_v31  ;;  %v1707_v55 = vunpack.c.l.bf16 %v2494_v30  ;;  %v1708_v47 = vunpack.c.h.bf16 %v2494_v30 }
 0x60f   :  { %2788 = vpow2.f32 %v2497_v11 }
 0x610   :  { %2790 = vpow2.f32 %v2498_v60 }
 0x611   :  { %2792 = vtanh.f32 %v1702_v39 }
 0x618   :  { %v2787_v61 = vpop.eup %2786 }
 0x619   :  { %v2789_v32 = vpop.eup %2788  ;;  %v1800_v15 = vadd.f32 1.0, %v2787_v61 }
 0x61a   :  { %v1806_v18 = vadd.f32 1.0, %v2789_v32  ;;  %v2791_v35 = vpop.eup %2790 }
 0x61b   :  { %2794 = vrcp.f32 %v1800_v15  ;;  %v2793_v54 = vpop.eup %2792  ;;  %v1813_v56 = vadd.f32 1.0, %v2791_v35  ;;  %v2495_v15 = vld [vmem:[%s4400_s0 + $0xd8] sm:$0xff] }
 0x61c   :  { %2796 = vrcp.f32 %v1806_v18  ;;  %v1710_v30 = vunpack.c.h.bf16 %v2495_v15 }
 0x61d   :  { %2798 = vrcp.f32 %v1813_v56 }
 0x625   :  { %v2795_v31 = vpop.eup %2794 }
 0x626   :  { %v2797_v11 = vpop.eup %2796  ;;  %v1817_v57 = vmul.f32 %v2795_v31, %v2793_v54  ;;  %v1709_v31 = vunpack.c.l.bf16 %v2495_v15 }
 0x627   :  { %v1816_v10 = vmul.f32 %v2797_v11, %v4111_v13  ;;  %v2799_v11 = vpop.eup %2798 }
 0x629   :  { %v4205_v2 = vadd.f32 %v1817_v57, %v1816_v10  ;;  %v1745_v60 = vpop.f32.mrb[44].mxu0  ;;  %v1786_v32 = vpop.f32.mrb[44].mxu1 }
 0x62a   :  { %v1793_v18 = vadd.f32 %v1745_v60, %v1707_v55  ;;  %v1747_v8 = vpop.f32.mrb[45].mxu0  ;;  %v1788_v5 = vpop.f32.mrb[45].mxu1  ;;  %v1795_v55 = vadd.f32 %v1786_v32, %v1709_v31  ;;  %v4628_v31 = vld [vmem:[#allocation13_spill] sm:$0xff] }
 0x62b   :  { %v1794_v62 = vadd.f32 %v1747_v8, %v1708_v47  ;;  %v1749_v59 = vpop.f32.mrb[46].mxu0  ;;  %v1790_v43 = vpop.f32.mrb[46].mxu1  ;;  %2800 = vtanh.f32 %v4205_v2  ;;  %v1796_v54 = vadd.f32 %v1788_v5, %v1710_v30  ;;  %v4625_v30 = vld [vmem:[#allocation27_spill] sm:$0xff] }
 0x62c   :  { %v2500_v39 = vmul.f32 -1.442695, %v1793_v18  ;;  %v1750_v13 = vpop.f32.mrb[47].mxu0  ;;  %v1791_v61 = vpop.f32.mrb[47].mxu1  ;;  %v2947_v43 = vld [vmem:[%s4399_s1] ss:$16 sps:$4 sm:$0xff]  }
 0x62d   :  { %v2501_v35 = vmul.f32 -1.442695, %v1794_v62  ;;  %v2502_v56 = vmul.f32 -1.442695, %v1796_v54  ;;  %v2946_v62 = vld [vmem:[%s4399_s1 + $0x4] ss:$16 sps:$4 sm:$0xff]  }
 0x62e   :  { %2802 = vpow2.f32 %v2500_v39  ;;  %v2948_v39 = vld [vmem:[%s4399_s1 + $0x8] ss:$16 sps:$4 sm:$0xff]   ;;  %v2950_v13 = vld [vmem:[%s4399_s1 + $0x20] ss:$16 sps:$4 sm:$0xff]   ;;  %v2951_v61 = vld [vmem:[%s4399_s1 + $0x44] ss:$16 sps:$4 sm:$0xff]  }
 0x62f   :  { %2804 = vpow2.f32 %v2501_v35  ;;  %v2953_v35 = vld [vmem:[%s4399_s1 + $0x64] ss:$16 sps:$4 sm:$0xff]   ;;  %v4627_v54 = vld [vmem:[#allocation7_spill] sm:$0xff] }
 0x630   :  { %2806 = vpow2.f32 %v2502_v56  ;;  %v4635_v56 = vld [vmem:[#allocation15_spill] sm:$0xff] }
 0x631   :  { %2808 = vtanh.f32 %v1795_v55  ;;  %v4636_v55 = vld [vmem:[#allocation21_spill] sm:$0xff] }
 0x635   :  { %v2801_v57 = vpop.eup %2800 }
 0x636   :  { %v1820_v10 = vmul.f32 %v2801_v57, %v2799_v11  ;;  %v4629_v11 = vld [vmem:[#allocation8_spill] sm:$0xff]  ;;  %v4634_v57 = vld [vmem:[#allocation18_spill] sm:$0xff] }
 0x638   :  { %v2803_v60 = vpop.eup %2802  ;;  %v1821_v47 = vpack.c.bf16 %v1820_v10, %v1820_v10  ;;  %v4637_v10 = vld [vmem:[#allocation16_spill] sm:$0xff] }
 0x639   :  { %v2805_v8 = vpop.eup %2804  ;;  %v1827_v59 = vadd.f32 1.0, %v2803_v60  ;;  %v4638_v60 = vld [vmem:[#allocation22_spill] sm:$0xff] }
 0x63a   :  { %v1833_v18 = vadd.f32 1.0, %v2805_v8  ;;  %2499 = vst [vmem:[%s4401_s2 + $0x14] sm:$0xf] %v1821_v47  ;;  %1891 = vmatmul.mubr.bf16.vlgmr.msra.gmra.mrb[48].mxu0 %v1821_v47  ;;  %1932 = vmatmul.mubr.bf16.vlgmr.msra.gmra.mrb[48].mxu1 %v1821_v47  ;;  %v4639_v47 = vld [vmem:[#allocation19_spill] sm:$0xff]  ;;  %v2504_v8 = vld [vmem:[%s4400_s0 + $0x60] sm:$0xff] }
 0x63b   :  { %2810 = vrcp.f32 %v1827_v59  ;;  %1952 = vmatpush1.bf16.msra.mxu0 %v3655_v36  ;;  %1993 = vmatpush1.bf16.msra.mxu1 %v3661_v21  ;;  %v2807_v36 = vpop.eup %2806  ;;  %v1854_v59 = vunpack.c.l.bf16 %v2504_v8 }
 0x63c   :  { %2812 = vrcp.f32 %v1833_v18  ;;  %1953 = vmatprep.subr.bf16.mxu0 %v3667_v22  ;;  %1994 = vmatprep.subr.bf16.mxu1 %v3673_v20  ;;  %v2809_v21 = vpop.eup %2808  ;;  %v1855_v18 = vunpack.c.h.bf16 %v2504_v8  ;;  %v2507_v8 = vld [vmem:[%s4400_s0 + $0xe8] sm:$0xff] }
 0x63d   :  { %1983 = vmatprep.mubr.bf16.mxu0 %v4527_v58  ;;  %2024 = vmatprep.mubr.bf16.mxu1 %v4527_v58 }
 0x63f   :  { %1954 = vmatpush1.bf16.msra.mxu0 %v3681_v33  ;;  %1995 = vmatpush1.bf16.msra.mxu1 %v3926_v0  ;;  %v1840_v33 = vadd.f32 1.0, %v2807_v36 }
 0x640   :  { %1955 = vmatprep.subr.bf16.mxu0 %v3688_v40  ;;  %1996 = vmatprep.subr.bf16.mxu1 %v3933_v9 }
 0x641   :  { %2814 = vrcp.f32 %v1840_v33 }
 0x643   :  { %1956 = vmatpush1.bf16.msra.mxu0 %v3695_v4  ;;  %1997 = vmatpush1.bf16.msra.mxu1 %v3940_v49 }
 0x644   :  { %1957 = vmatprep.subr.bf16.mxu0 %v3702_v38  ;;  %1998 = vmatprep.subr.bf16.mxu1 %v3947_v3 }
 0x645   :  { %v2811_v22 = vpop.eup %2810 }
 0x646   :  { %v2813_v20 = vpop.eup %2812  ;;  %v1844_v32 = vmul.f32 %v2811_v22, %v2809_v21 }
 0x647   :  { %v1843_v15 = vmul.f32 %v2813_v20, %v4139_v14  ;;  %1958 = vmatpush1.bf16.msra.mxu0 %v3954_v44  ;;  %1999 = vmatpush1.bf16.msra.mxu1 %v3960_v45  ;;  %v2505_v20 = vld [vmem:[%s4400_s0 + $0x68] sm:$0xff] }
 0x648   :  { %1959 = vmatprep.subr.bf16.mxu0 %v3966_v41  ;;  %2000 = vmatprep.subr.bf16.mxu1 %v3972_v48 }
 0x649   :  { %v4233_v40 = vadd.f32 %v1844_v32, %v1843_v15 }
 0x64b   :  { %1960 = vmatpush1.bf16.msra.mxu0 %v3980_v29  ;;  %2001 = vmatpush1.bf16.msra.mxu1 %v3986_v16  ;;  %2816 = vtanh.f32 %v4233_v40  ;;  %v2815_v4 = vpop.eup %2814 }
 0x64c   :  { %1961 = vmatprep.subr.bf16.mxu0 %v3993_v26  ;;  %2002 = vmatprep.subr.bf16.mxu1 %v3999_v42 }
 0x64f   :  { %1962 = vmatpush1.bf16.msra.mxu0 %v4005_v46  ;;  %2003 = vmatpush1.bf16.msra.mxu1 %v4011_v50 }
 0x650   :  { %1963 = vmatprep.subr.bf16.mxu0 %v4017_v12  ;;  %2004 = vmatprep.subr.bf16.mxu1 %v4598_v19 }
 0x653   :  { %1964 = vmatpush1.bf16.msra.mxu0 %v4599_v24  ;;  %2005 = vmatpush1.bf16.msra.mxu1 %v4600_v63 }
 0x654   :  { %1965 = vmatprep.subr.bf16.mxu0 %v4601_v27  ;;  %2006 = vmatprep.subr.bf16.mxu1 %v4047_v23 }
 0x655   :  { %v2817_v38 = vpop.eup %2816 }
 0x656   :  { %v1847_v14 = vmul.f32 %v2817_v38, %v2815_v4 }
 0x657   :  { %1966 = vmatpush1.bf16.msra.mxu0 %v4053_v34  ;;  %2007 = vmatpush1.bf16.msra.mxu1 %v4059_v7 }
 0x658   :  { %v1848_v5 = vpack.c.bf16 %v1847_v14, %v1847_v14  ;;  %2098 = vmatprep.subr.bf16.mxu0 %v2946_v62  ;;  %2139 = vmatprep.subr.bf16.mxu1 %v3732_v51  ;;  %v2949_v51 = vld [vmem:[%s4399_s1 + $0x24] ss:$16 sps:$4 sm:$0xff]  }
 0x65a   :  { %2503 = vst [vmem:[%s4401_s2 + $0x34] sm:$0xf] %v1848_v5  ;;  %1984 = vmatmul.mubr.bf16.vlgmr.msra.gmra.mrb[52].mxu0 %v1848_v5  ;;  %2025 = vmatmul.mubr.bf16.vlgmr.msra.gmra.mrb[52].mxu1 %v1848_v5 }
 0x65b   :  { %2099 = vmatpush1.bf16.msra.mxu0 %v2947_v43  ;;  %2140 = vmatpush1.bf16.msra.mxu1 %v2948_v39  ;;  %v1857_v39 = vunpack.c.h.bf16 %v2505_v20 }
 0x65c   :  { %2100 = vmatprep.subr.bf16.mxu0 %v2949_v51  ;;  %2141 = vmatprep.subr.bf16.mxu1 %v3744_v1  ;;  %v2952_v1 = vld [vmem:[%s4399_s1 + $0x40] ss:$16 sps:$4 sm:$0xff]  }
 0x65d   :  { %2130 = vmatprep.mubr.bf16.mxu0 %v4527_v58  ;;  %2171 = vmatprep.mubr.bf16.mxu1 %v4527_v58 }
 0x65f   :  { %2101 = vmatpush1.bf16.msra.mxu0 %v2950_v13  ;;  %2142 = vmatpush1.bf16.msra.mxu1 %v3753_v37  ;;  %v4623_v37 = vld [vmem:[#allocation9_spill] sm:$0xff]  ;;  %v1856_v13 = vunpack.c.l.bf16 %v2505_v20 }
 0x660   :  { %2102 = vmatprep.subr.bf16.mxu0 %v2951_v61  ;;  %2143 = vmatprep.subr.bf16.mxu1 %v3760_v52  ;;  %v4624_v52 = vld [vmem:[#allocation5_spill] sm:$0xff] }
 0x663   :  { %2103 = vmatpush1.bf16.msra.mxu0 %v2952_v1  ;;  %2144 = vmatpush1.bf16.msra.mxu1 %v3767_v53  ;;  %v4626_v53 = vld [vmem:[#allocation10_spill] sm:$0xff] }
 0x664   :  { %2104 = vmatprep.subr.bf16.mxu0 %v2953_v35  ;;  %2145 = vmatprep.subr.bf16.mxu1 %v4602_v17  ;;  %v4630_v17 = vld [vmem:[#allocation14_spill] sm:$0xff] }
 0x667   :  { %2105 = vmatpush1.bf16.msra.mxu0 %v4603_v28  ;;  %2146 = vmatpush1.bf16.msra.mxu1 %v4604_v25  ;;  %v4631_v28 = vld [vmem:[#allocation11_spill] sm:$0xff]  ;;  %v4632_v25 = vld [vmem:[#allocation17_spill] sm:$0xff] }
 0x668   :  { %2106 = vmatprep.subr.bf16.mxu0 %v4605_v6  ;;  %2147 = vmatprep.subr.bf16.mxu1 %v4623_v37  ;;  %v4633_v6 = vld [vmem:[#allocation12_spill] sm:$0xff] }
 0x66b   :  { %2107 = vmatpush1.bf16.msra.mxu0 %v4624_v52  ;;  %2148 = vmatpush1.bf16.msra.mxu1 %v4625_v30 }
 0x66c   :  { %2108 = vmatprep.subr.bf16.mxu0 %v4626_v53  ;;  %2149 = vmatprep.subr.bf16.mxu1 %v4627_v54  ;;  %v2506_v54 = vld [vmem:[%s4400_s0 + $0xe0] sm:$0xff] }
 0x66f   :  { %2109 = vmatpush1.bf16.msra.mxu0 %v4628_v31  ;;  %2150 = vmatpush1.bf16.msra.mxu1 %v4629_v11 }
 0x670   :  { %2110 = vmatprep.subr.bf16.mxu0 %v4630_v17  ;;  %2151 = vmatprep.subr.bf16.mxu1 %v4631_v28 }
 0x673   :  { %2111 = vmatpush1.bf16.msra.mxu0 %v4632_v25  ;;  %2152 = vmatpush1.bf16.msra.mxu1 %v4633_v6  ;;  %v1947_v6 = vunpack.c.l.bf16 %v2506_v54 }
 0x674   :  { %2112 = vmatprep.subr.bf16.mxu0 %v4634_v57  ;;  %2153 = vmatprep.subr.bf16.mxu1 %v4635_v56  ;;  %v1948_v56 = vunpack.c.h.bf16 %v2506_v54  ;;  %v2958_v54 = vld [vmem:[%s4399_s1 + $0x120] ss:$16 sps:$4 sm:$0xff]  }
 0x677   :  { %2113 = vmatpush1.bf16.msra.mxu0 %v4636_v55  ;;  %2154 = vmatpush1.bf16.msra.mxu1 %v4637_v10 }
 0x678   :  { %2191 = vmatprep.subr.bf16.mxu0 %v4638_v60  ;;  %2232 = vmatprep.subr.bf16.mxu1 %v4639_v47 }
 0x70d   :  { %v1892_v36 = vpop.f32.mrb[48].mxu0  ;;  %v1933_v21 = vpop.f32.mrb[48].mxu1 }
 0x70e   :  { %v1940_v22 = vadd.f32 %v1892_v36, %v1854_v59  ;;  %v1894_v32 = vpop.f32.mrb[49].mxu0  ;;  %v1935_v33 = vpop.f32.mrb[49].mxu1  ;;  %v1942_v1 = vadd.f32 %v1933_v21, %v1856_v13 }
 0x70f   :  { %v1941_v15 = vadd.f32 %v1894_v32, %v1855_v18  ;;  %v1896_v4 = vpop.f32.mrb[50].mxu0  ;;  %v1937_v38 = vpop.f32.mrb[50].mxu1  ;;  %v1943_v51 = vadd.f32 %v1935_v33, %v1857_v39 }
 0x710   :  { %v2508_v14 = vmul.f32 -1.442695, %v1940_v22  ;;  %v1897_v5 = vpop.f32.mrb[51].mxu0  ;;  %v1938_v62 = vpop.f32.mrb[51].mxu1  ;;  %v1949_v38 = vunpack.c.l.bf16 %v2507_v8 }
 0x711   :  { %v2509_v43 = vmul.f32 -1.442695, %v1941_v15  ;;  %v2510_v61 = vmul.f32 -1.442695, %v1943_v51  ;;  %v1950_v15 = vunpack.c.h.bf16 %v2507_v8 }
 0x712   :  { %2818 = vpow2.f32 %v2508_v14 }
 0x713   :  { %2820 = vpow2.f32 %v2509_v43 }
 0x714   :  { %2822 = vpow2.f32 %v2510_v61 }
 0x715   :  { %2824 = vtanh.f32 %v1942_v1 }
 0x71c   :  { %v2819_v35 = vpop.eup %2818 }
 0x71d   :  { %v2821_v37 = vpop.eup %2820  ;;  %v2040_v52 = vadd.f32 1.0, %v2819_v35 }
 0x71e   :  { %v2046_v30 = vadd.f32 1.0, %v2821_v37  ;;  %v2823_v53 = vpop.eup %2822  ;;  %v2954_v37 = vld [vmem:[%s4399_s1 + $0x100] ss:$16 sps:$4 sm:$0xff]  }
 0x71f   :  { %2826 = vrcp.f32 %v2040_v52  ;;  %v2825_v31 = vpop.eup %2824  ;;  %v2053_v25 = vadd.f32 1.0, %v2823_v53  ;;  %v2955_v52 = vld [vmem:[%s4399_s1 + $0x108] ss:$16 sps:$4 sm:$0xff]   ;;  %v2957_v53 = vld [vmem:[%s4399_s1 + $0x12c] ss:$16 sps:$4 sm:$0xff]  }
 0x720   :  { %2828 = vrcp.f32 %v2046_v30  ;;  %v2956_v30 = vld [vmem:[%s4399_s1 + $0x124] ss:$16 sps:$4 sm:$0xff]  }
 0x721   :  { %2830 = vrcp.f32 %v2053_v25 }
 0x729   :  { %v2827_v11 = vpop.eup %2826 }
 0x72a   :  { %v2829_v17 = vpop.eup %2828  ;;  %v2057_v28 = vmul.f32 %v2827_v11, %v2825_v31  ;;  %v2959_v31 = vld [vmem:[%s4399_s1 + $0x144] ss:$16 sps:$4 sm:$0xff]  }
 0x72b   :  { %v2056_v57 = vmul.f32 %v2829_v17, %v4205_v2  ;;  %v2831_v14 = vpop.eup %2830  ;;  %v2960_v17 = vld [vmem:[%s4399_s1 + $0x140] ss:$16 sps:$4 sm:$0xff]  }
 0x72d   :  { %v4315_v55 = vadd.f32 %v2057_v28, %v2056_v57  ;;  %v1985_v10 = vpop.f32.mrb[52].mxu0  ;;  %v2026_v60 = vpop.f32.mrb[52].mxu1 }
 0x72e   :  { %v2033_v47 = vadd.f32 %v1985_v10, %v1947_v6  ;;  %v1987_v59 = vpop.f32.mrb[53].mxu0  ;;  %v2028_v18 = vpop.f32.mrb[53].mxu1  ;;  %v2035_v43 = vadd.f32 %v2026_v60, %v1949_v38 }
 0x72f   :  { %v2034_v36 = vadd.f32 %v1987_v59, %v1948_v56  ;;  %v1989_v21 = vpop.f32.mrb[54].mxu0  ;;  %v2030_v22 = vpop.f32.mrb[54].mxu1  ;;  %2832 = vtanh.f32 %v4315_v55  ;;  %v2036_v4 = vadd.f32 %v2028_v18, %v1950_v15 }
 0x730   :  { %v2512_v20 = vmul.f32 -1.442695, %v2033_v47  ;;  %v1990_v2 = vpop.f32.mrb[55].mxu0  ;;  %v2031_v32 = vpop.f32.mrb[55].mxu1 }
 0x731   :  { %v2513_v33 = vmul.f32 -1.442695, %v2034_v36  ;;  %v2514_v62 = vmul.f32 -1.442695, %v2036_v4 }
 0x732   :  { %2834 = vpow2.f32 %v2512_v20  ;;  %v2518_v20 = vld [vmem:[%s4400_s0 + $0xf0] sm:$0xff] }
 0x733   :  { %2836 = vpow2.f32 %v2513_v33  ;;  %v2187_v38 = vunpack.c.l.bf16 %v2518_v20 }
 0x734   :  { %2838 = vpow2.f32 %v2514_v62 }
 0x735   :  { %2840 = vtanh.f32 %v2035_v43 }
 0x739   :  { %v2833_v5 = vpop.eup %2832 }
 0x73a   :  { %v2060_v39 = vmul.f32 %v2833_v5, %v2831_v14  ;;  %v2188_v5 = vunpack.c.h.bf16 %v2518_v20 }
 0x73c   :  { %v2835_v51 = vpop.eup %2834  ;;  %v2061_v13 = vpack.c.bf16 %v2060_v39, %v2060_v39 }
 0x73d   :  { %v2837_v61 = vpop.eup %2836  ;;  %v2067_v1 = vadd.f32 1.0, %v2835_v51 }
 0x73e   :  { %v2073_v35 = vadd.f32 1.0, %v2837_v61  ;;  %2511 = vst [vmem:[%s4401_s2 + $0x18] sm:$0xf] %v2061_v13  ;;  %2131 = vmatmul.mubr.bf16.vlgmr.msra.gmra.mrb[56].mxu0 %v2061_v13  ;;  %2172 = vmatmul.mubr.bf16.vlgmr.msra.gmra.mrb[56].mxu1 %v2061_v13  ;;  %v2839_v11 = vpop.eup %2838  ;;  %v2519_v13 = vld [vmem:[%s4400_s0 + $0xf8] sm:$0xff] }
 0x73f   :  { %2842 = vrcp.f32 %v2067_v1  ;;  %2192 = vmatpush1.bf16.msra.mxu0 %v2954_v37  ;;  %2233 = vmatpush1.bf16.msra.mxu1 %v2955_v52 }
 0x740   :  { %2844 = vrcp.f32 %v2073_v35  ;;  %2193 = vmatprep.subr.bf16.mxu0 %v2956_v30  ;;  %2234 = vmatprep.subr.bf16.mxu1 %v2957_v53 }
 0x741   :  { %2223 = vmatprep.mubr.bf16.mxu0 %v4527_v58  ;;  %2264 = vmatprep.mubr.bf16.mxu1 %v4527_v58  ;;  %v2841_v58 = vpop.eup %2840 }
 0x743   :  { %2194 = vmatpush1.bf16.msra.mxu0 %v2958_v54  ;;  %2235 = vmatpush1.bf16.msra.mxu1 %v3926_v0  ;;  %v2961_v0 = vld [vmem:[%s4399_s1 + $0x164] ss:$16 sps:$4 sm:$0xff]  }
 0x744   :  { %2195 = vmatprep.subr.bf16.mxu0 %v2959_v31  ;;  %2236 = vmatprep.subr.bf16.mxu1 %v3933_v9  ;;  %v2080_v9 = vadd.f32 1.0, %v2839_v11  ;;  %v2190_v31 = vunpack.c.h.bf16 %v2519_v13 }
 0x746   :  { %2846 = vrcp.f32 %v2080_v9 }
 0x747   :  { %2196 = vmatpush1.bf16.msra.mxu0 %v2960_v17  ;;  %2237 = vmatpush1.bf16.msra.mxu1 %v3940_v49  ;;  %v2189_v17 = vunpack.c.l.bf16 %v2519_v13 }
 0x748   :  { %2197 = vmatprep.subr.bf16.mxu0 %v2961_v0  ;;  %2238 = vmatprep.subr.bf16.mxu1 %v3947_v3 }
 0x749   :  { %v2843_v28 = vpop.eup %2842 }
 0x74a   :  { %v2845_v25 = vpop.eup %2844  ;;  %v2084_v6 = vmul.f32 %v2843_v28, %v2841_v58 }
 0x74b   :  { %v2083_v57 = vmul.f32 %v2845_v25, %v4233_v40  ;;  %2198 = vmatpush1.bf16.msra.mxu0 %v3954_v44  ;;  %2239 = vmatpush1.bf16.msra.mxu1 %v3960_v45 }
 0x74c   :  { %2199 = vmatprep.subr.bf16.mxu0 %v3966_v41  ;;  %2240 = vmatprep.subr.bf16.mxu1 %v3972_v48  ;;  %v2516_v48 = vld [vmem:[%s4400_s0 + $0x70] sm:$0xff] }
 0x74d   :  { %v4359_v49 = vadd.f32 %v2084_v6, %v2083_v57 }
 0x74f   :  { %2200 = vmatpush1.bf16.msra.mxu0 %v3980_v29  ;;  %2241 = vmatpush1.bf16.msra.mxu1 %v3986_v16  ;;  %2848 = vtanh.f32 %v4359_v49  ;;  %v2094_v29 = vunpack.c.l.bf16 %v2516_v48  ;;  %v2095_v16 = vunpack.c.h.bf16 %v2516_v48 }
 0x750   :  { %2201 = vmatprep.subr.bf16.mxu0 %v3993_v26  ;;  %2242 = vmatprep.subr.bf16.mxu1 %v3999_v42  ;;  %v2847_v3 = vpop.eup %2846 }
 0x753   :  { %2202 = vmatpush1.bf16.msra.mxu0 %v4005_v46  ;;  %2243 = vmatpush1.bf16.msra.mxu1 %v4011_v50  ;;  %v2517_v50 = vld [vmem:[%s4400_s0 + $0x78] sm:$0xff] }
 0x754   :  { %2203 = vmatprep.subr.bf16.mxu0 %v4017_v12  ;;  %2244 = vmatprep.subr.bf16.mxu1 %v4598_v19  ;;  %v2097_v56 = vunpack.c.h.bf16 %v2517_v50  ;;  %v2096_v60 = vunpack.c.l.bf16 %v2517_v50 }
 0x757   :  { %2204 = vmatpush1.bf16.msra.mxu0 %v4599_v24  ;;  %2245 = vmatpush1.bf16.msra.mxu1 %v4600_v63 }
 0x758   :  { %2205 = vmatprep.subr.bf16.mxu0 %v4601_v27  ;;  %2246 = vmatprep.subr.bf16.mxu1 %v4047_v23 }
 0x759   :  { %v2849_v44 = vpop.eup %2848 }
 0x75a   :  { %v2087_v45 = vmul.f32 %v2849_v44, %v2847_v3 }
 0x75b   :  { %2206 = vmatpush1.bf16.msra.mxu0 %v4053_v34  ;;  %2247 = vmatpush1.bf16.msra.mxu1 %v4059_v7 }
 0x75c   :  { %v2088_v41 = vpack.c.bf16 %v2087_v45, %v2087_v45 }
 0x75e   :  { %2515 = vst [vmem:[%s4401_s2 + $0x38] sm:$0xf] %v2088_v41  ;;  %2224 = vmatmul.mubr.bf16.vlgmr.msra.gmra.mrb[60].mxu0 %v2088_v41  ;;  %2265 = vmatmul.mubr.bf16.vlgmr.msra.gmra.mrb[60].mxu1 %v2088_v41 }
 0x811   :  { %v2132_v26 = vpop.f32.mrb[56].mxu0  ;;  %v2173_v42 = vpop.f32.mrb[56].mxu1 }
 0x812   :  { %v2180_v46 = vadd.f32 %v2132_v26, %v2094_v29  ;;  %v2134_v12 = vpop.f32.mrb[57].mxu0  ;;  %v2175_v34 = vpop.f32.mrb[57].mxu1  ;;  %v2182_v8 = vadd.f32 %v2173_v42, %v2096_v60 }
 0x813   :  { %v2181_v7 = vadd.f32 %v2134_v12, %v2095_v16  ;;  %v2136_v23 = vpop.f32.mrb[58].mxu0  ;;  %v2177_v19 = vpop.f32.mrb[58].mxu1  ;;  %v2183_v10 = vadd.f32 %v2175_v34, %v2097_v56 }
 0x814   :  { %v2520_v24 = vmul.f32 -1.442695, %v2180_v46  ;;  %v2137_v63 = vpop.f32.mrb[59].mxu0  ;;  %v2178_v27 = vpop.f32.mrb[59].mxu1 }
 0x815   :  { %v2521_v40 = vmul.f32 -1.442695, %v2181_v7  ;;  %v2522_v47 = vmul.f32 -1.442695, %v2183_v10 }
 0x816   :  { %2850 = vpow2.f32 %v2520_v24 }
 0x817   :  { %2852 = vpow2.f32 %v2521_v40 }
 0x818   :  { %2854 = vpow2.f32 %v2522_v47 }
 0x819   :  { %2856 = vtanh.f32 %v2182_v8 }
 0x820   :  { %v2851_v59 = vpop.eup %2850 }
 0x821   :  { %v2853_v18 = vpop.eup %2852  ;;  %v2280_v36 = vadd.f32 1.0, %v2851_v59 }
 0x822   :  { %v2286_v21 = vadd.f32 1.0, %v2853_v18  ;;  %v2855_v22 = vpop.eup %2854 }
 0x823   :  { %2858 = vrcp.f32 %v2280_v36  ;;  %v2857_v2 = vpop.eup %2856  ;;  %v2293_v4 = vadd.f32 1.0, %v2855_v22 }
 0x824   :  { %2860 = vrcp.f32 %v2286_v21 }
 0x825   :  { %2862 = vrcp.f32 %v2293_v4 }
 0x82d   :  { %v2859_v32 = vpop.eup %2858 }
 0x82e   :  { %v2861_v33 = vpop.eup %2860  ;;  %v2297_v15 = vmul.f32 %v2859_v32, %v2857_v2 }
 0x82f   :  { %v2296_v14 = vmul.f32 %v2861_v33, %v4315_v55  ;;  %v2863_v58 = vpop.eup %2862 }
 0x831   :  { %v2298_v62 = vadd.f32 %v2297_v15, %v2296_v14  ;;  %v2225_v43 = vpop.f32.mrb[60].mxu0  ;;  %v2266_v39 = vpop.f32.mrb[60].mxu1 }
 0x832   :  { %v2273_v51 = vadd.f32 %v2225_v43, %v2187_v38  ;;  %v2227_v61 = vpop.f32.mrb[61].mxu0  ;;  %v2268_v1 = vpop.f32.mrb[61].mxu1  ;;  %v2275_v6 = vadd.f32 %v2266_v39, %v2189_v17 }
 0x833   :  { %2864 = vtanh.f32 %v2298_v62  ;;  %v2274_v35 = vadd.f32 %v2227_v61, %v2188_v5  ;;  %v2229_v37 = vpop.f32.mrb[62].mxu0  ;;  %v2270_v52 = vpop.f32.mrb[62].mxu1  ;;  %v2276_v11 = vadd.f32 %v2268_v1, %v2190_v31 }
 0x834   :  { %v2524_v30 = vmul.f32 -1.442695, %v2273_v51  ;;  %v2230_v53 = vpop.f32.mrb[63].mxu0  ;;  %v2271_v54 = vpop.f32.mrb[63].mxu1 }
 0x835   :  { %v2525_v55 = vmul.f32 -1.442695, %v2274_v35  ;;  %v2526_v28 = vmul.f32 -1.442695, %v2276_v11 }
 0x836   :  { %2866 = vpow2.f32 %v2524_v30 }
 0x837   :  { %2868 = vpow2.f32 %v2525_v55 }
 0x838   :  { %2870 = vpow2.f32 %v2526_v28 }
 0x839   :  { %2872 = vtanh.f32 %v2275_v6 }
 0x83d   :  { %v2865_v0 = vpop.eup %2864 }
 0x83e   :  { %v2300_v25 = vmul.f32 %v2865_v0, %v2863_v58 }
 0x840   :  { %v2867_v9 = vpop.eup %2866  ;;  %v2301_v57 = vpack.c.bf16 %v2300_v25, %v2300_v25 }
 0x841   :  { %v2869_v3 = vpop.eup %2868  ;;  %v2307_v44 = vadd.f32 1.0, %v2867_v9 }
 0x842   :  { %2523 = vst [vmem:[%s4401_s2 + $0x1c] sm:$0xf] %v2301_v57  ;;  %v2313_v45 = vadd.f32 1.0, %v2869_v3  ;;  %v2871_v41 = vpop.eup %2870 }
 0x843   :  { %2874 = vrcp.f32 %v2307_v44  ;;  %v2873_v48 = vpop.eup %2872  ;;  %v2320_v42 = vadd.f32 1.0, %v2871_v41 }
 0x844   :  { %2876 = vrcp.f32 %v2313_v45 }
 0x845   :  { %2878 = vrcp.f32 %v2320_v42 }
 0x84d   :  { %v2875_v29 = vpop.eup %2874 }
 0x84e   :  { %v2877_v16 = vpop.eup %2876  ;;  %v2324_v26 = vmul.f32 %v2875_v29, %v2873_v48 }
 0x84f   :  { %v2323_v46 = vmul.f32 %v2877_v16, %v4359_v49  ;;  %v2879_v12 = vpop.eup %2878 }
 0x851   :  { %v2325_v50 = vadd.f32 %v2324_v26, %v2323_v46 }
 0x853   :  { %2880 = vtanh.f32 %v2325_v50 }
 0x85d   :  { %v2881_v34 = vpop.eup %2880 }
 0x85e   :  { %v2327_v7 = vmul.f32 %v2881_v34, %v2879_v12 }
 0x860   :  { %v2328_v23 = vpack.c.bf16 %v2327_v7, %v2327_v7 }
 0x862   :  { %2527 = vst [vmem:[%s4401_s2 + $0x3c] sm:$0xf] %v2328_v23 }

</bundles_post_ra>
